<compile_context>
chip_gen: v7x
topology: tpu7x:2x2x1
jax: 0.10.0
libtpu: 0.0.40
codegen_flags: <defaults>
</compile_context>

<pallas_src>
import functools

import jax
import jax.numpy as jnp
from jax import lax
from jax.experimental import pallas as pl
from jax.experimental.pallas import tpu as pltpu

EPS = 1e-5
LANE = 128
_CONV_VMEM_BUDGET = 24 << 20     # per-step working-set target (safe on v7x's 64 MiB VMEM)
_VMEM_LIMIT_CAP = 48 << 20


# --------------------------------------------------------------------------- helpers
def _round_up(x, m):
    return ((x + m - 1) // m) * m


def _conv_vmem_bytes(th, w, cin_p, cout_p):
    halo = (th + 2) * (w + 2) * cin_p * 2          # bf16 halo input tile
    wts = 9 * cin_p * cout_p * 2                   # bf16 weights
    yout = th * w * cout_p * 2                     # bf16 output tile
    im2col = th * w * 9 * cin_p * 2                # on-chip patch matrix
    acc = th * w * cout_p * 4                      # f32 matmul result
    bn = (th + 2) * (w + 2) * cin_p * 4            # f32 BN-prologue temp (conv2 only)
    return 2 * halo + 2 * wts + 2 * yout + im2col + acc + bn


def _deconv_vmem_bytes(tm, cm_p, co4p):
    return (2 * tm * cm_p * 2 + 2 * cm_p * co4p * 2 + 2 * tm * co4p * 2
            + tm * cm_p * 4 + tm * co4p * 4)


def _pick_tile_h(h, w, cin_p, cout_p):
    """Largest row tile that divides H, keeps bf16 blocks (16,128)-aligned, fits the budget."""
    for th in (64, 32, 16, 8, 4, 2, 1):
        if (th <= h and h % th == 0 and (th * w) % 16 == 0
                and _conv_vmem_bytes(th, w, cin_p, cout_p) <= _CONV_VMEM_BUDGET):
            return th
    for th in (1, 2, 4, 8, 16, 32, 64):            # smallest aligned tile, ignore the budget
        if th <= h and h % th == 0 and (th * w) % 16 == 0:
            return th
    raise ValueError("tile_h * W must be a multiple of 16 (bf16 sublane packing)")


def _pick_tile_m(m, cm_p, co4p):
    for tm in (2048, 1024, 512, 256, 128, 64, 32, 16):
        if tm <= m and m % tm == 0 and _deconv_vmem_bytes(tm, cm_p, co4p) <= _CONV_VMEM_BUDGET:
            return tm
    return m


def _vmem_limit(nbytes):
    return int(min(_VMEM_LIMIT_CAP, max(32 << 20, 2 * nbytes)))


# --------------------------------------------------------------------------- kernels
def _conv3x3_kernel(*refs, tile_h, width, nt, bn_prologue):
    """One (tile_h, W) row-tile of a 3x3 / pad=1 conv (bias-free) + per-tile BN partials.

    Without prologue: refs = (x, w, y, stats).
    With prologue   : refs = (x, w, scale, shift, y, stats) and relu(x*scale + shift)
                      (training-mode BN of the previous layer) is applied to the halo tile,
                      with the zero-padded border re-masked to post-ReLU zeros.

    x:     (1, TH+2, W+2, Cin_p) bf16 halo tile
    w:     (9*Cin_p, Cout_p)     bf16, rows ordered (ky, kx, cin)
    y:     (TH*W, Cout_p)        bf16 pre-activation
    stats: (1, 2, Cout_p)        f32  [sum; sum_sq] partials for this tile
    """
    if bn_prologue:
        x_ref, w_ref, scale_ref, shift_ref, y_ref, stats_ref = refs
    else:
        x_ref, w_ref, y_ref, stats_ref = refs

    cin = x_ref.shape[-1]
    xt = x_ref[0]                                            # (TH+2, W+2, Cin_p) bf16

    if bn_prologue:
        ti = pl.program_id(0) % nt
        is_first = ti == 0
        is_last = ti == nt - 1
        r = lax.broadcasted_iota(jnp.int32, (tile_h + 2, width + 2, 1), 0)
        c = lax.broadcasted_iota(jnp.int32, (tile_h + 2, width + 2, 1), 1)
        valid = (c >= 1) & (c <= width)
        valid &= (r >= 1) | jnp.logical_not(is_first)
        valid &= (r <= tile_h) | jnp.logical_not(is_last)
        a = jnp.maximum(xt.astype(jnp.float32) * scale_ref[...].reshape(1, 1, cin)
                        + shift_ref[...].reshape(1, 1, cin), 0.0)
        xt = jnp.where(valid, a, 0.0).astype(jnp.bfloat16)

    # On-chip im2col: one (TH*W, 9*Cin_p) patch matrix -> single K = 9*Cin_p MXU matmul.
    taps = []
    for ky in range(3):
        for kx in range(3):
            taps.append(xt[ky:ky + tile_h, kx:kx + width, :].reshape(tile_h * width, cin))
    patch = jnp.concatenate(taps, axis=-1)                   # (TH*W, 9*Cin_p) bf16
    acc = jnp.dot(patch, w_ref[...], preferred_element_type=jnp.float32)
    y_ref[...] = acc.astype(y_ref.dtype)

    # Per-tile BN partial statistics (reduced across tiles by XLA on the host side).
    stats_ref[:, 0:1, :] = jnp.sum(acc, axis=0, keepdims=True)[None]
    stats_ref[:, 1:2, :] = jnp.sum(acc * acc, axis=0, keepdims=True)[None]


def _bn_relu_deconv_kernel(y_ref, scale_ref, shift_ref, w_ref, b_ref, o_ref):
    """BN(train)+ReLU fused with ConvTranspose2d(k=2, s=2) as one lane-dense matmul.

    y: (TM, Cm_p) bf16   scale/shift: (1, Cm_p) f32
    w: (Cm_p, CO4p) bf16 (column = (ky*2+kx)*out_ch + co)   b: (1, CO4p) f32
    o: (TM, CO4p) bf16
    """
    a = jnp.maximum(y_ref[...].astype(jnp.float32) * scale_ref[...] + shift_ref[...], 0.0)
    r = jnp.dot(a.astype(jnp.bfloat16), w_ref[...], preferred_element_type=jnp.float32)
    o_ref[...] = (r + b_ref[...]).astype(o_ref.dtype)


# --------------------------------------------------------------------------- pallas wrappers
def conv3x3_bn_stats(x_tiles, w_packed, *, tile_h, width, nt, cout_p, bn=None):
    """x_tiles: (T, TH+2, W+2, Cin_p) bf16; w_packed: (9*Cin_p, Cout_p) bf16.
    Returns pre-activation y (T*TH*W, Cout_p) bf16 and per-channel [sum, sum_sq] (2, Cout_p)."""
    t_total, _, _, cin_p = x_tiles.shape
    tile_m = tile_h * width
    m = t_total * tile_m

    kern = functools.partial(_conv3x3_kernel, tile_h=tile_h, width=width, nt=nt,
                             bn_prologue=bn is not None)
    in_specs = [
        pl.BlockSpec((1, tile_h + 2, width + 2, cin_p), lambda t: (t, 0, 0, 0)),
        pl.BlockSpec((9 * cin_p, cout_p), lambda t: (0, 0)),
    ]
    args = [x_tiles, w_packed]
    if bn is not None:
        scale, shift = bn
        in_specs += [pl.BlockSpec((1, cin_p), lambda t: (0, 0)),
                     pl.BlockSpec((1, cin_p), lambda t: (0, 0))]
        args += [scale, shift]

    vmem = _conv_vmem_bytes(tile_h, width, cin_p, cout_p)
    y, stats = pl.pallas_call(
        kern,
        grid=(t_total,),
        in_specs=in_specs,
        out_specs=[
            pl.BlockSpec((tile_m, cout_p), lambda t: (t, 0)),
            pl.BlockSpec((1, 2, cout_p), lambda t: (t, 0, 0)),
        ],
        out_shape=[
            jax.ShapeDtypeStruct((m, cout_p), jnp.bfloat16),
            jax.ShapeDtypeStruct((t_total, 2, cout_p), jnp.float32),
        ],
        compiler_params=pltpu.CompilerParams(
            dimension_semantics=("parallel",),
            vmem_limit_bytes=_vmem_limit(vmem)),
    )(*args)
    return y, jnp.sum(stats, axis=0)


def bn_relu_deconv2x2(y, scale, shift, wt, bt):
    m, cm_p = y.shape
    co4p = wt.shape[1]
    tm = _pick_tile_m(m, cm_p, co4p)
    vmem = _deconv_vmem_bytes(tm, cm_p, co4p)
    return pl.pallas_call(
        _bn_relu_deconv_kernel,
        grid=(m // tm,),
        in_specs=[
            pl.BlockSpec((tm, cm_p), lambda i: (i, 0)),
            pl.BlockSpec((1, cm_p), lambda i: (0, 0)),
            pl.BlockSpec((1, cm_p), lambda i: (0, 0)),
            pl.BlockSpec((cm_p, co4p), lambda i: (0, 0)),
            pl.BlockSpec((1, co4p), lambda i: (0, 0)),
        ],
        out_specs=pl.BlockSpec((tm, co4p), lambda i: (i, 0)),
        out_shape=jax.ShapeDtypeStruct((m, co4p), jnp.bfloat16),
        compiler_params=pltpu.CompilerParams(
            dimension_semantics=("parallel",),
            vmem_limit_bytes=_vmem_limit(vmem)),
    )(y, scale, shift, wt, bt)


# --------------------------------------------------------------------------- host-side glue
def _halo_tiles(x_nhwc, tile_h):
    """(N,H,W,C) -> (N*H/tile_h, tile_h+2, W+2, C): spatial zero pad 1 + 1-row halos."""
    n, h, w, c = x_nhwc.shape
    xpad = jnp.pad(x_nhwc, ((0, 0), (1, 1), (1, 1), (0, 0)))
    nt = h // tile_h
    tiles = jnp.stack(
        [xpad[:, t * tile_h:t * tile_h + tile_h + 2] for t in range(nt)], axis=1)
    return tiles.reshape(n * nt, tile_h + 2, w + 2, c)


def _pack_conv_w(w_oihw, cin_p, cout_p):
    cout, cin, _, _ = w_oihw.shape
    w = jnp.transpose(w_oihw, (2, 3, 1, 0))                         # (ky,kx,Cin,Cout)
    w = jnp.pad(w, ((0, 0), (0, 0), (0, cin_p - cin), (0, cout_p - cout)))
    return w.reshape(9 * cin_p, cout_p).astype(jnp.bfloat16)        # rows ordered (ky,kx,cin)


def _pack_deconv_w(w_iohw, cm_p, out_ch, co4p):
    cm = w_iohw.shape[0]
    w = jnp.transpose(w_iohw, (0, 2, 3, 1)).reshape(cm, 4 * out_ch)  # col=(ky*2+kx)*out_ch+co
    w = jnp.pad(w, ((0, cm_p - cm), (0, co4p - 4 * out_ch)))
    return w.astype(jnp.bfloat16)


def _bn_fold(stats, count, gamma, beta, c_pad):
    """Fold train-mode BN (batch mean, biased var) + affine into per-channel scale/shift.
    Variance via E[x^2] - E[x]^2 from f32 partial sums (see review note on cancellation)."""
    g = jnp.pad(gamma, (0, c_pad - gamma.shape[0]))
    b = jnp.pad(beta, (0, c_pad - beta.shape[0]))
    mean = stats[0] / count
    var = jnp.maximum(stats[1] / count - mean * mean, 0.0)
    inv = lax.rsqrt(var + EPS)
    scale = g * inv
    shift = b - mean * scale
    return scale.reshape(1, c_pad), shift.reshape(1, c_pad)


def decoder_block_forward(x_nchw, params):
    """Equivalent of DecoderBlock.forward (training-mode BN). NCHW in / NCHW out like PyTorch."""
    n, cin, h, w = x_nchw.shape
    assert w % 8 == 0, "W must be a multiple of 8 (lane/sublane tiling)"
    mid = params["w1"].shape[0]
    out_ch = params["wt"].shape[1]
    cin_p = _round_up(max(cin, LANE), LANE)
    cm_p = _round_up(max(mid, LANE), LANE)
    co4p = _round_up(max(4 * out_ch, LANE), LANE)

    tile_h = _pick_tile_h(h, w, max(cin_p, cm_p), cm_p)
    nt = h // tile_h
    m = n * h * w

    # NCHW -> NHWC, channel-pad to lane width, bf16 for HBM traffic + MXU.
    x = jnp.transpose(x_nchw, (0, 2, 3, 1))
    x = jnp.pad(x, ((0, 0), (0, 0), (0, 0), (0, cin_p - cin))).astype(jnp.bfloat16)

    w1 = _pack_conv_w(params["w1"], cin_p, cm_p)
    w2 = _pack_conv_w(params["w2"], cm_p, cm_p)
    wt = _pack_deconv_w(params["wt"], cm_p, out_ch, co4p)
    bt = jnp.pad(jnp.tile(params["bt"], 4), (0, co4p - 4 * out_ch)).reshape(1, co4p)

    # conv1 (+ batch stats).  Conv bias intentionally dropped: cancels in training-mode BN.
    y1, stats1 = conv3x3_bn_stats(_halo_tiles(x, tile_h), w1,
                                  tile_h=tile_h, width=w, nt=nt, cout_p=cm_p)
    scale1, shift1 = _bn_fold(stats1, m, params["g1"], params["be1"], cm_p)

    # conv2 with BN1 + ReLU fused into its prologue (+ batch stats).
    y1_tiles = _halo_tiles(y1.reshape(n, h, w, cm_p), tile_h)
    y2, stats2 = conv3x3_bn_stats(y1_tiles, w2, tile_h=tile_h, width=w, nt=nt,
                                  cout_p=cm_p, bn=(scale1, shift1))
    scale2, shift2 = _bn_fold(stats2, m, params["g2"], params["be2"], cm_p)

    # BN2 + ReLU fused into ConvTranspose2d(2, stride=2) -> (m, CO4p) bf16, lane-dense taps.
    o = bn_relu_deconv2x2(y2, scale2, shift2, wt, bt)
    o = o[:, :4 * out_ch].reshape(n, h, w, 2, 2, out_ch)               # (n,h,w,ky,kx,co)
    o = jnp.transpose(o, (0, 1, 3, 2, 4, 5)).reshape(n, 2 * h, 2 * w, out_ch)
    # TODO(synk): fold this tap-unpack + NHWC->NCHW epilogue into a small Pallas pass.
    return jnp.transpose(o, (0, 3, 1, 2)).astype(jnp.float32)          # NHWC -> NCHW


def init_params(key, in_ch, mid_ch, out_ch):
    ks = jax.random.split(key, 6)
    s1 = 1.0 / jnp.sqrt(in_ch * 9.0)
    s2 = 1.0 / jnp.sqrt(mid_ch * 9.0)
    s3 = 1.0 / jnp.sqrt(mid_ch * 4.0)
    return {
        "w1": s1 * jax.random.normal(ks[0], (mid_ch, in_ch, 3, 3), jnp.float32),
        "b1": s1 * jax.random.normal(ks[1], (mid_ch,), jnp.float32),   # unused: cancels in BN
        "g1": jnp.ones((mid_ch,), jnp.float32),
        "be1": jnp.zeros((mid_ch,), jnp.float32),
        "w2": s2 * jax.random.normal(ks[2], (mid_ch, mid_ch, 3, 3), jnp.float32),
        "b2": s2 * jax.random.normal(ks[3], (mid_ch,), jnp.float32),   # unused: cancels in BN
        "g2": jnp.ones((mid_ch,), jnp.float32),
        "be2": jnp.zeros((mid_ch,), jnp.float32),
        "wt": s3 * jax.random.normal(ks[4], (mid_ch, out_ch, 2, 2), jnp.float32),
        "bt": s3 * jax.random.normal(ks[5], (out_ch,), jnp.float32),
    }


if __name__ == "__main__":
    key = jax.random.PRNGKey(0)
    kx, kp = jax.random.split(key)

    N, IN_CH, MID_CH, OUT_CH, HW = 2, 4, 8, 4, 16
    x = jax.random.normal(kx, (N, IN_CH, HW, HW), jnp.float32)         # NCHW like PyTorch
    params = init_params(kp, IN_CH, MID_CH, OUT_CH)

    y = jax.jit(decoder_block_forward)(x, params)
    y = jax.block_until_ready(y)

    assert y.shape == (N, OUT_CH, 2 * HW, 2 * HW), y.shape
    assert bool(jnp.all(jnp.isfinite(y)))
    print("KERNEL_OK")
</pallas_src>

<mosaic_0001>
module attributes {stable_mosaic.version = 11 : i64} {
  func.func @_conv3x3_kernel(%arg0: i32, %arg1: memref<1x18x18x128xbf16, #tpu.memory_space<vmem>>, %arg2: memref<1152x128xbf16, #tpu.memory_space<vmem>>, %arg3: memref<256x128xbf16, #tpu.memory_space<vmem>>, %arg4: memref<1x2x128xf32, #tpu.memory_space<vmem>>) attributes {dimension_semantics = [#tpu.dimension_semantics<parallel>], iteration_bounds = array<i64: 2>, scalar_prefetch = 0 : i64, scratch_operands = 0 : i64, tpu.core_type = #tpu.core_type<tc>, window_params = [{transform_indices = @transform_0, window_bounds = array<i64: 1, 18, 18, 128>}, {pipeline_mode = #tpu.pipeline_mode<synchronous>, transform_indices = @transform_1, window_bounds = array<i64: 1152, 128>}, {transform_indices = @transform_2, window_bounds = array<i64: 256, 128>}, {transform_indices = @transform_3, window_bounds = array<i64: 1, 2, 128>}]} {
    %c0 = arith.constant 0 : index
    %c0_0 = arith.constant 0 : index
    %c0_1 = arith.constant 0 : index
    %c0_2 = arith.constant 0 : index
    %0 = vector.load %arg1[%c0, %c0_0, %c0_1, %c0_2] : memref<1x18x18x128xbf16, #tpu.memory_space<vmem>>, vector<1x18x18x128xbf16>
    %1 = vector.shape_cast %0 : vector<1x18x18x128xbf16> to vector<18x18x128xbf16>
    %2 = vector.extract_strided_slice %1 {offsets = [0, 0, 0], sizes = [16, 16, 128], strides = [1, 1, 1]} : vector<18x18x128xbf16> to vector<16x16x128xbf16>
    %3 = vector.shape_cast %2 : vector<16x16x128xbf16> to vector<256x128xbf16>
    %4 = vector.extract_strided_slice %1 {offsets = [0, 1, 0], sizes = [16, 16, 128], strides = [1, 1, 1]} : vector<18x18x128xbf16> to vector<16x16x128xbf16>
    %5 = vector.shape_cast %4 : vector<16x16x128xbf16> to vector<256x128xbf16>
    %6 = vector.extract_strided_slice %1 {offsets = [0, 2, 0], sizes = [16, 16, 128], strides = [1, 1, 1]} : vector<18x18x128xbf16> to vector<16x16x128xbf16>
    %7 = vector.shape_cast %6 : vector<16x16x128xbf16> to vector<256x128xbf16>
    %8 = vector.extract_strided_slice %1 {offsets = [1, 0, 0], sizes = [16, 16, 128], strides = [1, 1, 1]} : vector<18x18x128xbf16> to vector<16x16x128xbf16>
    %9 = vector.shape_cast %8 : vector<16x16x128xbf16> to vector<256x128xbf16>
    %10 = vector.extract_strided_slice %1 {offsets = [1, 1, 0], sizes = [16, 16, 128], strides = [1, 1, 1]} : vector<18x18x128xbf16> to vector<16x16x128xbf16>
    %11 = vector.shape_cast %10 : vector<16x16x128xbf16> to vector<256x128xbf16>
    %12 = vector.extract_strided_slice %1 {offsets = [1, 2, 0], sizes = [16, 16, 128], strides = [1, 1, 1]} : vector<18x18x128xbf16> to vector<16x16x128xbf16>
    %13 = vector.shape_cast %12 : vector<16x16x128xbf16> to vector<256x128xbf16>
    %14 = vector.extract_strided_slice %1 {offsets = [2, 0, 0], sizes = [16, 16, 128], strides = [1, 1, 1]} : vector<18x18x128xbf16> to vector<16x16x128xbf16>
    %15 = vector.shape_cast %14 : vector<16x16x128xbf16> to vector<256x128xbf16>
    %16 = vector.extract_strided_slice %1 {offsets = [2, 1, 0], sizes = [16, 16, 128], strides = [1, 1, 1]} : vector<18x18x128xbf16> to vector<16x16x128xbf16>
    %17 = vector.shape_cast %16 : vector<16x16x128xbf16> to vector<256x128xbf16>
    %18 = vector.extract_strided_slice %1 {offsets = [2, 2, 0], sizes = [16, 16, 128], strides = [1, 1, 1]} : vector<18x18x128xbf16> to vector<16x16x128xbf16>
    %19 = vector.shape_cast %18 : vector<16x16x128xbf16> to vector<256x128xbf16>
    %20 = tpu.concatenate %3, %5, %7, %9, %11, %13, %15, %17, %19 in 1 : vector<256x128xbf16>, vector<256x128xbf16>, vector<256x128xbf16>, vector<256x128xbf16>, vector<256x128xbf16>, vector<256x128xbf16>, vector<256x128xbf16>, vector<256x128xbf16>, vector<256x128xbf16> -> vector<256x1152xbf16>
    %c0_3 = arith.constant 0 : index
    %c0_4 = arith.constant 0 : index
    %21 = vector.load %arg2[%c0_3, %c0_4] : memref<1152x128xbf16, #tpu.memory_space<vmem>>, vector<1152x128xbf16>
    %cst = arith.constant dense<0.000000e+00> : vector<256x128xf32>
    %22 = tpu.matmul %20, %21, %cst {dimension_numbers = #tpu.dot_dimension_numbers<[1], [0], [0], [1], [0, 0, 1, 1], [], []>} : vector<256x1152xbf16>, vector<1152x128xbf16>, vector<256x128xf32> -> vector<256x128xf32>
    %23 = arith.truncf %22 : vector<256x128xf32> to vector<256x128xbf16>
    %c0_5 = arith.constant 0 : index
    %c0_6 = arith.constant 0 : index
    %24 = vector.load %arg3[%c0_5, %c0_6] : memref<256x128xbf16, #tpu.memory_space<vmem>>, vector<256x128xbf16>
    tpu.vector_store %arg3[%c0_5, %c0_6], %23 {strides = array<i32>} : memref<256x128xbf16, #tpu.memory_space<vmem>>, vector<256x128xbf16>,
    %cst_7 = arith.constant dense<0.000000e+00> : vector<128xf32>
    %25 = vector.multi_reduction <add>, %22, %cst_7 [0] : vector<256x128xf32> to vector<128xf32>
    %26 = vector.shape_cast %25 : vector<128xf32> to vector<1x128xf32>
    %27 = vector.shape_cast %26 : vector<1x128xf32> to vector<1x1x128xf32>
    %c0_8 = arith.constant 0 : index
    %c0_9 = arith.constant 0 : index
    %c0_10 = arith.constant 0 : index
    %28 = vector.load %arg4[%c0_8, %c0_9, %c0_10] : memref<1x2x128xf32, #tpu.memory_space<vmem>>, vector<1x1x128xf32>
    tpu.vector_store %arg4[%c0_8, %c0_9, %c0_10], %27 {strides = array<i32>} : memref<1x2x128xf32, #tpu.memory_space<vmem>>, vector<1x1x128xf32>,
    %29 = arith.mulf %22, %22 : vector<256x128xf32>
    %cst_11 = arith.constant dense<0.000000e+00> : vector<128xf32>
    %30 = vector.multi_reduction <add>, %29, %cst_11 [0] : vector<256x128xf32> to vector<128xf32>
    %31 = vector.shape_cast %30 : vector<128xf32> to vector<1x128xf32>
    %32 = vector.shape_cast %31 : vector<1x128xf32> to vector<1x1x128xf32>
    %c0_12 = arith.constant 0 : index
    %c1 = arith.constant 1 : index
    %c0_13 = arith.constant 0 : index
    %33 = vector.load %arg4[%c0_12, %c1, %c0_13] : memref<1x2x128xf32, #tpu.memory_space<vmem>>, vector<1x1x128xf32>
    tpu.vector_store %arg4[%c0_12, %c1, %c0_13], %32 {strides = array<i32>} : memref<1x2x128xf32, #tpu.memory_space<vmem>>, vector<1x1x128xf32>,
    return
  }
  func.func @transform_0(%arg0: i32) -> (i32, i32, i32, i32) {
    %c0_i32 = arith.constant 0 : i32
    %c0_i32_0 = arith.constant 0 : i32
    %c0_i32_1 = arith.constant 0 : i32
    %c0_i32_2 = arith.constant 0 : i32
    return %arg0, %c0_i32, %c0_i32_0, %c0_i32_1 : i32, i32, i32, i32
  }
  func.func @transform_1(%arg0: i32) -> (i32, i32) {
    %c0_i32 = arith.constant 0 : i32
    %c0_i32_0 = arith.constant 0 : i32
    %c0_i32_1 = arith.constant 0 : i32
    return %c0_i32, %c0_i32_0 : i32, i32
  }
  func.func @transform_2(%arg0: i32) -> (i32, i32) {
    %c0_i32 = arith.constant 0 : i32
    %c0_i32_0 = arith.constant 0 : i32
    return %arg0, %c0_i32 : i32, i32
  }
  func.func @transform_3(%arg0: i32) -> (i32, i32, i32) {
    %c0_i32 = arith.constant 0 : i32
    %c0_i32_0 = arith.constant 0 : i32
    %c0_i32_1 = arith.constant 0 : i32
    return %arg0, %c0_i32, %c0_i32_0 : i32, i32, i32
  }
}

module attributes {stable_mosaic.version = 11 : i64} {
  func.func @_conv3x3_kernel(%arg0: i32, %arg1: memref<1x18x18x128xbf16, #tpu.memory_space<vmem>>, %arg2: memref<1152x128xbf16, #tpu.memory_space<vmem>>, %arg3: memref<1x128xf32, #tpu.memory_space<vmem>>, %arg4: memref<1x128xf32, #tpu.memory_space<vmem>>, %arg5: memref<256x128xbf16, #tpu.memory_space<vmem>>, %arg6: memref<1x2x128xf32, #tpu.memory_space<vmem>>) attributes {dimension_semantics = [#tpu.dimension_semantics<parallel>], iteration_bounds = array<i64: 2>, scalar_prefetch = 0 : i64, scratch_operands = 0 : i64, tpu.core_type = #tpu.core_type<tc>, window_params = [{transform_indices = @transform_0, window_bounds = array<i64: 1, 18, 18, 128>}, {pipeline_mode = #tpu.pipeline_mode<synchronous>, transform_indices = @transform_1, window_bounds = array<i64: 1152, 128>}, {pipeline_mode = #tpu.pipeline_mode<synchronous>, transform_indices = @transform_2, window_bounds = array<i64: 1, 128>}, {pipeline_mode = #tpu.pipeline_mode<synchronous>, transform_indices = @transform_3, window_bounds = array<i64: 1, 128>}, {transform_indices = @transform_4, window_bounds = array<i64: 256, 128>}, {transform_indices = @transform_5, window_bounds = array<i64: 1, 2, 128>}]} {
    %c0 = arith.constant 0 : index
    %c0_0 = arith.constant 0 : index
    %c0_1 = arith.constant 0 : index
    %c0_2 = arith.constant 0 : index
    %0 = vector.load %arg1[%c0, %c0_0, %c0_1, %c0_2] : memref<1x18x18x128xbf16, #tpu.memory_space<vmem>>, vector<1x18x18x128xbf16>
    %1 = vector.shape_cast %0 : vector<1x18x18x128xbf16> to vector<18x18x128xbf16>
    %c1_i32 = arith.constant 1 : i32
    %c0_i32 = arith.constant 0 : i32
    %2 = arith.cmpi eq, %c1_i32, %c0_i32 : i32
    %c1_i32_3 = arith.constant 1 : i32
    %3 = arith.select %2, %c1_i32_3, %c1_i32 : i32
    %4 = arith.remsi %arg0, %3 : i32
    %c0_i32_4 = arith.constant 0 : i32
    %5 = arith.cmpi ne, %4, %c0_i32_4 : i32
    %c0_i32_5 = arith.constant 0 : i32
    %6 = arith.cmpi slt, %4, %c0_i32_5 : i32
    %c0_i32_6 = arith.constant 0 : i32
    %7 = arith.cmpi slt, %3, %c0_i32_6 : i32
    %8 = arith.xori %6, %7 : i1
    %9 = arith.andi %8, %5 : i1
    %10 = arith.addi %4, %3 : i32
    %11 = arith.select %9, %10, %4 : i32
    %c0_i32_7 = arith.constant 0 : i32
    %12 = arith.cmpi eq, %11, %c0_i32_7 : i32
    %c0_i32_8 = arith.constant 0 : i32
    %13 = arith.cmpi eq, %11, %c0_i32_8 : i32
    %14 = tpu.iota {dimensions = array<i32: 0>} : vector<18x18x1xi32>
    %15 = tpu.iota {dimensions = array<i32: 1>} : vector<18x18x1xi32>
    %c1_i32_9 = arith.constant 1 : i32
    %16 = vector.broadcast %c1_i32_9 : i32 to vector<18x18x1xi32>
    %17 = arith.cmpi sge, %15, %16 : vector<18x18x1xi32>
    %c16_i32 = arith.constant 16 : i32
    %18 = vector.broadcast %c16_i32 : i32 to vector<18x18x1xi32>
    %19 = arith.cmpi sle, %15, %18 : vector<18x18x1xi32>
    %20 = arith.andi %17, %19 : vector<18x18x1xi1>
    %c1_i32_10 = arith.constant 1 : i32
    %21 = vector.broadcast %c1_i32_10 : i32 to vector<18x18x1xi32>
    %22 = arith.cmpi sge, %14, %21 : vector<18x18x1xi32>
    %true = arith.constant true
    %23 = arith.xori %12, %true : i1
    %24 = vector.broadcast %23 : i1 to vector<18x18x1xi1>
    %25 = arith.ori %22, %24 : vector<18x18x1xi1>
    %26 = arith.andi %20, %25 : vector<18x18x1xi1>
    %c16_i32_11 = arith.constant 16 : i32
    %27 = vector.broadcast %c16_i32_11 : i32 to vector<18x18x1xi32>
    %28 = arith.cmpi sle, %14, %27 : vector<18x18x1xi32>
    %true_12 = arith.constant true
    %29 = arith.xori %13, %true_12 : i1
    %30 = vector.broadcast %29 : i1 to vector<18x18x1xi1>
    %31 = arith.ori %28, %30 : vector<18x18x1xi1>
    %32 = arith.andi %26, %31 : vector<18x18x1xi1>
    %33 = arith.extf %1 : vector<18x18x128xbf16> to vector<18x18x128xf32>
    %c0_13 = arith.constant 0 : index
    %c0_14 = arith.constant 0 : index
    %34 = vector.load %arg3[%c0_13, %c0_14] : memref<1x128xf32, #tpu.memory_space<vmem>>, vector<1x128xf32>
    %35 = vector.shape_cast %34 : vector<1x128xf32> to vector<1x1x128xf32>
    %36 = vector.broadcast %35 : vector<1x1x128xf32> to vector<18x18x128xf32>
    %37 = arith.mulf %33, %36 : vector<18x18x128xf32>
    %c0_15 = arith.constant 0 : index
    %c0_16 = arith.constant 0 : index
    %38 = vector.load %arg4[%c0_15, %c0_16] : memref<1x128xf32, #tpu.memory_space<vmem>>, vector<1x128xf32>
    %39 = vector.shape_cast %38 : vector<1x128xf32> to vector<1x1x128xf32>
    %40 = vector.broadcast %39 : vector<1x1x128xf32> to vector<18x18x128xf32>
    %41 = arith.addf %37, %40 : vector<18x18x128xf32>
    %cst = arith.constant 0.000000e+00 : f32
    %42 = vector.broadcast %cst : f32 to vector<18x18x128xf32>
    %43 = arith.maximumf %41, %42 : vector<18x18x128xf32>
    %cst_17 = arith.constant 0.000000e+00 : f32
    %44 = vector.shape_cast %32 : vector<18x18x1xi1> to vector<18x18x1xi1>
    %45 = vector.broadcast %44 : vector<18x18x1xi1> to vector<18x18x128xi1>
    %46 = vector.broadcast %cst_17 : f32 to vector<18x18x128xf32>
    %47 = arith.select %45, %43, %46 : vector<18x18x128xi1>, vector<18x18x128xf32>
    %48 = arith.truncf %47 : vector<18x18x128xf32> to vector<18x18x128xbf16>
    %49 = vector.extract_strided_slice %48 {offsets = [0, 0, 0], sizes = [16, 16, 128], strides = [1, 1, 1]} : vector<18x18x128xbf16> to vector<16x16x128xbf16>
    %50 = vector.shape_cast %49 : vector<16x16x128xbf16> to vector<256x128xbf16>
    %51 = vector.extract_strided_slice %48 {offsets = [0, 1, 0], sizes = [16, 16, 128], strides = [1, 1, 1]} : vector<18x18x128xbf16> to vector<16x16x128xbf16>
    %52 = vector.shape_cast %51 : vector<16x16x128xbf16> to vector<256x128xbf16>
    %53 = vector.extract_strided_slice %48 {offsets = [0, 2, 0], sizes = [16, 16, 128], strides = [1, 1, 1]} : vector<18x18x128xbf16> to vector<16x16x128xbf16>
    %54 = vector.shape_cast %53 : vector<16x16x128xbf16> to vector<256x128xbf16>
    %55 = vector.extract_strided_slice %48 {offsets = [1, 0, 0], sizes = [16, 16, 128], strides = [1, 1, 1]} : vector<18x18x128xbf16> to vector<16x16x128xbf16>
    %56 = vector.shape_cast %55 : vector<16x16x128xbf16> to vector<256x128xbf16>
    %57 = vector.extract_strided_slice %48 {offsets = [1, 1, 0], sizes = [16, 16, 128], strides = [1, 1, 1]} : vector<18x18x128xbf16> to vector<16x16x128xbf16>
    %58 = vector.shape_cast %57 : vector<16x16x128xbf16> to vector<256x128xbf16>
    %59 = vector.extract_strided_slice %48 {offsets = [1, 2, 0], sizes = [16, 16, 128], strides = [1, 1, 1]} : vector<18x18x128xbf16> to vector<16x16x128xbf16>
    %60 = vector.shape_cast %59 : vector<16x16x128xbf16> to vector<256x128xbf16>
    %61 = vector.extract_strided_slice %48 {offsets = [2, 0, 0], sizes = [16, 16, 128], strides = [1, 1, 1]} : vector<18x18x128xbf16> to vector<16x16x128xbf16>
    %62 = vector.shape_cast %61 : vector<16x16x128xbf16> to vector<256x128xbf16>
    %63 = vector.extract_strided_slice %48 {offsets = [2, 1, 0], sizes = [16, 16, 128], strides = [1, 1, 1]} : vector<18x18x128xbf16> to vector<16x16x128xbf16>
    %64 = vector.shape_cast %63 : vector<16x16x128xbf16> to vector<256x128xbf16>
    %65 = vector.extract_strided_slice %48 {offsets = [2, 2, 0], sizes = [16, 16, 128], strides = [1, 1, 1]} : vector<18x18x128xbf16> to vector<16x16x128xbf16>
    %66 = vector.shape_cast %65 : vector<16x16x128xbf16> to vector<256x128xbf16>
    %67 = tpu.concatenate %50, %52, %54, %56, %58, %60, %62, %64, %66 in 1 : vector<256x128xbf16>, vector<256x128xbf16>, vector<256x128xbf16>, vector<256x128xbf16>, vector<256x128xbf16>, vector<256x128xbf16>, vector<256x128xbf16>, vector<256x128xbf16>, vector<256x128xbf16> -> vector<256x1152xbf16>
    %c0_18 = arith.constant 0 : index
    %c0_19 = arith.constant 0 : index
    %68 = vector.load %arg2[%c0_18, %c0_19] : memref<1152x128xbf16, #tpu.memory_space<vmem>>, vector<1152x128xbf16>
    %cst_20 = arith.constant dense<0.000000e+00> : vector<256x128xf32>
    %69 = tpu.matmul %67, %68, %cst_20 {dimension_numbers = #tpu.dot_dimension_numbers<[1], [0], [0], [1], [0, 0, 1, 1], [], []>} : vector<256x1152xbf16>, vector<1152x128xbf16>, vector<256x128xf32> -> vector<256x128xf32>
    %70 = arith.truncf %69 : vector<256x128xf32> to vector<256x128xbf16>
    %c0_21 = arith.constant 0 : index
    %c0_22 = arith.constant 0 : index
    %71 = vector.load %arg5[%c0_21, %c0_22] : memref<256x128xbf16, #tpu.memory_space<vmem>>, vector<256x128xbf16>
    tpu.vector_store %arg5[%c0_21, %c0_22], %70 {strides = array<i32>} : memref<256x128xbf16, #tpu.memory_space<vmem>>, vector<256x128xbf16>,
    %cst_23 = arith.constant dense<0.000000e+00> : vector<128xf32>
    %72 = vector.multi_reduction <add>, %69, %cst_23 [0] : vector<256x128xf32> to vector<128xf32>
    %73 = vector.shape_cast %72 : vector<128xf32> to vector<1x128xf32>
    %74 = vector.shape_cast %73 : vector<1x128xf32> to vector<1x1x128xf32>
    %c0_24 = arith.constant 0 : index
    %c0_25 = arith.constant 0 : index
    %c0_26 = arith.constant 0 : index
    %75 = vector.load %arg6[%c0_24, %c0_25, %c0_26] : memref<1x2x128xf32, #tpu.memory_space<vmem>>, vector<1x1x128xf32>
    tpu.vector_store %arg6[%c0_24, %c0_25, %c0_26], %74 {strides = array<i32>} : memref<1x2x128xf32, #tpu.memory_space<vmem>>, vector<1x1x128xf32>,
    %76 = arith.mulf %69, %69 : vector<256x128xf32>
    %cst_27 = arith.constant dense<0.000000e+00> : vector<128xf32>
    %77 = vector.multi_reduction <add>, %76, %cst_27 [0] : vector<256x128xf32> to vector<128xf32>
    %78 = vector.shape_cast %77 : vector<128xf32> to vector<1x128xf32>
    %79 = vector.shape_cast %78 : vector<1x128xf32> to vector<1x1x128xf32>
    %c0_28 = arith.constant 0 : index
    %c1 = arith.constant 1 : index
    %c0_29 = arith.constant 0 : index
    %80 = vector.load %arg6[%c0_28, %c1, %c0_29] : memref<1x2x128xf32, #tpu.memory_space<vmem>>, vector<1x1x128xf32>
    tpu.vector_store %arg6[%c0_28, %c1, %c0_29], %79 {strides = array<i32>} : memref<1x2x128xf32, #tpu.memory_space<vmem>>, vector<1x1x128xf32>,
    return
  }
  func.func @transform_0(%arg0: i32) -> (i32, i32, i32, i32) {
    %c0_i32 = arith.constant 0 : i32
    %c0_i32_0 = arith.constant 0 : i32
    %c0_i32_1 = arith.constant 0 : i32
    %c0_i32_2 = arith.constant 0 : i32
    return %arg0, %c0_i32, %c0_i32_0, %c0_i32_1 : i32, i32, i32, i32
  }
  func.func @transform_1(%arg0: i32) -> (i32, i32) {
    %c0_i32 = arith.constant 0 : i32
    %c0_i32_0 = arith.constant 0 : i32
    %c0_i32_1 = arith.constant 0 : i32
    return %c0_i32, %c0_i32_0 : i32, i32
  }
  func.func @transform_2(%arg0: i32) -> (i32, i32) {
    %c0_i32 = arith.constant 0 : i32
    %c0_i32_0 = arith.constant 0 : i32
    %c0_i32_1 = arith.constant 0 : i32
    return %c0_i32, %c0_i32_0 : i32, i32
  }
  func.func @transform_3(%arg0: i32) -> (i32, i32) {
    %c0_i32 = arith.constant 0 : i32
    %c0_i32_0 = arith.constant 0 : i32
    %c0_i32_1 = arith.constant 0 : i32
    return %c0_i32, %c0_i32_0 : i32, i32
  }
  func.func @transform_4(%arg0: i32) -> (i32, i32) {
    %c0_i32 = arith.constant 0 : i32
    %c0_i32_0 = arith.constant 0 : i32
    return %arg0, %c0_i32 : i32, i32
  }
  func.func @transform_5(%arg0: i32) -> (i32, i32, i32) {
    %c0_i32 = arith.constant 0 : i32
    %c0_i32_0 = arith.constant 0 : i32
    %c0_i32_1 = arith.constant 0 : i32
    return %arg0, %c0_i32, %c0_i32_0 : i32, i32, i32
  }
}

module attributes {stable_mosaic.version = 11 : i64} {
  func.func @_bn_relu_deconv_kernel(%arg0: i32, %arg1: memref<512x128xbf16, #tpu.memory_space<vmem>>, %arg2: memref<1x128xf32, #tpu.memory_space<vmem>>, %arg3: memref<1x128xf32, #tpu.memory_space<vmem>>, %arg4: memref<128x128xbf16, #tpu.memory_space<vmem>>, %arg5: memref<1x128xf32, #tpu.memory_space<vmem>>, %arg6: memref<512x128xbf16, #tpu.memory_space<vmem>>) attributes {dimension_semantics = [#tpu.dimension_semantics<parallel>], iteration_bounds = array<i64: 1>, scalar_prefetch = 0 : i64, scratch_operands = 0 : i64, tpu.core_type = #tpu.core_type<tc>, window_params = [{transform_indices = @transform_0, window_bounds = array<i64: 512, 128>}, {pipeline_mode = #tpu.pipeline_mode<synchronous>, transform_indices = @transform_1, window_bounds = array<i64: 1, 128>}, {pipeline_mode = #tpu.pipeline_mode<synchronous>, transform_indices = @transform_2, window_bounds = array<i64: 1, 128>}, {pipeline_mode = #tpu.pipeline_mode<synchronous>, transform_indices = @transform_3, window_bounds = array<i64: 128, 128>}, {pipeline_mode = #tpu.pipeline_mode<synchronous>, transform_indices = @transform_4, window_bounds = array<i64: 1, 128>}, {transform_indices = @transform_5, window_bounds = array<i64: 512, 128>}]} {
    %c0 = arith.constant 0 : index
    %c0_0 = arith.constant 0 : index
    %0 = vector.load %arg1[%c0, %c0_0] : memref<512x128xbf16, #tpu.memory_space<vmem>>, vector<512x128xbf16>
    %1 = arith.extf %0 : vector<512x128xbf16> to vector<512x128xf32>
    %c0_1 = arith.constant 0 : index
    %c0_2 = arith.constant 0 : index
    %2 = vector.load %arg2[%c0_1, %c0_2] : memref<1x128xf32, #tpu.memory_space<vmem>>, vector<1x128xf32>
    %3 = vector.broadcast %2 : vector<1x128xf32> to vector<512x128xf32>
    %4 = arith.mulf %1, %3 : vector<512x128xf32>
    %c0_3 = arith.constant 0 : index
    %c0_4 = arith.constant 0 : index
    %5 = vector.load %arg3[%c0_3, %c0_4] : memref<1x128xf32, #tpu.memory_space<vmem>>, vector<1x128xf32>
    %6 = vector.broadcast %5 : vector<1x128xf32> to vector<512x128xf32>
    %7 = arith.addf %4, %6 : vector<512x128xf32>
    %cst = arith.constant 0.000000e+00 : f32
    %8 = vector.broadcast %cst : f32 to vector<512x128xf32>
    %9 = arith.maximumf %7, %8 : vector<512x128xf32>
    %10 = arith.truncf %9 : vector<512x128xf32> to vector<512x128xbf16>
    %c0_5 = arith.constant 0 : index
    %c0_6 = arith.constant 0 : index
    %11 = vector.load %arg4[%c0_5, %c0_6] : memref<128x128xbf16, #tpu.memory_space<vmem>>, vector<128x128xbf16>
    %cst_7 = arith.constant dense<0.000000e+00> : vector<512x128xf32>
    %12 = tpu.matmul %10, %11, %cst_7 {dimension_numbers = #tpu.dot_dimension_numbers<[1], [0], [0], [1], [0, 0, 1, 1], [], []>} : vector<512x128xbf16>, vector<128x128xbf16>, vector<512x128xf32> -> vector<512x128xf32>
    %c0_8 = arith.constant 0 : index
    %c0_9 = arith.constant 0 : index
    %13 = vector.load %arg5[%c0_8, %c0_9] : memref<1x128xf32, #tpu.memory_space<vmem>>, vector<1x128xf32>
    %14 = vector.broadcast %13 : vector<1x128xf32> to vector<512x128xf32>
    %15 = arith.addf %12, %14 : vector<512x128xf32>
    %16 = arith.truncf %15 : vector<512x128xf32> to vector<512x128xbf16>
    %c0_10 = arith.constant 0 : index
    %c0_11 = arith.constant 0 : index
    %17 = vector.load %arg6[%c0_10, %c0_11] : memref<512x128xbf16, #tpu.memory_space<vmem>>, vector<512x128xbf16>
    tpu.vector_store %arg6[%c0_10, %c0_11], %16 {strides = array<i32>} : memref<512x128xbf16, #tpu.memory_space<vmem>>, vector<512x128xbf16>,
    return
  }
  func.func @transform_0(%arg0: i32) -> (i32, i32) {
    %c0_i32 = arith.constant 0 : i32
    %c0_i32_0 = arith.constant 0 : i32
    return %arg0, %c0_i32 : i32, i32
  }
  func.func @transform_1(%arg0: i32) -> (i32, i32) {
    %c0_i32 = arith.constant 0 : i32
    %c0_i32_0 = arith.constant 0 : i32
    %c0_i32_1 = arith.constant 0 : i32
    return %c0_i32, %c0_i32_0 : i32, i32
  }
  func.func @transform_2(%arg0: i32) -> (i32, i32) {
    %c0_i32 = arith.constant 0 : i32
    %c0_i32_0 = arith.constant 0 : i32
    %c0_i32_1 = arith.constant 0 : i32
    return %c0_i32, %c0_i32_0 : i32, i32
  }
  func.func @transform_3(%arg0: i32) -> (i32, i32) {
    %c0_i32 = arith.constant 0 : i32
    %c0_i32_0 = arith.constant 0 : i32
    %c0_i32_1 = arith.constant 0 : i32
    return %c0_i32, %c0_i32_0 : i32, i32
  }
  func.func @transform_4(%arg0: i32) -> (i32, i32) {
    %c0_i32 = arith.constant 0 : i32
    %c0_i32_0 = arith.constant 0 : i32
    %c0_i32_1 = arith.constant 0 : i32
    return %c0_i32, %c0_i32_0 : i32, i32
  }
  func.func @transform_5(%arg0: i32) -> (i32, i32) {
    %c0_i32 = arith.constant 0 : i32
    %c0_i32_0 = arith.constant 0 : i32
    return %arg0, %c0_i32 : i32, i32
  }
}

</mosaic_0001>

<bundles_post_ra>
// kernel: tile.8
= control target key start
LH: loop header
LB: loop body
LE: loop exit
PB: predicated region body
PF: predicated region fallthrough
CT: control target
= control target key end

     0   :  { %2 = vsyncpa [#allocation1], 0  ;;  %s44_s6 = smov [#allocation0]   ;;  %s70_s0 = inlined_call_operand.hbm [shape: f32[4], index: 0, kind: input, shape index: {}]   ;;  %s71_s1 = inlined_call_operand.vmem [shape: f32[4,4], index: 1, kind: output, shape index: {}]  }
   0x1   :  { %s9_s7 = sshll.u32 %s44_s6, 4  ;;  %s20_s10 = scalar_lea.hbm %s70_s0, 16  ;;  %s10_s7 = int_to_ptr.vmem [resolvable:$true] %s9_s7 }
   0x2   :  { %p21_p0 = scmp.ne.s32.totalorder %s70_s0, %s20_s10  ;;  %p24_p1 = scmp.lt.u32.totalorder %s20_s10, %s70_s0 }
   0x4   :  { %p26_p2 = pnand %p24_p1, %p21_p0 }
   0x6   :  { %29 = shalt.err (!%p26_p2)
}
   0x7   :  { %s30_s15 = scalar_lea.vmem %s10_s7, 16  ;;  %s34_s16 = scalar_lea.vmem %s10_s7, 32 }
   0x8   :  { %p31_p3 = scmp.ne.s32.totalorder %s10_s7, %s30_s15  ;;  %p35_p4 = scmp.lt.s32.totalorder %s10_s7, %s10_s7 }
   0x9   :  { %p36_p5 = scmp.lt.s32.totalorder %s34_s16, %s30_s15 }
   0xb   :  { %p37_p6 = por %p36_p5, %p35_p4 }
   0xd   :  { %p38_p7 = pnand %p37_p6, %p31_p3 }
   0xf   :  { %41 = shalt.err (!%p38_p7)
}
  0x10   :  { %12 = dma.hbm_to_vmem [thread:$0]  %s70_s0, 16, %s10_s7, [#allocation1]  }
  0x11   :  { %42 = dma.done.wait [#allocation1], 16  }
  0x12   :  { %43 = vsyncadd [#allocation1], 4294967280  ;;  %v16_v0 = vld [vmem:[#allocation0] ss:$0 sm:$0xff] }
  0x13   :  { %17 = vst [vmem:[%s71_s1] sm:$0xf] %v16_v0 }
  0x14   :  { %18 = vsyncpa [#allocation1], 1 }

// kernel: tile.9
= control target key start
LH: loop header
LB: loop body
LE: loop exit
PB: predicated region body
PF: predicated region fallthrough
CT: control target
= control target key end

     0   :  { %vm7_vm0 = vcmask 31744   ;;  %s37_s8 = smov 4   ;;  %s38_s9 = smov 8   ;;  %vm13_vm1 = vcmask 130144   ;;  %vm19_vm2 = vcmask 97344   ;;  %vm25_vm3 = vcmask 64544   ;;  %s55_s0 = inlined_call_operand.vmem [shape: f32[4,4], index: 0, kind: input, shape index: {}]   ;;  %s56_s1 = inlined_call_operand.vmem [shape: f32[16], index: 1, kind: output, shape index: {}]  }
   0x1   :  { %v4_v0 = vld [vmem:[%s55_s0] sm:$0xf]  ;;  %s36_s0 = smov 12  }
   0x2   :  { %5 = vst [vmem:[#allocation1] sm:$0xf] %v4_v0 }
   0x9   :  { %v10_v1 = vld [vmem:[#allocation1 + $0x3] sm:$0x1]   ;;  %v22_v2 = vld [vmem:[#allocation1 + $0x1] sm:$0x1]   ;;  %v6_v3 = vld [vmem:[#allocation1] sm:$0x1]  }
   0xa   :  { %11 = vrot.lane.b32.xlu0 %v10_v1, %s36_s0  ;;  %23 = vrot.lane.b32.xlu1 %v22_v2, %s37_s8  ;;  %v16_v4 = vld [vmem:[#allocation1 + $0x2] sm:$0x1]   ;;  %8 = vst.msk [vmem:[#allocation0] sm:$0x1] %vm7_vm0, %v6_v3  }
   0xe   :  { %17 = vrot.lane.b32.xlu0 %v16_v4, %s38_s9 }
  0x7c   :  { %v12_v5 = vpop.permute.xlu0 %11   ;;  %v24_v6 = vpop.permute.xlu1 %23  }
  0x7d   :  { %14 = vst.msk [vmem:[#allocation0] sm:$0x1] %vm13_vm1, %v12_v5  }
  0x80   :  { %v18_v7 = vpop.permute.xlu0 %17  }
  0x81   :  { %20 = vst.msk [vmem:[#allocation0] sm:$0x1] %vm19_vm2, %v18_v7  }
  0x82   :  { %26 = vst.msk [vmem:[#allocation0] sm:$0x1] %vm25_vm3, %v24_v6  }
  0x89   :  { %v30_v8 = vld [vmem:[#allocation0] sm:$0x1] }
  0x8a   :  { %32 = vst [vmem:[%s56_s1] sm:$0x1] %v30_v8 }

// kernel: decoder_block_forward.5
= control target key start
LH: loop header
LB: loop body
LE: loop exit
PB: predicated region body
PF: predicated region fallthrough
CT: control target
= control target key end

     0   :  { %s2166_s3 = inlined_call_operand.vmem [shape: bf16[128,128], index: 3, kind: input, shape index: {}]   ;;  %s2167_s0 = inlined_call_operand.vmem [shape: bf16[512,128], index: 0, kind: input, shape index: {}]   ;;  %s2168_s1 = inlined_call_operand.vmem [shape: f32[1,128], index: 1, kind: input, shape index: {}]   ;;  %s2169_s2 = inlined_call_operand.vmem [shape: f32[1,128], index: 2, kind: input, shape index: {}]   ;;  %s2170_s4 = inlined_call_operand.vmem [shape: f32[1,128], index: 4, kind: input, shape index: {}]   ;;  %s2171_s5 = inlined_call_operand.vmem [shape: bf16[512,128], index: 5, kind: output, shape index: {}]  }
   0x1   :  { %v1696_v0 = vld [vmem:[%s2166_s3] sm:$0xff]   ;;  %v1697_v1 = vld [vmem:[%s2166_s3 + $0x8] sm:$0xff]   ;;  %v1698_v2 = vld [vmem:[%s2166_s3 + $0x10] sm:$0xff]  }
   0x2   :  { %1600 = vmatprep.subr.bf16.mxu0 %v1696_v0  ;;  %1680 = vmatprep.subr.bf16.mxu1 %v1696_v0  ;;  %v1699_v3 = vld [vmem:[%s2166_s3 + $0x18] sm:$0xff]   ;;  %v1211_v4 = vld [vmem:[%s2167_s0] sm:$0xff]   ;;  %v1498_v9 = vld [vmem:[%s2167_s0 + $0x8] sm:$0xff]  }
   0x3   :  { %1601 = vmatpush3.bf16.msra.mxu0 %v1696_v0  ;;  %1688 = vmatpush3.bf16.msra.mxu1 %v1696_v0  ;;  %v1752_v5 = vld [vmem:[%s2168_s1] ss:$0 sm:$0xff]  ;;  %v1212_v6 = vunpack.c.l.bf16 %v1211_v4  ;;  %v1213_v7 = vunpack.c.h.bf16 %v1211_v4  ;;  %v1514_v10 = vld [vmem:[%s2167_s0 + $0x88] sm:$0xff]   ;;  %v1216_v14 = vunpack.c.l.bf16 %v1498_v9  ;;  %v1217_v15 = vunpack.c.h.bf16 %v1498_v9  ;;  %v1499_v16 = vld [vmem:[%s2167_s0 + $0x10] sm:$0xff]  }
   0x4   :  { %1602 = vmatprep.subr.bf16.mxu0 %v1697_v1  ;;  %1681 = vmatprep.subr.bf16.mxu1 %v1697_v1  ;;  %v1513_v8 = vld [vmem:[%s2167_s0 + $0x80] sm:$0xff]   ;;  %v1280_v19 = vunpack.c.l.bf16 %v1514_v10  ;;  %v1281_v20 = vunpack.c.h.bf16 %v1514_v10  ;;  %v1220_v25 = vunpack.c.l.bf16 %v1499_v16  ;;  %v1515_v38 = vld [vmem:[%s2167_s0 + $0x90] sm:$0xff]   ;;  %v1701_v39 = vld [vmem:[%s2166_s3 + $0x28] sm:$0xff]   ;;  %v1221_v48 = vunpack.c.h.bf16 %v1499_v16 }
   0x5   :  { %v1766_v11 = vld [vmem:[%s2169_s2] ss:$0 sm:$0xff]  ;;  %v1276_v12 = vunpack.c.l.bf16 %v1513_v8  ;;  %v1277_v13 = vunpack.c.h.bf16 %v1513_v8  ;;  %v156_v17 = vmul.f32 %v1212_v6, %v1752_v5  ;;  %v157_v18 = vmul.f32 %v1213_v7, %v1752_v5  ;;  %v1500_v44 = vld [vmem:[%s2167_s0 + $0x18] sm:$0xff]   ;;  %v1702_v58 = vld [vmem:[%s2166_s3 + $0x30] sm:$0xff]  }
   0x6   :  { %v1700_v21 = vld [vmem:[%s2166_s3 + $0x20] sm:$0xff]   ;;  %v158_v24 = vmul.f32 %v1216_v14, %v1752_v5  ;;  %v159_v28 = vmul.f32 %v1217_v15, %v1752_v5  ;;  %v190_v29 = vmul.f32 %v1280_v19, %v1752_v5  ;;  %v191_v33 = vmul.f32 %v1281_v20, %v1752_v5  ;;  %v1516_v53 = vld [vmem:[%s2167_s0 + $0x98] sm:$0xff]  }
   0x7   :  { %1603 = vmatpush3.bf16.msra.mxu0 %v1697_v1  ;;  %1689 = vmatpush3.bf16.msra.mxu1 %v1697_v1  ;;  %v188_v22 = vmul.f32 %v1276_v12, %v1752_v5  ;;  %v189_v23 = vmul.f32 %v1277_v13, %v1752_v5  ;;  %v227_v26 = vadd.f32 %v1766_v11, %v156_v17  ;;  %v1284_v52 = vunpack.c.l.bf16 %v1515_v38  ;;  %v1703_v14 = vld [vmem:[%s2166_s3 + $0x38] sm:$0xff]   ;;  %v1517_v19 = vld [vmem:[%s2167_s0 + $0xa0] sm:$0xff]  }
   0x8   :  { %1604 = vmatprep.subr.bf16.mxu0 %v1698_v2  ;;  %1682 = vmatprep.subr.bf16.mxu1 %v1698_v2  ;;  %v228_v27 = vadd.f32 %v1766_v11, %v157_v18  ;;  %v229_v32 = vadd.f32 %v1766_v11, %v158_v24  ;;  %v230_v36 = vadd.f32 %v1766_v11, %v159_v28  ;;  %v1285_v56 = vunpack.c.h.bf16 %v1515_v38  ;;  %v1502_v28 = vld [vmem:[%s2167_s0 + $0x28] sm:$0xff]  }
   0x9   :  { %v259_v30 = vadd.f32 %v1766_v11, %v188_v22  ;;  %v260_v31 = vadd.f32 %v1766_v11, %v189_v23  ;;  %v291_v34 = vmax.f32 %v227_v26, 0.0  ;;  %v261_v37 = vadd.f32 %v1766_v11, %v190_v29 }
   0xa   :  { %v292_v35 = vmax.f32 %v228_v27, 0.0  ;;  %v293_v42 = vmax.f32 %v229_v32, 0.0  ;;  %v262_v43 = vadd.f32 %v1766_v11, %v191_v33  ;;  %v294_v46 = vmax.f32 %v230_v36, 0.0  ;;  %v1518_v33 = vld [vmem:[%s2167_s0 + $0xa8] sm:$0xff]  }
   0xb   :  { %1605 = vmatpush3.bf16.msra.mxu0 %v1698_v2  ;;  %1690 = vmatpush3.bf16.msra.mxu1 %v1698_v2  ;;  %v323_v40 = vmax.f32 %v259_v30, 0.0  ;;  %v324_v41 = vmax.f32 %v260_v31, 0.0  ;;  %v325_v47 = vmax.f32 %v261_v37, 0.0  ;;  %v160_v51 = vmul.f32 %v1220_v25, %v1752_v5 }
   0xc   :  { %1606 = vmatprep.subr.bf16.mxu0 %v1699_v3  ;;  %1683 = vmatprep.subr.bf16.mxu1 %v1699_v3  ;;  %v355_v45 = vpack.c.bf16 %v292_v35, %v291_v34  ;;  %v326_v50 = vmax.f32 %v262_v43, 0.0  ;;  %v1803_v54 = vpack.c.bf16 %v294_v46, %v293_v42  ;;  %v161_v55 = vmul.f32 %v1221_v48, %v1752_v5  ;;  %v1503_v42 = vld [vmem:[%s2167_s0 + $0x30] sm:$0xff]  }
   0xd   :  { %v371_v49 = vpack.c.bf16 %v324_v41, %v323_v40  ;;  %v1224_v57 = vunpack.c.l.bf16 %v1500_v44  ;;  %v231_v60 = vadd.f32 %v1766_v11, %v160_v51  ;;  %v192_v61 = vmul.f32 %v1284_v52, %v1752_v5 }
   0xe   :  { %v1809_v59 = vpack.c.bf16 %v326_v50, %v325_v47  ;;  %v1225_v62 = vunpack.c.h.bf16 %v1500_v44  ;;  %1616 = vmatprep.mubr.bf16.mxu0 %v355_v45  ;;  %v232_v63 = vadd.f32 %v1766_v11, %v161_v55  ;;  %v193_v0 = vmul.f32 %v1285_v56, %v1752_v5 }
   0xf   :  { %1607 = vmatpush3.bf16.msra.mxu0 %v1699_v3  ;;  %1691 = vmatpush3.bf16.msra.mxu1 %v1699_v3  ;;  %v162_v1 = vmul.f32 %v1224_v57, %v1752_v5  ;;  %v1288_v2 = vunpack.c.l.bf16 %v1516_v53  ;;  %v1501_v3 = vld [vmem:[%s2167_s0 + $0x20] sm:$0xff]   ;;  %v295_v4 = vmax.f32 %v231_v60, 0.0  ;;  %v263_v6 = vadd.f32 %v1766_v11, %v192_v61  ;;  %v1519_v61 = vld [vmem:[%s2167_s0 + $0xb0] sm:$0xff]  }
  0x10   :  { %1608 = vmatprep.subr.bf16.mxu0 %v1700_v21  ;;  %1684 = vmatprep.subr.bf16.mxu1 %v1700_v21  ;;  %v163_v7 = vmul.f32 %v1225_v62, %v1752_v5  ;;  %v1289_v8 = vunpack.c.h.bf16 %v1516_v53  ;;  %v296_v9 = vmax.f32 %v232_v63, 0.0  ;;  %v264_v10 = vadd.f32 %v1766_v11, %v193_v0 }
  0x11   :  { %1648 = vmatprep.mubr.bf16.mxu1 %v371_v49  ;;  %v233_v12 = vadd.f32 %v1766_v11, %v162_v1  ;;  %v194_v13 = vmul.f32 %v1288_v2, %v1752_v5  ;;  %v327_v15 = vmax.f32 %v263_v6, 0.0  ;;  %v1228_v18 = vunpack.c.l.bf16 %v1501_v3  ;;  %v1504_v2 = vld [vmem:[%s2167_s0 + $0x38] sm:$0xff]  }
  0x12   :  { %v234_v16 = vadd.f32 %v1766_v11, %v163_v7  ;;  %v195_v17 = vmul.f32 %v1289_v8, %v1752_v5  ;;  %v357_v20 = vpack.c.bf16 %v296_v9, %v295_v4  ;;  %v1229_v26 = vunpack.c.h.bf16 %v1501_v3 }
  0x13   :  { %1609 = vmatpush3.bf16.msra.mxu0 %v1700_v21  ;;  %1692 = vmatpush3.bf16.msra.mxu1 %v1700_v21  ;;  %v328_v21 = vmax.f32 %v264_v10, 0.0  ;;  %v297_v22 = vmax.f32 %v233_v12, 0.0  ;;  %v265_v23 = vadd.f32 %v1766_v11, %v194_v13  ;;  %v164_v27 = vmul.f32 %v1228_v18, %v1752_v5 }
  0x14   :  { %1610 = vmatprep.subr.bf16.mxu0 %v1701_v39  ;;  %1685 = vmatprep.subr.bf16.mxu1 %v1701_v39  ;;  %v298_v24 = vmax.f32 %v234_v16, 0.0  ;;  %v266_v25 = vadd.f32 %v1766_v11, %v195_v17  ;;  %v1292_v31 = vunpack.c.l.bf16 %v1517_v19  ;;  %v1293_v32 = vunpack.c.h.bf16 %v1517_v19 }
  0x15   :  { %v373_v29 = vpack.c.bf16 %v328_v21, %v327_v15  ;;  %v329_v30 = vmax.f32 %v265_v23, 0.0  ;;  %v165_v36 = vmul.f32 %v1229_v26, %v1752_v5  ;;  %v235_v37 = vadd.f32 %v1766_v11, %v164_v27  ;;  %v1520_v15 = vld [vmem:[%s2167_s0 + $0xb8] sm:$0xff]  }
  0x16   :  { %v1841_v34 = vpack.c.bf16 %v298_v24, %v297_v22  ;;  %v330_v35 = vmax.f32 %v266_v25, 0.0  ;;  %v196_v38 = vmul.f32 %v1292_v31, %v1752_v5  ;;  %v1232_v40 = vunpack.c.l.bf16 %v1502_v28 }
  0x17   :  { %1611 = vmatpush3.bf16.msra.mxu0 %v1701_v39  ;;  %1693 = vmatpush3.bf16.msra.mxu1 %v1701_v39  ;;  %v197_v39 = vmul.f32 %v1293_v32, %v1752_v5  ;;  %v1233_v41 = vunpack.c.h.bf16 %v1502_v28  ;;  %v236_v44 = vadd.f32 %v1766_v11, %v165_v36  ;;  %v299_v45 = vmax.f32 %v235_v37, 0.0 }
  0x18   :  { %1612 = vmatprep.subr.bf16.mxu0 %v1702_v58  ;;  %1686 = vmatprep.subr.bf16.mxu1 %v1702_v58  ;;  %v374_v43 = vpack.c.bf16 %v330_v35, %v329_v30  ;;  %v1296_v46 = vunpack.c.l.bf16 %v1518_v33  ;;  %v267_v47 = vadd.f32 %v1766_v11, %v196_v38  ;;  %v166_v49 = vmul.f32 %v1232_v40, %v1752_v5 }
  0x19   :  { %v268_v48 = vadd.f32 %v1766_v11, %v197_v39  ;;  %v1297_v50 = vunpack.c.h.bf16 %v1518_v33  ;;  %v300_v51 = vmax.f32 %v236_v44, 0.0  ;;  %v167_v52 = vmul.f32 %v1233_v41, %v1752_v5  ;;  %v1521_v33 = vld [vmem:[%s2167_s0 + $0xc0] sm:$0xff]  }
  0x1a   :  { %v198_v53 = vmul.f32 %v1296_v46, %v1752_v5  ;;  %v1236_v55 = vunpack.c.l.bf16 %v1503_v42  ;;  %v331_v56 = vmax.f32 %v267_v47, 0.0  ;;  %v1237_v1 = vunpack.c.h.bf16 %v1503_v42 }
  0x1b   :  { %1613 = vmatpush3.bf16.msra.mxu0 %v1702_v58  ;;  %1694 = vmatpush3.bf16.msra.mxu1 %v1702_v58  ;;  %v332_v57 = vmax.f32 %v268_v48, 0.0  ;;  %v237_v58 = vadd.f32 %v1766_v11, %v166_v49  ;;  %v199_v60 = vmul.f32 %v1297_v50, %v1752_v5  ;;  %v359_v62 = vpack.c.bf16 %v300_v51, %v299_v45  ;;  %v1522_v51 = vld [vmem:[%s2167_s0 + $0xc8] sm:$0xff]  }
  0x1c   :  { %1614 = vmatprep.subr.bf16.mxu0 %v1703_v14  ;;  %1687 = vmatprep.subr.bf16.mxu1 %v1703_v14  ;;  %v238_v63 = vadd.f32 %v1766_v11, %v167_v52  ;;  %v269_v0 = vadd.f32 %v1766_v11, %v198_v53  ;;  %v169_v8 = vmul.f32 %v1237_v1, %v1752_v5  ;;  %v1300_v9 = vunpack.c.l.bf16 %v1519_v61 }
  0x1d   :  { %v375_v3 = vpack.c.bf16 %v332_v57, %v331_v56  ;;  %v301_v4 = vmax.f32 %v237_v58, 0.0  ;;  %v270_v6 = vadd.f32 %v1766_v11, %v199_v60  ;;  %v1301_v13 = vunpack.c.h.bf16 %v1519_v61 }
  0x1e   :  { %v302_v7 = vmax.f32 %v238_v63, 0.0  ;;  %v240_v17 = vadd.f32 %v1766_v11, %v169_v8  ;;  %v200_v18 = vmul.f32 %v1300_v9, %v1752_v5  ;;  %v1241_v19 = vunpack.c.h.bf16 %v1504_v2 }
  0x1f   :  { %1615 = vmatpush3.bf16.msra.mxu0 %v1703_v14  ;;  %1695 = vmatpush3.bf16.msra.mxu1 %v1703_v14  ;;  %v334_v10 = vmax.f32 %v270_v6, 0.0  ;;  %v1240_v14 = vunpack.c.l.bf16 %v1504_v2  ;;  %v201_v23 = vmul.f32 %v1301_v13, %v1752_v5  ;;  %v1304_v28 = vunpack.c.l.bf16 %v1520_v15  ;;  %v1507_v2 = vld [vmem:[%s2167_s0 + $0x50] sm:$0xff]  }
  0x20   :  { %v360_v16 = vpack.c.bf16 %v302_v7, %v301_v4  ;;  %v304_v25 = vmax.f32 %v240_v17, 0.0  ;;  %v271_v26 = vadd.f32 %v1766_v11, %v200_v18  ;;  %v171_v27 = vmul.f32 %v1241_v19, %v1752_v5 }
  0x21   :  { %v170_v24 = vmul.f32 %v1240_v14, %v1752_v5  ;;  %v1305_v31 = vunpack.c.h.bf16 %v1520_v15  ;;  %v202_v38 = vmul.f32 %v1304_v28, %v1752_v5  ;;  %v1309_v50 = vunpack.c.h.bf16 %v1521_v33 }
  0x22   :  { %1617 = vmatmul.mubr.bf16.vlgmr.msra.gmra.mrb[0].mxu0 %v1803_v54  ;;  %1649 = vmatmul.mubr.bf16.vlgmr.msra.gmra.mrb[0].mxu1 %v1809_v59  ;;  %v168_v54 = vmul.f32 %v1236_v55, %v1752_v5  ;;  %v333_v59 = vmax.f32 %v269_v0, 0.0  ;;  %v335_v36 = vmax.f32 %v271_v26, 0.0  ;;  %v242_v37 = vadd.f32 %v1766_v11, %v171_v27 }
  0x23   :  { %1620 = vmatprep.mubr.bf16.mxu0 %v357_v20  ;;  %1652 = vmatprep.mubr.bf16.mxu1 %v373_v29  ;;  %v1505_v20 = vld [vmem:[%s2167_s0 + $0x40] sm:$0xff]   ;;  %v272_v29 = vadd.f32 %v1766_v11, %v201_v23  ;;  %v241_v30 = vadd.f32 %v1766_v11, %v170_v24  ;;  %v203_v41 = vmul.f32 %v1305_v31, %v1752_v5  ;;  %v1312_v1 = vunpack.c.l.bf16 %v1522_v51 }
  0x24   :  { %v239_v12 = vadd.f32 %v1766_v11, %v168_v54  ;;  %v376_v21 = vpack.c.bf16 %v334_v10, %v333_v59  ;;  %v1244_v32 = vunpack.c.l.bf16 %v1505_v20  ;;  %v1245_v42 = vunpack.c.h.bf16 %v1505_v20  ;;  %v1523_v10 = vld [vmem:[%s2167_s0 + $0xd0] sm:$0xff]   ;;  %v1508_v20 = vld [vmem:[%s2167_s0 + $0x58] sm:$0xff]  }
  0x25   :  { %v336_v39 = vmax.f32 %v272_v29, 0.0  ;;  %v305_v40 = vmax.f32 %v241_v30, 0.0  ;;  %v306_v44 = vmax.f32 %v242_v37, 0.0  ;;  %v273_v45 = vadd.f32 %v1766_v11, %v202_v38 }
  0x26   :  { %v303_v22 = vmax.f32 %v239_v12, 0.0  ;;  %v172_v46 = vmul.f32 %v1244_v32, %v1752_v5  ;;  %v274_v48 = vadd.f32 %v1766_v11, %v203_v41  ;;  %v173_v49 = vmul.f32 %v1245_v42, %v1752_v5 }
  0x27   :  { %v377_v47 = vpack.c.bf16 %v336_v39, %v335_v36  ;;  %v362_v52 = vpack.c.bf16 %v306_v44, %v305_v40  ;;  %v337_v53 = vmax.f32 %v273_v45, 0.0  ;;  %v205_v60 = vmul.f32 %v1309_v50, %v1752_v5  ;;  %v1509_v44 = vld [vmem:[%s2167_s0 + $0x60] sm:$0xff]  }
  0x28   :  { %v361_v35 = vpack.c.bf16 %v304_v25, %v303_v22  ;;  %v243_v55 = vadd.f32 %v1766_v11, %v172_v46  ;;  %v338_v57 = vmax.f32 %v274_v48, 0.0  ;;  %v244_v58 = vadd.f32 %v1766_v11, %v173_v49 }
  0x29   :  { %v276_v6 = vadd.f32 %v1766_v11, %v205_v60  ;;  %v1313_v8 = vunpack.c.h.bf16 %v1522_v51  ;;  %v206_v9 = vmul.f32 %v1312_v1, %v1752_v5  ;;  %v1252_v15 = vunpack.c.l.bf16 %v1507_v2  ;;  %v1525_v51 = vld [vmem:[%s2167_s0 + $0xe0] sm:$0xff]  }
  0x2a   :  { %1621 = vmatmul.mubr.bf16.gmra.mrb[4].mxu0 %v1841_v34  ;;  %1653 = vmatmul.mubr.bf16.gmra.mrb[4].mxu1 %v374_v43  ;;  %v1308_v34 = vunpack.c.l.bf16 %v1521_v33  ;;  %v1506_v43 = vld [vmem:[%s2167_s0 + $0x48] sm:$0xff]   ;;  %v308_v4 = vmax.f32 %v244_v58, 0.0  ;;  %v1253_v19 = vunpack.c.h.bf16 %v1507_v2  ;;  %v1316_v24 = vunpack.c.l.bf16 %v1523_v10  ;;  %v1524_v33 = vld [vmem:[%s2167_s0 + $0xd8] sm:$0xff]  }
  0x2b   :  { %1624 = vmatprep.mubr.bf16.mxu0 %v359_v62  ;;  %1656 = vmatprep.mubr.bf16.mxu1 %v375_v3  ;;  %v1248_v61 = vunpack.c.l.bf16 %v1506_v43  ;;  %v307_v62 = vmax.f32 %v243_v55, 0.0  ;;  %v1249_v0 = vunpack.c.h.bf16 %v1506_v43  ;;  %v378_v3 = vpack.c.bf16 %v338_v57, %v337_v53  ;;  %v1510_v2 = vld [vmem:[%s2167_s0 + $0x68] sm:$0xff]  }
  0x2c   :  { %v204_v56 = vmul.f32 %v1308_v34, %v1752_v5  ;;  %v340_v13 = vmax.f32 %v276_v6, 0.0  ;;  %v207_v17 = vmul.f32 %v1313_v8, %v1752_v5  ;;  %v277_v18 = vadd.f32 %v1766_v11, %v206_v9 }
  0x2d   :  { %v174_v54 = vmul.f32 %v1248_v61, %v1752_v5  ;;  %v175_v59 = vmul.f32 %v1249_v0, %v1752_v5  ;;  %v363_v12 = vpack.c.bf16 %v308_v4, %v307_v62  ;;  %v176_v23 = vmul.f32 %v1252_v15, %v1752_v5 }
  0x2e   :  { %v275_v63 = vadd.f32 %v1766_v11, %v204_v56  ;;  %v278_v26 = vadd.f32 %v1766_v11, %v207_v17  ;;  %v341_v27 = vmax.f32 %v277_v18, 0.0  ;;  %v177_v28 = vmul.f32 %v1253_v19, %v1752_v5  ;;  %v1511_v19 = vld [vmem:[%s2167_s0 + $0x70] sm:$0xff]  }
  0x2f   :  { %v245_v14 = vadd.f32 %v1766_v11, %v174_v54  ;;  %v247_v29 = vadd.f32 %v1766_v11, %v176_v23  ;;  %v1317_v30 = vunpack.c.h.bf16 %v1523_v10  ;;  %v208_v31 = vmul.f32 %v1316_v24, %v1752_v5 }
  0x30   :  { %v339_v7 = vmax.f32 %v275_v63, 0.0  ;;  %v1256_v32 = vunpack.c.l.bf16 %v1508_v20  ;;  %v342_v36 = vmax.f32 %v278_v26, 0.0  ;;  %v248_v37 = vadd.f32 %v1766_v11, %v177_v28  ;;  %v1527_v28 = vld [vmem:[%s2167_s0 + $0xf0] sm:$0xff]  }
  0x31   :  { %v309_v22 = vmax.f32 %v245_v14, 0.0  ;;  %v1257_v38 = vunpack.c.h.bf16 %v1508_v20  ;;  %v311_v39 = vmax.f32 %v247_v29, 0.0  ;;  %v209_v40 = vmul.f32 %v1317_v30, %v1752_v5 }
  0x32   :  { %1625 = vmatmul.mubr.bf16.gmra.mrb[8].mxu0 %v360_v16  ;;  %1657 = vmatmul.mubr.bf16.gmra.mrb[8].mxu1 %v376_v21  ;;  %v246_v16 = vadd.f32 %v1766_v11, %v175_v59  ;;  %v379_v21 = vpack.c.bf16 %v340_v13, %v339_v7  ;;  %v279_v41 = vadd.f32 %v1766_v11, %v208_v31  ;;  %v312_v46 = vmax.f32 %v248_v37, 0.0  ;;  %v1526_v7 = vld [vmem:[%s2167_s0 + $0xe8] sm:$0xff]  }
  0x33   :  { %1628 = vmatprep.mubr.bf16.mxu0 %v361_v35  ;;  %1660 = vmatprep.mubr.bf16.mxu1 %v377_v47  ;;  %v178_v42 = vmul.f32 %v1256_v32, %v1752_v5  ;;  %v380_v45 = vpack.c.bf16 %v342_v36, %v341_v27  ;;  %v179_v34 = vmul.f32 %v1257_v38, %v1752_v5  ;;  %v1320_v43 = vunpack.c.l.bf16 %v1524_v33  ;;  %v1512_v38 = vld [vmem:[%s2167_s0 + $0x78] sm:$0xff]  }
  0x34   :  { %v310_v25 = vmax.f32 %v246_v16, 0.0  ;;  %v280_v47 = vadd.f32 %v1766_v11, %v209_v40  ;;  %v343_v48 = vmax.f32 %v279_v41, 0.0  ;;  %v1321_v50 = vunpack.c.h.bf16 %v1524_v33 }
  0x35   :  { %v249_v49 = vadd.f32 %v1766_v11, %v178_v42  ;;  %v365_v53 = vpack.c.bf16 %v312_v46, %v311_v39  ;;  %v210_v55 = vmul.f32 %v1320_v43, %v1752_v5  ;;  %v1260_v56 = vunpack.c.l.bf16 %v1509_v44 }
  0x36   :  { %v364_v35 = vpack.c.bf16 %v310_v25, %v309_v22  ;;  %v344_v57 = vmax.f32 %v280_v47, 0.0  ;;  %v211_v60 = vmul.f32 %v1321_v50, %v1752_v5  ;;  %v1261_v61 = vunpack.c.h.bf16 %v1509_v44  ;;  %v1528_v50 = vld [vmem:[%s2167_s0 + $0xf8] sm:$0xff]  }
  0x37   :  { %v313_v58 = vmax.f32 %v249_v49, 0.0  ;;  %v281_v63 = vadd.f32 %v1766_v11, %v210_v55  ;;  %v180_v0 = vmul.f32 %v1260_v56, %v1752_v5  ;;  %v1324_v1 = vunpack.c.l.bf16 %v1525_v51 }
  0x38   :  { %v282_v4 = vadd.f32 %v1766_v11, %v211_v60  ;;  %v181_v6 = vmul.f32 %v1261_v61, %v1752_v5  ;;  %v1325_v54 = vunpack.c.h.bf16 %v1525_v51  ;;  %v1264_v14 = vunpack.c.l.bf16 %v1510_v2 }
  0x39   :  { %v345_v59 = vmax.f32 %v281_v63, 0.0  ;;  %v251_v8 = vadd.f32 %v1766_v11, %v180_v0  ;;  %v212_v9 = vmul.f32 %v1324_v1, %v1752_v5  ;;  %v1265_v17 = vunpack.c.h.bf16 %v1510_v2 }
  0x3a   :  { %1629 = vmatmul.mubr.bf16.gmra.mrb[12].mxu0 %v362_v52  ;;  %1661 = vmatmul.mubr.bf16.gmra.mrb[12].mxu1 %v378_v3  ;;  %v250_v52 = vadd.f32 %v1766_v11, %v179_v34  ;;  %v381_v3 = vpack.c.bf16 %v344_v57, %v343_v48  ;;  %v346_v10 = vmax.f32 %v282_v4, 0.0  ;;  %v213_v13 = vmul.f32 %v1325_v54, %v1752_v5 }
  0x3b   :  { %1632 = vmatprep.mubr.bf16.mxu0 %v363_v12  ;;  %1664 = vmatprep.mubr.bf16.mxu1 %v379_v21  ;;  %v252_v12 = vadd.f32 %v1766_v11, %v181_v6  ;;  %v283_v16 = vadd.f32 %v1766_v11, %v212_v9  ;;  %v1328_v18 = vunpack.c.l.bf16 %v1526_v7  ;;  %v315_v20 = vmax.f32 %v251_v8, 0.0 }
  0x3c   :  { %v314_v62 = vmax.f32 %v250_v52, 0.0  ;;  %v284_v22 = vadd.f32 %v1766_v11, %v213_v13  ;;  %v182_v23 = vmul.f32 %v1264_v14, %v1752_v5  ;;  %v183_v25 = vmul.f32 %v1265_v17, %v1752_v5 }
  0x3d   :  { %v316_v21 = vmax.f32 %v252_v12, 0.0  ;;  %v347_v24 = vmax.f32 %v283_v16, 0.0  ;;  %v1329_v26 = vunpack.c.h.bf16 %v1526_v7  ;;  %v214_v27 = vmul.f32 %v1328_v18, %v1752_v5 }
  0x3e   :  { %v366_v15 = vpack.c.bf16 %v314_v62, %v313_v58  ;;  %v382_v29 = vpack.c.bf16 %v346_v10, %v345_v59  ;;  %v348_v30 = vmax.f32 %v284_v22, 0.0  ;;  %v253_v31 = vadd.f32 %v1766_v11, %v182_v23 }
  0x3f   :  { %v1268_v32 = vunpack.c.l.bf16 %v1511_v19  ;;  %v254_v33 = vadd.f32 %v1766_v11, %v183_v25  ;;  %v285_v36 = vadd.f32 %v1766_v11, %v214_v27  ;;  %v1269_v37 = vunpack.c.h.bf16 %v1511_v19 }
  0x40   :  { %v367_v39 = vpack.c.bf16 %v316_v21, %v315_v20  ;;  %v383_v40 = vpack.c.bf16 %v348_v30, %v347_v24  ;;  %v1332_v42 = vunpack.c.l.bf16 %v1527_v28  ;;  %v317_v44 = vmax.f32 %v253_v31, 0.0 }
  0x41   :  { %v184_v41 = vmul.f32 %v1268_v32, %v1752_v5  ;;  %v185_v34 = vmul.f32 %v1269_v37, %v1752_v5  ;;  %v1333_v47 = vunpack.c.h.bf16 %v1527_v28  ;;  %v1272_v49 = vunpack.c.l.bf16 %v1512_v38 }
  0x42   :  { %1633 = vmatmul.mubr.bf16.gmra.mrb[16].mxu0 %v364_v35  ;;  %1665 = vmatmul.mubr.bf16.gmra.mrb[16].mxu1 %v380_v45  ;;  %v215_v35 = vmul.f32 %v1329_v26, %v1752_v5  ;;  %v318_v45 = vmax.f32 %v254_v33, 0.0  ;;  %v216_v48 = vmul.f32 %v1332_v42, %v1752_v5  ;;  %v349_v51 = vmax.f32 %v285_v36, 0.0 }
  0x43   :  { %1636 = vmatprep.mubr.bf16.mxu0 %v365_v53  ;;  %1668 = vmatprep.mubr.bf16.mxu1 %v381_v3  ;;  %v255_v43 = vadd.f32 %v1766_v11, %v184_v41  ;;  %v256_v52 = vadd.f32 %v1766_v11, %v185_v34  ;;  %v1273_v55 = vunpack.c.h.bf16 %v1512_v38  ;;  %v217_v57 = vmul.f32 %v1333_v47, %v1752_v5 }
  0x44   :  { %v286_v46 = vadd.f32 %v1766_v11, %v215_v35  ;;  %v287_v58 = vadd.f32 %v1766_v11, %v216_v48  ;;  %v186_v60 = vmul.f32 %v1272_v49, %v1752_v5  ;;  %v1336_v63 = vunpack.c.l.bf16 %v1528_v50 }
  0x45   :  { %v319_v56 = vmax.f32 %v255_v43, 0.0  ;;  %v320_v61 = vmax.f32 %v256_v52, 0.0  ;;  %v187_v62 = vmul.f32 %v1273_v55, %v1752_v5  ;;  %v368_v0 = vpack.c.bf16 %v318_v45, %v317_v44 }
  0x46   :  { %v350_v53 = vmax.f32 %v286_v46, 0.0  ;;  %v288_v1 = vadd.f32 %v1766_v11, %v217_v57  ;;  %v351_v2 = vmax.f32 %v287_v58, 0.0  ;;  %v1337_v3 = vunpack.c.h.bf16 %v1528_v50 }
  0x47   :  { %v257_v6 = vadd.f32 %v1766_v11, %v186_v60  ;;  %v258_v54 = vadd.f32 %v1766_v11, %v187_v62  ;;  %v218_v7 = vmul.f32 %v1336_v63, %v1752_v5  ;;  %v369_v59 = vpack.c.bf16 %v320_v61, %v319_v56 }
  0x48   :  { %v384_v4 = vpack.c.bf16 %v350_v53, %v349_v51  ;;  %v352_v8 = vmax.f32 %v288_v1, 0.0  ;;  %v219_v9 = vmul.f32 %v1337_v3, %v1752_v5  ;;  %v2004_v5 = vld [vmem:[%s2170_s4] ss:$0 sm:$0xff] }
  0x49   :  { %v289_v10 = vadd.f32 %v1766_v11, %v218_v7  ;;  %v321_v14 = vmax.f32 %v257_v6, 0.0 }
  0x4a   :  { %1637 = vmatmul.mubr.bf16.gmra.mrb[20].mxu0 %v366_v15  ;;  %1669 = vmatmul.mubr.bf16.gmra.mrb[20].mxu1 %v382_v29  ;;  %v385_v12 = vpack.c.bf16 %v352_v8, %v351_v2  ;;  %v290_v13 = vadd.f32 %v1766_v11, %v219_v9  ;;  %v322_v15 = vmax.f32 %v258_v54, 0.0 }
  0x4b   :  { %1640 = vmatprep.mubr.bf16.mxu0 %v367_v39  ;;  %1672 = vmatprep.mubr.bf16.mxu1 %v383_v40  ;;  %v353_v16 = vmax.f32 %v289_v10, 0.0 }
  0x4c   :  { %v354_v17 = vmax.f32 %v290_v13, 0.0  ;;  %v370_v18 = vpack.c.bf16 %v322_v15, %v321_v14 }
  0x4e   :  { %v386_v19 = vpack.c.bf16 %v354_v17, %v353_v16 }
  0x52   :  { %1641 = vmatmul.mubr.bf16.gmra.mrb[24].mxu0 %v368_v0  ;;  %1673 = vmatmul.mubr.bf16.gmra.mrb[24].mxu1 %v384_v4 }
  0x53   :  { %1644 = vmatprep.mubr.bf16.mxu0 %v369_v59  ;;  %1676 = vmatprep.mubr.bf16.mxu1 %v385_v12 }
  0x5a   :  { %1645 = vmatmul.mubr.bf16.gmra.mrb[28].mxu0 %v370_v18  ;;  %1677 = vmatmul.mubr.bf16.gmra.mrb[28].mxu1 %v386_v19 }
  0xf5   :  { %v1618_v20 = vpop.f32.mrb[0].mxu0  ;;  %v1650_v21 = vpop.f32.mrb[0].mxu1 }
  0xf6   :  { %v492_v11 = vpop.f32.mrb[1].mxu0  ;;  %v620_v22 = vpop.f32.mrb[1].mxu1  ;;  %v501_v25 = vadd.f32 %v1618_v20, %v2004_v5  ;;  %v629_v26 = vadd.f32 %v1650_v21, %v2004_v5 }
  0xf7   :  { %v1619_v23 = vpop.f32.mrb[2].mxu0  ;;  %v1651_v24 = vpop.f32.mrb[2].mxu1  ;;  %v493_v31 = vadd.f32 %v2004_v5, %v492_v11  ;;  %v621_v32 = vadd.f32 %v2004_v5, %v620_v22 }
  0xf8   :  { %v504_v27 = vadd.f32 %v1619_v23, %v2004_v5  ;;  %v632_v28 = vadd.f32 %v1651_v24, %v2004_v5  ;;  %v495_v29 = vpop.f32.mrb[3].mxu0  ;;  %v623_v30 = vpop.f32.mrb[3].mxu1 }
  0xf9   :  { %v496_v33 = vadd.f32 %v2004_v5, %v495_v29  ;;  %v624_v35 = vadd.f32 %v2004_v5, %v623_v30 }
  0xfa   :  { %v1346_v36 = vpack.c.bf16 %v504_v27, %v501_v25  ;;  %v1426_v37 = vpack.c.bf16 %v632_v28, %v629_v26 }
  0xfb   :  { %v1341_v38 = vpack.c.bf16 %v496_v33, %v493_v31  ;;  %v1421_v39 = vpack.c.bf16 %v624_v35, %v621_v32 }
  0xfc   :  { %1529 = vst [vmem:[%s2171_s5 + $0x8] sm:$0xff] %v1346_v36   ;;  %1545 = vst [vmem:[%s2171_s5 + $0x88] sm:$0xff] %v1426_v37  }
  0xfd   :  { %1342 = vst [vmem:[%s2171_s5] sm:$0xff] %v1341_v38   ;;  %1544 = vst [vmem:[%s2171_s5 + $0x80] sm:$0xff] %v1421_v39   ;;  %v1622_v40 = vpop.f32.mrb[4].mxu0  ;;  %v1654_v41 = vpop.f32.mrb[4].mxu1 }
  0xfe   :  { %v508_v42 = vpop.f32.mrb[5].mxu0  ;;  %v636_v44 = vpop.f32.mrb[5].mxu1  ;;  %v517_v34 = vadd.f32 %v1622_v40, %v2004_v5  ;;  %v645_v43 = vadd.f32 %v1654_v41, %v2004_v5 }
  0xff   :  { %v1623_v45 = vpop.f32.mrb[6].mxu0  ;;  %v1655_v46 = vpop.f32.mrb[6].mxu1  ;;  %v509_v51 = vadd.f32 %v2004_v5, %v508_v42  ;;  %v637_v53 = vadd.f32 %v2004_v5, %v636_v44 }
 0x100   :  { %v520_v47 = vadd.f32 %v1623_v45, %v2004_v5  ;;  %v648_v48 = vadd.f32 %v1655_v46, %v2004_v5  ;;  %v511_v49 = vpop.f32.mrb[7].mxu0  ;;  %v639_v50 = vpop.f32.mrb[7].mxu1 }
 0x101   :  { %v512_v52 = vadd.f32 %v2004_v5, %v511_v49  ;;  %v640_v55 = vadd.f32 %v2004_v5, %v639_v50 }
 0x102   :  { %v1356_v56 = vpack.c.bf16 %v520_v47, %v517_v34  ;;  %v1436_v57 = vpack.c.bf16 %v648_v48, %v645_v43 }
 0x103   :  { %v1351_v58 = vpack.c.bf16 %v512_v52, %v509_v51  ;;  %v1431_v60 = vpack.c.bf16 %v640_v55, %v637_v53 }
 0x104   :  { %1531 = vst [vmem:[%s2171_s5 + $0x18] sm:$0xff] %v1356_v56   ;;  %1547 = vst [vmem:[%s2171_s5 + $0x98] sm:$0xff] %v1436_v57  }
 0x105   :  { %1530 = vst [vmem:[%s2171_s5 + $0x10] sm:$0xff] %v1351_v58   ;;  %1546 = vst [vmem:[%s2171_s5 + $0x90] sm:$0xff] %v1431_v60   ;;  %v1626_v61 = vpop.f32.mrb[8].mxu0  ;;  %v1658_v62 = vpop.f32.mrb[8].mxu1 }
 0x106   :  { %v524_v63 = vpop.f32.mrb[9].mxu0  ;;  %v652_v0 = vpop.f32.mrb[9].mxu1  ;;  %v533_v3 = vadd.f32 %v1626_v61, %v2004_v5  ;;  %v661_v4 = vadd.f32 %v1658_v62, %v2004_v5 }
 0x107   :  { %v1627_v1 = vpop.f32.mrb[10].mxu0  ;;  %v1659_v2 = vpop.f32.mrb[10].mxu1  ;;  %v525_v8 = vadd.f32 %v2004_v5, %v524_v63  ;;  %v653_v9 = vadd.f32 %v2004_v5, %v652_v0 }
 0x108   :  { %v536_v6 = vadd.f32 %v1627_v1, %v2004_v5  ;;  %v664_v54 = vadd.f32 %v1659_v2, %v2004_v5  ;;  %v527_v7 = vpop.f32.mrb[11].mxu0  ;;  %v655_v59 = vpop.f32.mrb[11].mxu1 }
 0x109   :  { %v528_v10 = vadd.f32 %v2004_v5, %v527_v7  ;;  %v656_v12 = vadd.f32 %v2004_v5, %v655_v59 }
 0x10a   :  { %v1366_v13 = vpack.c.bf16 %v536_v6, %v533_v3  ;;  %v1446_v14 = vpack.c.bf16 %v664_v54, %v661_v4 }
 0x10b   :  { %v1361_v15 = vpack.c.bf16 %v528_v10, %v525_v8  ;;  %v1441_v16 = vpack.c.bf16 %v656_v12, %v653_v9 }
 0x10c   :  { %1533 = vst [vmem:[%s2171_s5 + $0x28] sm:$0xff] %v1366_v13   ;;  %1549 = vst [vmem:[%s2171_s5 + $0xa8] sm:$0xff] %v1446_v14  }
 0x10d   :  { %1532 = vst [vmem:[%s2171_s5 + $0x20] sm:$0xff] %v1361_v15   ;;  %1548 = vst [vmem:[%s2171_s5 + $0xa0] sm:$0xff] %v1441_v16   ;;  %v1630_v17 = vpop.f32.mrb[12].mxu0  ;;  %v1662_v18 = vpop.f32.mrb[12].mxu1 }
 0x10e   :  { %v540_v19 = vpop.f32.mrb[13].mxu0  ;;  %v668_v20 = vpop.f32.mrb[13].mxu1  ;;  %v549_v22 = vadd.f32 %v1630_v17, %v2004_v5  ;;  %v677_v23 = vadd.f32 %v1662_v18, %v2004_v5 }
 0x10f   :  { %v1631_v21 = vpop.f32.mrb[14].mxu0  ;;  %v1663_v11 = vpop.f32.mrb[14].mxu1  ;;  %v541_v28 = vadd.f32 %v2004_v5, %v540_v19  ;;  %v669_v29 = vadd.f32 %v2004_v5, %v668_v20 }
 0x110   :  { %v552_v24 = vadd.f32 %v1631_v21, %v2004_v5  ;;  %v680_v25 = vadd.f32 %v1663_v11, %v2004_v5  ;;  %v543_v26 = vpop.f32.mrb[15].mxu0  ;;  %v671_v27 = vpop.f32.mrb[15].mxu1 }
 0x111   :  { %v544_v30 = vadd.f32 %v2004_v5, %v543_v26  ;;  %v672_v31 = vadd.f32 %v2004_v5, %v671_v27 }
 0x112   :  { %v1376_v32 = vpack.c.bf16 %v552_v24, %v549_v22  ;;  %v1456_v33 = vpack.c.bf16 %v680_v25, %v677_v23 }
 0x113   :  { %v1371_v35 = vpack.c.bf16 %v544_v30, %v541_v28  ;;  %v1451_v36 = vpack.c.bf16 %v672_v31, %v669_v29 }
 0x114   :  { %1535 = vst [vmem:[%s2171_s5 + $0x38] sm:$0xff] %v1376_v32   ;;  %1551 = vst [vmem:[%s2171_s5 + $0xb8] sm:$0xff] %v1456_v33  }
 0x115   :  { %1534 = vst [vmem:[%s2171_s5 + $0x30] sm:$0xff] %v1371_v35   ;;  %1550 = vst [vmem:[%s2171_s5 + $0xb0] sm:$0xff] %v1451_v36   ;;  %v1634_v37 = vpop.f32.mrb[16].mxu0  ;;  %v1666_v38 = vpop.f32.mrb[16].mxu1 }
 0x116   :  { %v556_v39 = vpop.f32.mrb[17].mxu0  ;;  %v684_v40 = vpop.f32.mrb[17].mxu1  ;;  %v565_v44 = vadd.f32 %v1634_v37, %v2004_v5  ;;  %v693_v45 = vadd.f32 %v1666_v38, %v2004_v5 }
 0x117   :  { %v1635_v41 = vpop.f32.mrb[18].mxu0  ;;  %v1667_v42 = vpop.f32.mrb[18].mxu1  ;;  %v557_v48 = vadd.f32 %v2004_v5, %v556_v39  ;;  %v685_v49 = vadd.f32 %v2004_v5, %v684_v40 }
 0x118   :  { %v568_v46 = vadd.f32 %v1635_v41, %v2004_v5  ;;  %v696_v34 = vadd.f32 %v1667_v42, %v2004_v5  ;;  %v559_v43 = vpop.f32.mrb[19].mxu0  ;;  %v687_v47 = vpop.f32.mrb[19].mxu1 }
 0x119   :  { %v560_v50 = vadd.f32 %v2004_v5, %v559_v43  ;;  %v688_v51 = vadd.f32 %v2004_v5, %v687_v47 }
 0x11a   :  { %v1386_v53 = vpack.c.bf16 %v568_v46, %v565_v44  ;;  %v1466_v52 = vpack.c.bf16 %v696_v34, %v693_v45 }
 0x11b   :  { %v1381_v55 = vpack.c.bf16 %v560_v50, %v557_v48  ;;  %v1461_v56 = vpack.c.bf16 %v688_v51, %v685_v49 }
 0x11c   :  { %1537 = vst [vmem:[%s2171_s5 + $0x48] sm:$0xff] %v1386_v53   ;;  %1553 = vst [vmem:[%s2171_s5 + $0xc8] sm:$0xff] %v1466_v52  }
 0x11d   :  { %1536 = vst [vmem:[%s2171_s5 + $0x40] sm:$0xff] %v1381_v55   ;;  %1552 = vst [vmem:[%s2171_s5 + $0xc0] sm:$0xff] %v1461_v56   ;;  %v1638_v57 = vpop.f32.mrb[20].mxu0  ;;  %v1670_v58 = vpop.f32.mrb[20].mxu1 }
 0x11e   :  { %v572_v60 = vpop.f32.mrb[21].mxu0  ;;  %v700_v61 = vpop.f32.mrb[21].mxu1  ;;  %v581_v0 = vadd.f32 %v1638_v57, %v2004_v5  ;;  %v709_v1 = vadd.f32 %v1670_v58, %v2004_v5 }
 0x11f   :  { %v1639_v62 = vpop.f32.mrb[22].mxu0  ;;  %v1671_v63 = vpop.f32.mrb[22].mxu1  ;;  %v573_v54 = vadd.f32 %v2004_v5, %v572_v60  ;;  %v701_v7 = vadd.f32 %v2004_v5, %v700_v61 }
 0x120   :  { %v584_v2 = vadd.f32 %v1639_v62, %v2004_v5  ;;  %v712_v3 = vadd.f32 %v1671_v63, %v2004_v5  ;;  %v575_v4 = vpop.f32.mrb[23].mxu0  ;;  %v703_v6 = vpop.f32.mrb[23].mxu1 }
 0x121   :  { %v576_v59 = vadd.f32 %v2004_v5, %v575_v4  ;;  %v704_v8 = vadd.f32 %v2004_v5, %v703_v6 }
 0x122   :  { %v1396_v9 = vpack.c.bf16 %v584_v2, %v581_v0  ;;  %v1476_v10 = vpack.c.bf16 %v712_v3, %v709_v1 }
 0x123   :  { %v1391_v12 = vpack.c.bf16 %v576_v59, %v573_v54  ;;  %v1471_v13 = vpack.c.bf16 %v704_v8, %v701_v7 }
 0x124   :  { %1539 = vst [vmem:[%s2171_s5 + $0x58] sm:$0xff] %v1396_v9   ;;  %1555 = vst [vmem:[%s2171_s5 + $0xd8] sm:$0xff] %v1476_v10  }
 0x125   :  { %1538 = vst [vmem:[%s2171_s5 + $0x50] sm:$0xff] %v1391_v12   ;;  %1554 = vst [vmem:[%s2171_s5 + $0xd0] sm:$0xff] %v1471_v13   ;;  %v1642_v14 = vpop.f32.mrb[24].mxu0  ;;  %v1674_v15 = vpop.f32.mrb[24].mxu1 }
 0x126   :  { %v588_v16 = vpop.f32.mrb[25].mxu0  ;;  %v716_v17 = vpop.f32.mrb[25].mxu1  ;;  %v597_v20 = vadd.f32 %v1642_v14, %v2004_v5  ;;  %v725_v21 = vadd.f32 %v1674_v15, %v2004_v5 }
 0x127   :  { %v1643_v18 = vpop.f32.mrb[26].mxu0  ;;  %v1675_v19 = vpop.f32.mrb[26].mxu1  ;;  %v589_v25 = vadd.f32 %v2004_v5, %v588_v16  ;;  %v717_v26 = vadd.f32 %v2004_v5, %v716_v17 }
 0x128   :  { %v600_v11 = vadd.f32 %v1643_v18, %v2004_v5  ;;  %v728_v22 = vadd.f32 %v1675_v19, %v2004_v5  ;;  %v591_v23 = vpop.f32.mrb[27].mxu0  ;;  %v719_v24 = vpop.f32.mrb[27].mxu1 }
 0x129   :  { %v592_v27 = vadd.f32 %v2004_v5, %v591_v23  ;;  %v720_v28 = vadd.f32 %v2004_v5, %v719_v24 }
 0x12a   :  { %v1406_v29 = vpack.c.bf16 %v600_v11, %v597_v20  ;;  %v1486_v30 = vpack.c.bf16 %v728_v22, %v725_v21 }
 0x12b   :  { %v1401_v31 = vpack.c.bf16 %v592_v27, %v589_v25  ;;  %v1481_v32 = vpack.c.bf16 %v720_v28, %v717_v26 }
 0x12c   :  { %1541 = vst [vmem:[%s2171_s5 + $0x68] sm:$0xff] %v1406_v29   ;;  %1557 = vst [vmem:[%s2171_s5 + $0xe8] sm:$0xff] %v1486_v30  }
 0x12d   :  { %1540 = vst [vmem:[%s2171_s5 + $0x60] sm:$0xff] %v1401_v31   ;;  %1556 = vst [vmem:[%s2171_s5 + $0xe0] sm:$0xff] %v1481_v32   ;;  %v1646_v33 = vpop.f32.mrb[28].mxu0  ;;  %v1678_v35 = vpop.f32.mrb[28].mxu1 }
 0x12e   :  { %v604_v36 = vpop.f32.mrb[29].mxu0  ;;  %v732_v37 = vpop.f32.mrb[29].mxu1  ;;  %v613_v40 = vadd.f32 %v1646_v33, %v2004_v5  ;;  %v741_v41 = vadd.f32 %v1678_v35, %v2004_v5 }
 0x12f   :  { %v1647_v38 = vpop.f32.mrb[30].mxu0  ;;  %v1679_v39 = vpop.f32.mrb[30].mxu1  ;;  %v605_v34 = vadd.f32 %v2004_v5, %v604_v36  ;;  %v733_v43 = vadd.f32 %v2004_v5, %v732_v37 }
 0x130   :  { %v616_v42 = vadd.f32 %v1647_v38, %v2004_v5  ;;  %v744_v44 = vadd.f32 %v1679_v39, %v2004_v5  ;;  %v607_v45 = vpop.f32.mrb[31].mxu0  ;;  %v735_v46 = vpop.f32.mrb[31].mxu1 }
 0x131   :  { %v608_v47 = vadd.f32 %v2004_v5, %v607_v45  ;;  %v736_v48 = vadd.f32 %v2004_v5, %v735_v46 }
 0x132   :  { %v1416_v49 = vpack.c.bf16 %v616_v42, %v613_v40  ;;  %v1496_v50 = vpack.c.bf16 %v744_v44, %v741_v41 }
 0x133   :  { %v1411_v51 = vpack.c.bf16 %v608_v47, %v605_v34  ;;  %v1491_v53 = vpack.c.bf16 %v736_v48, %v733_v43 }
 0x134   :  { %1543 = vst [vmem:[%s2171_s5 + $0x78] sm:$0xff] %v1416_v49   ;;  %1559 = vst [vmem:[%s2171_s5 + $0xf8] sm:$0xff] %v1496_v50  }
 0x135   :  { %1542 = vst [vmem:[%s2171_s5 + $0x70] sm:$0xff] %v1411_v51   ;;  %1558 = vst [vmem:[%s2171_s5 + $0xf0] sm:$0xff] %v1491_v53  }

// kernel: decoder_block_forward.3
= control target key start
LH: loop header
LB: loop body
LE: loop exit
PB: predicated region body
PF: predicated region fallthrough
CT: control target
= control target key end

     0   :  { %s3797_s12 = smov 0   ;;  %s5106_s0 = inlined_call_operand.vmem [shape: bf16[2,18,18,128], index: 0, kind: input, shape index: {}]   ;;  %s5107_s1 = inlined_call_operand.vmem [shape: bf16[1152,128], index: 1, kind: input, shape index: {}]   ;;  %s5108_s2 = inlined_call_operand.vmem [shape: bf16[512,128], index: 2, kind: output, shape index: {0}]   ;;  %s5109_s3 = inlined_call_operand.vmem [shape: f32[2,2,128], index: 3, kind: output, shape index: {1}]  }
   0x1 LB: > { %s3803_s13 = sadd.s32 4294967295, %s3775_s12   ;;  %p2812_p0 = scmp.ge.s32.totalorder %s3775_s12, 1  ;;  %s3775_s12 = sphi %s3797_s12, %s14_s12  }
   0x2   : > { %p140_p1 = scmp.lt.s32.totalorder %s3775_s12, 3 }
   0x4   : > { %p141_p2 = pnand %p2812_p0, %p140_p1 }
   0x6   : > { %144 = sbr.rel (%p141_p2) target bundleno = 570 (0x23a), region = 28 }
   0xd   : > { %v3667_v0 = vld [vmem:[%s5107_s1 + $0x40] sm:$0xff]   ;;  %p168_p3 = scmp.lt.s32.totalorder %s3803_s13, 1  ;;  %v3669_v2 = vld [vmem:[%s5107_s1 + $0x48] sm:$0xff]   ;;  %v3671_v4 = vld [vmem:[%s5107_s1 + $0x50] sm:$0xff]   ;;  %vm238_vm0 = vsmask.f32 3328 }
   0xe   : > { %v3668_v1 = vld [vmem:[%s5107_s1] sm:$0xff]   ;;  %3122 = vmatprep.subr.bf16.mxu0 %v3667_v0  ;;  %3642 = vmatprep.subr.bf16.mxu1 %v3667_v0  ;;  %v3670_v3 = vld [vmem:[%s5107_s1 + $0x8] sm:$0xff]   ;;  %v3672_v5 = vld [vmem:[%s5107_s1 + $0x10] sm:$0xff]   ;;  %vm239_vm1 = vsmask.f32 7440  ;;  %vm673_vm3 = vcmask 1042432  }
   0xf   : > { %3123 = vmatpush3.bf16.msra.mxu0 %v3668_v1  ;;  %3650 = vmatpush3.bf16.msra.mxu1 %v3668_v1  ;;  %s3824_s24 = scalar_select %p168_p3, %s3803_s13, 1  ;;  %v3673_v6 = vld [vmem:[%s5107_s1 + $0x58] sm:$0xff]   ;;  %v3675_v8 = vld [vmem:[%s5107_s1 + $0x60] sm:$0xff]   ;;  %v3677_v10 = vld [vmem:[%s5107_s1 + $0x68] sm:$0xff]   ;;  %vm674_vm4 = vcmask 1046532  }
  0x10   : > { %3124 = vmatprep.subr.bf16.mxu0 %v3669_v2  ;;  %3643 = vmatprep.subr.bf16.mxu1 %v3669_v2  ;;  %v3674_v7 = vld [vmem:[%s5107_s1 + $0x18] sm:$0xff]   ;;  %v3676_v9 = vld [vmem:[%s5107_s1 + $0x20] sm:$0xff]   ;;  %v3678_v16 = vld [vmem:[%s5107_s1 + $0x28] sm:$0xff]  }
  0x11   : > { %s3658_s29 = smul.u32 216, %s3824_s24  ;;  %v3679_v21 = vld [vmem:[%s5107_s1 + $0x70] sm:$0xff]   ;;  %v3681_v36 = vld [vmem:[%s5107_s1 + $0x78] sm:$0xff]   ;;  %vm3887_vm2 = vmor %vm238_vm0, %vm239_vm1  ;;  %s2816_s27 = sshll.u32 %s3824_s24, 1 }
  0x12   : > { %v3680_v31 = vld [vmem:[%s5107_s1 + $0x30] sm:$0xff]   ;;  %v3682_v50 = vld [vmem:[%s5107_s1 + $0x38] sm:$0xff]   ;;  %v3685_v57 = vld [vmem:[%s5107_s1 + $0xc0] sm:$0xff]   ;;  %s182_s30 = scalar_lea.vmem %s5109_s3, %s2816_s27 }
  0x13   : > { %3125 = vmatpush3.bf16.msra.mxu0 %v3670_v3  ;;  %3651 = vmatpush3.bf16.msra.mxu1 %v3670_v3  ;;  %s3842_s9 = scalar_lea.vmem %s5106_s0, %s3658_s29  ;;  %v3686_v60 = vld [vmem:[%s5107_s1 + $0x140] sm:$0xff]   ;;  %vm4080_vm5 = vmor %vm673_vm3, %vm674_vm4 }
  0x14   : > { %3126 = vmatprep.subr.bf16.mxu0 %v3671_v4  ;;  %3644 = vmatprep.subr.bf16.mxu1 %v3671_v4  ;;  %v3851_v11 = vld [vmem:[%s3842_s9] sm:$0xf]  ;;  %v3854_v12 = vld [vmem:[%s3842_s9 + $0x4] sm:$0xf]  ;;  %v3857_v13 = vld [vmem:[%s3842_s9 + $0x8] sm:$0x1] }
  0x15   : > { %v242_v14 = vshrl.u32 %v3851_v11, 16  ;;  %v245_v15 = vshll.u32 %v3851_v11, 16  ;;  %v251_v17 = vshll.u32 %v3854_v12, 16  ;;  %v255_v18 = vshrl.u32 %v3854_v12, 16  ;;  %v3868_v20 = vld [vmem:[%s3842_s9 + $0x90] sm:$0xf] }
  0x16   : > { %v261_v19 = vshll.u32 %v3857_v13, 16  ;;  %v2817_v24 = vrot.slane %v3851_v11, 9  ;;  %v221_v25 = vld [vmem:[%s3842_s9 + $0x94] sm:$0xf]  ;;  %v678_v28 = vrot.slane %v3854_v12, 5  ;;  %v530_v30 = vshrl.u32 %v3868_v20, 16 }
  0x17   : > { %3127 = vmatpush3.bf16.msra.mxu0 %v3672_v5  ;;  %3652 = vmatpush3.bf16.msra.mxu1 %v3672_v5  ;;  %v244_v22 = vrot.slane %v242_v14, 4  ;;  %v247_v23 = vrot.slane %v245_v15, 5  ;;  %v253_v26 = vrot.slane %v251_v17, 5  ;;  %v257_v27 = vrot.slane %v255_v18, 4  ;;  %v222_v29 = vld [vmem:[%s3842_s9 + $0x98] sm:$0x1] }
  0x18   : > { %3128 = vmatprep.subr.bf16.mxu0 %v3673_v6  ;;  %3645 = vmatprep.subr.bf16.mxu1 %v3673_v6  ;;  %v263_v33 = vrot.slane %v261_v19, 5  ;;  %v533_v34 = vshll.u32 %v3868_v20, 16  ;;  %v539_v35 = vshll.u32 %v221_v25, 16  ;;  %v532_v39 = vrot.slane %v530_v30, 4  ;;  %v3912_v61 = vld [vmem:[%s3842_s9 + $0xc] sm:$0xf] }
  0x19   : > { %v248_v32 = vor.u32 %v247_v23, %v244_v22  ;;  %v258_v38 = vor.u32 %v257_v27, %v253_v26  ;;  %v543_v40 = vshrl.u32 %v221_v25, 16  ;;  %v549_v41 = vshll.u32 %v222_v29, 16  ;;  %v3915_v62 = vld [vmem:[%s3842_s9 + $0x10] sm:$0xf]  ;;  %v3687_v0 = vld [vmem:[%s5107_s1 + $0x80] sm:$0xff]  }
  0x1a   : > { %v681_v43 = vrot.slane %v3857_v13, 5  ;;  %v535_v44 = vrot.slane %v533_v34, 5  ;;  %v541_v45 = vrot.slane %v539_v35, 5  ;;  %v3894_v47 = vrot.slane %v678_v28, 4  ;;  %v3688_v1 = vld [vmem:[%s5107_s1 + $0x100] sm:$0xff]   ;;  %v3693_v35 = vld [vmem:[%s5107_s1 + $0xd0] sm:$0xff]  }
  0x1b   : > { %3129 = vmatpush3.bf16.msra.mxu0 %v3674_v7  ;;  %3653 = vmatpush3.bf16.msra.mxu1 %v3674_v7  ;;  %v249_v42 = vrot.slane %v248_v32, 4  ;;  %v259_v46 = vrot.slane %v258_v38, 4  ;;  %v545_v48 = vrot.slane %v543_v40, 4  ;;  %v551_v49 = vrot.slane %v549_v41, 5  ;;  %v3926_v2 = vld [vmem:[%s3842_s9 + $0x14] sm:$0x1] }
  0x1c   : > { %3130 = vmatprep.subr.bf16.mxu0 %v3675_v8  ;;  %3646 = vmatprep.subr.bf16.mxu1 %v3675_v8  ;;  %v536_v52 = vor.u32 %v535_v44, %v532_v39  ;;  %v2835_v59 = vcombine.low %v3851_v11, %v3854_v12  ;;  %v266_v3 = vshrl.u32 %v3912_v61, 16  ;;  %v269_v4 = vshll.u32 %v3912_v61, 16  ;;  %v224_v14 = vld [vmem:[%s3842_s9 + $0xa0] sm:$0xf]  ;;  %v3696_v44 = vld [vmem:[%s5107_s1 + $0x148] sm:$0xff]   ;;  %v3717_v13 = vld [vmem:[%s5107_s1 + $0x118] sm:$0xff]  }
  0x1d   : > { %v254_v51 = vsel %vm3887_vm2, %v249_v42, %v253_v26  ;;  %v264_v53 = vsel %vm3887_vm2, %v259_v46, %v263_v33  ;;  %v546_v54 = vor.u32 %v545_v48, %v541_v45  ;;  %v275_v5 = vshll.u32 %v3915_v62, 16  ;;  %v3690_v26 = vld [vmem:[%s5107_s1 + $0x88] sm:$0xff]  }
  0x1e   : > { %v2851_v55 = vcombine.low %v254_v51, %v264_v53  ;;  %v537_v56 = vrot.slane %v536_v52, 4  ;;  %v3934_v7 = vcombine.low %v3868_v20, %v221_v25  ;;  %v279_v8 = vshrl.u32 %v3915_v62, 16  ;;  %v3694_v51 = vld [vmem:[%s5107_s1 + $0x90] sm:$0xff]  }
  0x1f   : > { %3131 = vmatpush3.bf16.msra.mxu0 %v3676_v9  ;;  %3654 = vmatpush3.bf16.msra.mxu1 %v3676_v9  ;;  %v547_v58 = vrot.slane %v546_v54, 4  ;;  %v285_v9 = vshll.u32 %v3926_v2, 16  ;;  %v268_v17 = vrot.slane %v266_v3, 4  ;;  %v271_v18 = vrot.slane %v269_v4, 5  ;;  %v3698_v54 = vld [vmem:[%s5107_s1 + $0x108] sm:$0xff]  }
  0x20   : > { %3132 = vmatprep.subr.bf16.mxu0 %v3677_v10  ;;  %3647 = vmatprep.subr.bf16.mxu1 %v3677_v10  ;;  %v542_v63 = vsel %vm3887_vm2, %v537_v56, %v541_v45  ;;  %v223_v10 = vld [vmem:[%s3842_s9 + $0x9c] sm:$0xf]  ;;  %v277_v19 = vrot.slane %v275_v5, 5  ;;  %v281_v20 = vrot.slane %v279_v8, 4  ;;  %v563_v29 = vshll.u32 %v224_v14, 16 }
  0x21   : > { %1680 = vmatprep.mubr.bf16.mxu0 %v2851_v55  ;;  %v552_v6 = vsel %vm3887_vm2, %v547_v58, %v551_v49  ;;  %v287_v22 = vrot.slane %v285_v9, 5  ;;  %v554_v23 = vshrl.u32 %v223_v10, 16  ;;  %v557_v25 = vshll.u32 %v223_v10, 16  ;;  %v3974_v55 = vld [vmem:[%s3842_s9 + $0x18] sm:$0xf] }
  0x22   : > { %v3940_v15 = vcombine.low %v542_v63, %v552_v6  ;;  %v272_v27 = vor.u32 %v271_v18, %v268_v17  ;;  %v567_v30 = vshrl.u32 %v224_v14, 16  ;;  %v282_v32 = vor.u32 %v281_v20, %v277_v19  ;;  %v3977_v56 = vld [vmem:[%s3842_s9 + $0x1c] sm:$0xf]  ;;  %v226_v6 = vld [vmem:[%s3842_s9 + $0xa8] sm:$0xf] }
  0x23   : > { %3133 = vmatpush3.bf16.msra.mxu0 %v3678_v16  ;;  %3655 = vmatpush3.bf16.msra.mxu1 %v3678_v16  ;;  %v3689_v16 = vld [vmem:[%s5107_s1 + $0xc8] sm:$0xff]   ;;  %v556_v33 = vrot.slane %v554_v23, 4  ;;  %v559_v34 = vrot.slane %v557_v25, 5  ;;  %v565_v38 = vrot.slane %v563_v29, 5  ;;  %v3695_v58 = vld [vmem:[%s5107_s1 + $0xd8] sm:$0xff]   ;;  %v293_v63 = vshll.u32 %v3974_v55, 16 }
  0x24   : > { %3134 = vmatprep.subr.bf16.mxu0 %v3679_v21  ;;  %3648 = vmatprep.subr.bf16.mxu1 %v3679_v21  ;;  %5123 = vst [vmem:[#allocation2_spill] sm:$0xff] %v3940_v15  ;;  %v225_v21 = vld [vmem:[%s3842_s9 + $0xa4] sm:$0x1]  ;;  %v569_v39 = vrot.slane %v567_v30, 4  ;;  %v283_v41 = vrot.slane %v282_v32, 4  ;;  %v3993_v3 = vcombine.low %v223_v10, %v224_v14  ;;  %v303_v4 = vshrl.u32 %v3977_v56, 16 }
  0x25   : > { %1776 = vmatprep.mubr.bf16.mxu1 %v3940_v15  ;;  %v560_v42 = vor.u32 %v559_v34, %v556_v33  ;;  %v227_v8 = vld [vmem:[%s3842_s9 + $0xac] sm:$0xf]  ;;  %v295_v18 = vrot.slane %v293_v63, 5  ;;  %v228_v10 = vld [vmem:[%s3842_s9 + $0xb0] sm:$0x1]  ;;  %v578_v20 = vshrl.u32 %v226_v6, 16 }
  0x26   : > { %v570_v46 = vor.u32 %v569_v39, %v565_v38  ;;  %v288_v48 = vsel %vm3887_vm2, %v283_v41, %v287_v22  ;;  %v305_v14 = vrot.slane %v303_v4, 4  ;;  %v581_v22 = vshll.u32 %v226_v6, 16  ;;  %v3701_v29 = vld [vmem:[%s5107_s1 + $0xe0] sm:$0xff]   ;;  %v4421_v15 = vld [vmem:[%s3842_s9 + $0x8c] sm:$0x1] }
  0x27   : > { %3135 = vmatpush3.bf16.msra.mxu0 %v3680_v31  ;;  %3656 = vmatpush3.bf16.msra.mxu1 %v3680_v31  ;;  %v573_v31 = vshll.u32 %v225_v21, 16  ;;  %v561_v49 = vrot.slane %v560_v42, 4  ;;  %v587_v25 = vshll.u32 %v227_v8, 16  ;;  %v3702_v33 = vld [vmem:[%s5107_s1 + $0xa0] sm:$0xff]  }
  0x28   : > { %3136 = vmatprep.subr.bf16.mxu0 %v3681_v36  ;;  %3649 = vmatprep.subr.bf16.mxu1 %v3681_v36  ;;  %v273_v36 = vrot.slane %v272_v27, 4  ;;  %v571_v53 = vrot.slane %v570_v46, 4  ;;  %v597_v27 = vshll.u32 %v228_v10, 16  ;;  %v583_v32 = vrot.slane %v581_v22, 5  ;;  %v3707_v10 = vld [vmem:[%s5107_s1 + $0xf0] sm:$0xff]  }
  0x29   : > { %v575_v40 = vrot.slane %v573_v31, 5  ;;  %v580_v31 = vrot.slane %v578_v20, 4  ;;  %v4023_v46 = vcombine.low %v226_v6, %v227_v8  ;;  %v3708_v6 = vld [vmem:[%s5107_s1 + $0x150] sm:$0xff]   ;;  %v231_v22 = vld [vmem:[%s3842_s9 + $0xbc] sm:$0x1] }
  0x2a   : > { %v278_v45 = vsel %vm3887_vm2, %v273_v36, %v277_v19  ;;  %v599_v41 = vrot.slane %v597_v27, 5 }
  0x2b   : > { %3137 = vmatpush3.bf16.msra.mxu0 %v3682_v50  ;;  %3657 = vmatpush3.bf16.msra.mxu1 %v3682_v50  ;;  %v3963_v50 = vcombine.low %v3912_v61, %v3915_v62  ;;  %v3968_v52 = vcombine.low %v278_v45, %v288_v48  ;;  %v4021_v45 = vcombine.low %v3974_v55, %v3977_v56  ;;  %v4026_v48 = vld [vmem:[%s3842_s9 + $0x24] sm:$0xf] }
  0x2c   : > { %3234 = vmatprep.subr.bf16.mxu1 %v3685_v57  ;;  %3346 = vmatprep.subr.bf16.mxu0 %v3686_v60  ;;  %v566_v57 = vsel %vm3887_vm2, %v561_v49, %v565_v38  ;;  %v290_v60 = vshrl.u32 %v3974_v55, 16  ;;  %v3703_v38 = vld [vmem:[%s5107_s1 + $0xe8] sm:$0xff]  }
  0x2d   : > { %v4029_v49 = vld [vmem:[%s3842_s9 + $0x28] sm:$0xf] }
  0x2e   : > { %1681 = vmatmul.mubr.bf16.vlgmr.msra.gmra.mrb[0].mxu0 %v2835_v59  ;;  %1777 = vmatmul.mubr.bf16.vlgmr.msra.gmra.mrb[0].mxu1 %v3934_v7  ;;  %v3985_v59 = vld [vmem:[%s3842_s9 + $0x20] sm:$0x1]  ;;  %v292_v17 = vrot.slane %v290_v60, 4  ;;  %v317_v60 = vshll.u32 %v4026_v48, 16  ;;  %v327_v4 = vshrl.u32 %v4029_v49, 16 }
  0x2f   : > { %3235 = vmatpush3.bf16.msra.mxu1 %v3687_v0  ;;  %3347 = vmatpush3.bf16.msra.mxu0 %v3688_v1  ;;  %v299_v0 = vshll.u32 %v3977_v56, 16  ;;  %v576_v1 = vsel %vm3887_vm2, %v571_v53, %v575_v40  ;;  %v309_v5 = vshll.u32 %v3985_v59, 16  ;;  %v584_v40 = vor.u32 %v583_v32, %v580_v31 }
  0x30   : > { %3236 = vmatprep.subr.bf16.mxu1 %v3689_v16  ;;  %3348 = vmatprep.subr.bf16.mxu0 %v3696_v44  ;;  %v3999_v9 = vcombine.low %v566_v57, %v576_v1  ;;  %v3697_v16 = vld [vmem:[%s5107_s1 + $0x98] sm:$0xff]   ;;  %v296_v23 = vor.u32 %v295_v18, %v292_v17  ;;  %v4037_v57 = vld [vmem:[%s3842_s9 + $0x2c] sm:$0x1]  ;;  %v323_v1 = vshll.u32 %v4029_v49, 16  ;;  %v319_v17 = vrot.slane %v317_v60, 5 }
  0x31   : > { %1688 = vmatprep.mubr.bf16.mxu0 %v3968_v52  ;;  %v301_v19 = vrot.slane %v299_v0, 5  ;;  %v311_v21 = vrot.slane %v309_v5, 5  ;;  %v585_v53 = vrot.slane %v584_v40, 4  ;;  %v4046_v5 = vld [vmem:[%s3842_s9 + $0xb4] sm:$0xf]  ;;  %v333_v18 = vshll.u32 %v4037_v57, 16 }
  0x32   : > { %5124 = vst [vmem:[#allocation3_spill] sm:$0xff] %v3999_v9  ;;  %1784 = vmatprep.mubr.bf16.mxu1 %v3999_v9  ;;  %v297_v34 = vrot.slane %v296_v23, 4  ;;  %v329_v20 = vrot.slane %v327_v4, 4  ;;  %v602_v23 = vshrl.u32 %v4046_v5, 16  ;;  %v3712_v60 = vld [vmem:[%s5107_s1 + $0xb8] sm:$0xff]   ;;  %v4097_v4 = vcombine.low %v4026_v48, %v4029_v49 }
  0x33   : > { %3237 = vmatpush3.bf16.msra.mxu1 %v3690_v26  ;;  %3349 = vmatpush3.bf16.msra.mxu0 %v3698_v54  ;;  %v591_v26 = vshrl.u32 %v227_v8, 16  ;;  %v306_v30 = vor.u32 %v305_v14, %v301_v19  ;;  %v3704_v54 = vld [vmem:[%s5107_s1 + $0xa8] sm:$0xff]  }
  0x34   : > { %3238 = vmatprep.subr.bf16.mxu1 %v3693_v35  ;;  %v589_v35 = vrot.slane %v587_v25, 5  ;;  %v302_v42 = vsel %vm3887_vm2, %v297_v34, %v301_v19  ;;  %v4055_v19 = vld [vmem:[%s3842_s9 + $0xb8] sm:$0xf]  ;;  %v3710_v25 = vld [vmem:[%s5107_s1 + $0x110] sm:$0xff]   ;;  %3350 = vmatprep.subr.bf16.mxu0 %v3708_v6  ;;  %v604_v32 = vrot.slane %v602_v23, 4  ;;  %5128 = vst [vmem:[#allocation5_spill] sm:$0xff] %v4097_v4 }
  0x35   : > { %v593_v36 = vrot.slane %v591_v26, 4  ;;  %v307_v39 = vrot.slane %v306_v30, 4  ;;  %v605_v30 = vshll.u32 %v4046_v5, 16  ;;  %v615_v34 = vshrl.u32 %v4055_v19, 16  ;;  %v3714_v6 = vld [vmem:[%s5107_s1 + $0x1c0] sm:$0xff]  }
  0x36   : > { %1689 = vmatmul.mubr.bf16.gmra.mrb[4].mxu0 %v3963_v50  ;;  %1785 = vmatmul.mubr.bf16.gmra.mrb[4].mxu1 %v3993_v3  ;;  %v590_v8 = vsel %vm3887_vm2, %v585_v53, %v589_v35  ;;  %v4148_v23 = vcombine.low %v4046_v5, %v4055_v19 }
  0x37   : > { %3239 = vmatpush3.bf16.msra.mxu1 %v3694_v51  ;;  %v594_v44 = vor.u32 %v593_v36, %v589_v35  ;;  %v312_v51 = vsel %vm3887_vm2, %v307_v39, %v311_v21  ;;  %v325_v21 = vrot.slane %v323_v1, 5  ;;  %3351 = vmatpush3.bf16.msra.mxu0 %v3710_v25  ;;  %v607_v36 = vrot.slane %v605_v30, 5  ;;  %v3709_v39 = vld [vmem:[%s5107_s1 + $0xb0] sm:$0xff]  }
  0x38   : > { %3240 = vmatprep.subr.bf16.mxu1 %v3695_v58  ;;  %v314_v58 = vshrl.u32 %v4026_v48, 16  ;;  %v4041_v63 = vcombine.low %v302_v42, %v312_v51  ;;  %v3711_v51 = vld [vmem:[%s5107_s1 + $0xf8] sm:$0xff]  }
  0x39   : > { %v595_v0 = vrot.slane %v594_v44, 4  ;;  %v330_v31 = vor.u32 %v329_v20, %v325_v21  ;;  %v617_v44 = vrot.slane %v615_v34, 4  ;;  %v4126_v20 = vsel %vm4080_vm5, %v2817_v24, %v678_v28  ;;  %v3720_v24 = vld [vmem:[%s5107_s1 + $0x160] sm:$0xff]  }
  0x3a   : > { %1696 = vmatprep.mubr.bf16.mxu0 %v4041_v63 }
  0x3b   : > { %3241 = vmatpush3.bf16.msra.mxu1 %v3697_v16  ;;  %v316_v16 = vrot.slane %v314_v58, 4  ;;  %v600_v14 = vsel %vm3887_vm2, %v595_v0, %v599_v41  ;;  %v331_v41 = vrot.slane %v330_v31, 4 }
  0x3c   : > { %3242 = vmatprep.subr.bf16.mxu1 %v3701_v29  ;;  %v4068_v26 = vcombine.low %v590_v8, %v600_v14  ;;  %v335_v29 = vrot.slane %v333_v18, 5  ;;  %v4112_v18 = vsel %vm4080_vm5, %v3894_v47, %v681_v43  ;;  %v4115_v14 = vld [vmem:[%s3842_s9 + $0x30] sm:$0xf]  ;;  %v4135_v47 = vld [vmem:[%s3842_s9 + $0x38] sm:$0x1] }
  0x3d   : > { %v320_v27 = vor.u32 %v319_v17, %v316_v16  ;;  %v3716_v17 = vld [vmem:[%s5107_s1 + $0x158] sm:$0xff]   ;;  %v341_v12 = vshll.u32 %v4115_v14, 16 }
  0x3e   : > { %5125 = vst [vmem:[#allocation4_spill] sm:$0xff] %v4068_v26  ;;  %1697 = vmatmul.mubr.bf16.gmra.mrb[8].mxu0 %v4021_v45  ;;  %1792 = vmatprep.mubr.bf16.mxu1 %v4068_v26  ;;  %v336_v0 = vsel %vm3887_vm2, %v331_v41, %v335_v29 }
  0x3f   : > { %3243 = vmatpush3.bf16.msra.mxu1 %v3702_v33  ;;  %v611_v33 = vshll.u32 %v4055_v19, 16  ;;  %v321_v35 = vrot.slane %v320_v27, 4  ;;  %3352 = vmatprep.subr.bf16.mxu0 %v3716_v17  ;;  %v357_v27 = vshll.u32 %v4135_v47, 16  ;;  %v343_v31 = vrot.slane %v341_v12, 5  ;;  %v4195_v12 = vld [vmem:[%s3842_s9 + $0x50] sm:$0x1] }
  0x40   : > { %3244 = vmatprep.subr.bf16.mxu1 %v3703_v38  ;;  %v621_v38 = vshll.u32 %v231_v22, 16  ;;  %1793 = vmatmul.mubr.bf16.gmra.mrb[8].mxu1 %v4023_v46  ;;  %v338_v22 = vshrl.u32 %v4115_v14, 16 }
  0x41   : > { %v613_v42 = vrot.slane %v611_v33, 5  ;;  %v326_v53 = vsel %vm3887_vm2, %v321_v35, %v325_v21  ;;  %v4118_v21 = vld [vmem:[%s3842_s9 + $0x34] sm:$0xf]  ;;  %3353 = vmatpush3.bf16.msra.mxu0 %v3717_v13  ;;  %v359_v34 = vrot.slane %v357_v27, 5  ;;  %v2867_v35 = vcombine.low %v4126_v20, %v4112_v18 }
  0x42   : > { %v623_v58 = vrot.slane %v621_v38, 5  ;;  %v4102_v8 = vcombine.low %v326_v53, %v336_v0  ;;  %v347_v11 = vshll.u32 %v4118_v21, 16  ;;  %v351_v25 = vshrl.u32 %v4118_v21, 16  ;;  %3354 = vmatprep.subr.bf16.mxu0 %v3720_v24  ;;  %v4162_v38 = vld [vmem:[%s3842_s9 + $0x40] sm:$0xf] }
  0x43   : > { %3245 = vmatpush3.bf16.msra.mxu1 %v3704_v54  ;;  %v608_v54 = vor.u32 %v607_v36, %v604_v32  ;;  %v618_v1 = vor.u32 %v617_v44, %v613_v42  ;;  %v340_v30 = vrot.slane %v338_v22, 4  ;;  %v4159_v36 = vld [vmem:[%s3842_s9 + $0x3c] sm:$0xf]  ;;  %v4178_v0 = vld [vmem:[%s3842_s9 + $0x48] sm:$0xf]  ;;  %v2818_v22 = vrot.slane %v3912_v61, 9 }
  0x44   : > { %3246 = vmatprep.subr.bf16.mxu1 %v3707_v10  ;;  %1704 = vmatprep.mubr.bf16.mxu0 %v4102_v8  ;;  %v349_v32 = vrot.slane %v347_v11, 5  ;;  %v353_v33 = vrot.slane %v351_v25, 4  ;;  %v365_v44 = vshll.u32 %v4159_v36, 16  ;;  %v3725_v11 = vld [vmem:[%s5107_s1 + $0x168] sm:$0xff]   ;;  %v685_v25 = vrot.slane %v3915_v62, 5 }
  0x45   : > { %v609_v16 = vrot.slane %v608_v54, 4  ;;  %v619_v10 = vrot.slane %v618_v1, 4  ;;  %v344_v5 = vor.u32 %v343_v31, %v340_v30  ;;  %v4173_v54 = vcombine.low %v4115_v14, %v4118_v21 }
  0x46   : > { %1705 = vmatmul.mubr.bf16.gmra.mrb[12].mxu0 %v4097_v4  ;;  %v354_v19 = vor.u32 %v353_v33, %v349_v32  ;;  %v367_v17 = vrot.slane %v365_v44, 5  ;;  %v688_v27 = vrot.slane %v3926_v2, 5  ;;  %v386_v31 = vshrl.u32 %v4178_v0, 16  ;;  %v3721_v33 = vld [vmem:[%s5107_s1 + $0x1c8] sm:$0xff]  }
  0x47   : > { %3247 = vmatpush3.bf16.msra.mxu1 %v3709_v39  ;;  %v614_v43 = vsel %vm3887_vm2, %v609_v16, %v613_v42  ;;  %v624_v28 = vsel %vm3887_vm2, %v619_v10, %v623_v58  ;;  %v4165_v39 = vld [vmem:[%s3842_s9 + $0x44] sm:$0x1]  ;;  %v345_v41 = vrot.slane %v344_v5, 4  ;;  %v362_v42 = vshrl.u32 %v4159_v36, 16  ;;  %5130 = vst [vmem:[#allocation7_spill] sm:$0xff] %v4173_v54 }
  0x48   : > { %3248 = vmatprep.subr.bf16.mxu1 %v3711_v51  ;;  %v4152_v29 = vcombine.low %v614_v43, %v624_v28  ;;  %v371_v51 = vshll.u32 %v4162_v38, 16  ;;  %v355_v53 = vrot.slane %v354_v19, 4  ;;  %v375_v58 = vshrl.u32 %v4162_v38, 16  ;;  %v4189_v10 = vld [vmem:[%s3842_s9 + $0x4c] sm:$0xf] }
  0x49   : > { %v350_v1 = vsel %vm3887_vm2, %v345_v41, %v349_v32  ;;  %v364_v16 = vrot.slane %v362_v42, 4  ;;  %v389_v32 = vshll.u32 %v4178_v0, 16  ;;  %v395_v61 = vshll.u32 %v4189_v10, 16  ;;  %v3723_v19 = vld [vmem:[%s5107_s1 + $0x188] sm:$0xff]  }
  0x4a   : > { %5129 = vst [vmem:[#allocation6_spill] sm:$0xff] %v4152_v29  ;;  %1800 = vmatprep.mubr.bf16.mxu1 %v4152_v29  ;;  %v373_v18 = vrot.slane %v371_v51, 5  ;;  %v360_v20 = vsel %vm3887_vm2, %v355_v53, %v359_v34  ;;  %v377_v13 = vrot.slane %v375_v58, 4  ;;  %v686_v62 = vsel %vm4080_vm5, %v2818_v22, %v685_v25  ;;  %v3726_v41 = vld [vmem:[%s5107_s1 + $0x128] sm:$0xff]  }
  0x4b   : > { %3249 = vmatpush3.bf16.msra.mxu1 %v3712_v60  ;;  %v381_v60 = vshll.u32 %v4165_v39, 16  ;;  %v4200_v24 = vcombine.low %v350_v1, %v360_v20  ;;  %v368_v28 = vor.u32 %v367_v17, %v364_v16  ;;  %v687_v5 = vrot.slane %v685_v25, 4  ;;  %v4239_v20 = vld [vmem:[%s3842_s9 + $0x58] sm:$0xf]  ;;  %v4248_v25 = vld [vmem:[%s3842_s9 + $0x5c] sm:$0x1] }
  0x4c   : > { %3458 = vmatprep.subr.bf16.mxu1 %v3714_v6  ;;  %1801 = vmatmul.mubr.bf16.gmra.mrb[12].mxu1 %v4148_v23  ;;  %v3715_v6 = vld [vmem:[%s5107_s1 + $0x180] sm:$0xff]   ;;  %v378_v30 = vor.u32 %v377_v13, %v373_v18  ;;  %v399_v2 = vshrl.u32 %v4189_v10, 16  ;;  %v388_v44 = vrot.slane %v386_v31, 4  ;;  %v391_v51 = vrot.slane %v389_v32, 5  ;;  %v3728_v13 = vld [vmem:[%s5107_s1 + $0x1d0] sm:$0xff]  }
  0x4d   : > { %1841 = vmatprep.mubr.bf16.mxu1 %v3963_v50  ;;  %v3722_v50 = vld [vmem:[%s5107_s1 + $0x120] sm:$0xff]   ;;  %v383_v43 = vrot.slane %v381_v60, 5  ;;  %1712 = vmatprep.mubr.bf16.mxu0 %v4200_v24  ;;  %v369_v34 = vrot.slane %v368_v28, 4  ;;  %v397_v53 = vrot.slane %v395_v61, 5  ;;  %v689_v60 = vsel %vm4080_vm5, %v687_v5, %v688_v27 }
  0x4e   : > { %3355 = vmatpush3.bf16.msra.mxu0 %v3722_v50  ;;  %v379_v42 = vrot.slane %v378_v30, 4  ;;  %v401_v50 = vrot.slane %v399_v2, 4  ;;  %v405_v1 = vshll.u32 %v4195_v12, 16  ;;  %v4231_v16 = vcombine.low %v4159_v36, %v4162_v38  ;;  %v4260_v2 = vld [vmem:[%s3842_s9 + $0x60] sm:$0xf] }
  0x4f   : > { %3356 = vmatprep.subr.bf16.mxu0 %v3725_v11  ;;  %1713 = vmatmul.mubr.bf16.gmra.mrb[16].mxu0 %v4173_v54  ;;  %v374_v58 = vsel %vm3887_vm2, %v369_v34, %v373_v18  ;;  %v392_v17 = vor.u32 %v391_v51, %v388_v44  ;;  %v4236_v18 = vld [vmem:[%s3842_s9 + $0x54] sm:$0xf]  ;;  %v2819_v28 = vrot.slane %v3974_v55, 9  ;;  %v692_v30 = vrot.slane %v3977_v56, 5  ;;  %v4265_v44 = vld [vmem:[%s3842_s9 + $0x64] sm:$0xf] }
  0x50   : > { %5131 = vst [vmem:[#allocation8_spill] sm:$0xff] %v4231_v16  ;;  %v402_v11 = vor.u32 %v401_v50, %v397_v53  ;;  %v695_v31 = vrot.slane %v3985_v59, 5  ;;  %v410_v32 = vshrl.u32 %v4236_v18, 16  ;;  %v419_v55 = vshll.u32 %v4239_v20, 16  ;;  %v3729_v51 = vld [vmem:[%s5107_s1 + $0x190] sm:$0xff]  }
  0x51   : > { %v393_v27 = vrot.slane %v392_v17, 4  ;;  %v423_v34 = vshrl.u32 %v4239_v20, 16  ;;  %v694_v5 = vrot.slane %v692_v30, 4  ;;  %v429_v50 = vshll.u32 %v4248_v25, 16 }
  0x52   : > { %3357 = vmatpush3.bf16.msra.mxu0 %v3726_v41  ;;  %v403_v61 = vrot.slane %v402_v11, 4  ;;  %v412_v56 = vrot.slane %v410_v32, 4  ;;  %v2820_v11 = vrot.slane %v4026_v48, 9  ;;  %v4296_v48 = vld [vmem:[%s3842_s9 + $0x68] sm:$0x1] }
  0x54   : > { %1842 = vmatmul.mubr.bf16.vlgmr.msra.gmra.mrb[16].mxu1 %v2867_v35  ;;  %v384_v35 = vsel %vm3887_vm2, %v379_v42, %v383_v43  ;;  %v407_v43 = vrot.slane %v405_v1, 5  ;;  %v421_v42 = vrot.slane %v419_v55, 5  ;;  %v3731_v1 = vld [vmem:[%s5107_s1 + $0x170] sm:$0xff]   ;;  %v443_v55 = vshll.u32 %v4265_v44, 16 }
  0x55   : > { %3459 = vmatpush3.bf16.msra.mxu1 %v3715_v6  ;;  %1849 = vmatprep.mubr.bf16.mxu1 %v4021_v45  ;;  %v4233_v6 = vcombine.low %v686_v62, %v689_v60  ;;  %v4244_v22 = vcombine.low %v374_v58, %v384_v35  ;;  %v398_v62 = vsel %vm3887_vm2, %v393_v27, %v397_v53  ;;  %v699_v27 = vrot.slane %v4029_v49, 5 }
  0x56   : > { %3460 = vmatprep.subr.bf16.mxu1 %v3721_v33  ;;  %v413_v33 = vshll.u32 %v4236_v18, 16  ;;  %v408_v59 = vsel %vm3887_vm2, %v403_v61, %v407_v43  ;;  %v4276_v58 = vcombine.low %v4178_v0, %v4189_v10  ;;  %v693_v60 = vsel %vm4080_vm5, %v2819_v28, %v692_v30  ;;  %v3732_v43 = vld [vmem:[%s5107_s1 + $0x130] sm:$0xff]   ;;  %3358 = vmatprep.subr.bf16.mxu0 %v3731_v1 }
  0x57   : > { %1720 = vmatprep.mubr.bf16.mxu0 %v4244_v22  ;;  %v4272_v53 = vcombine.low %v398_v62, %v408_v59  ;;  %v696_v35 = vsel %vm4080_vm5, %v694_v5, %v695_v31  ;;  %v431_v28 = vrot.slane %v429_v50, 5  ;;  %v702_v30 = vrot.slane %v4037_v57, 5  ;;  %3359 = vmatpush3.bf16.msra.mxu0 %v3732_v43  ;;  %v4307_v57 = vld [vmem:[%s3842_s9 + $0x70] sm:$0xf]  ;;  %v3734_v59 = vld [vmem:[%s5107_s1 + $0x1d8] sm:$0xff]  }
  0x58   : > { %v415_v41 = vrot.slane %v413_v33, 5  ;;  %1721 = vmatmul.mubr.bf16.gmra.mrb[20].mxu0 %v4231_v16  ;;  %v434_v31 = vshrl.u32 %v4260_v2, 16  ;;  %v437_v33 = vshll.u32 %v4260_v2, 16  ;;  %v701_v62 = vrot.slane %v699_v27, 4 }
  0x59   : > { %3461 = vmatpush3.bf16.msra.mxu1 %v3723_v19  ;;  %v425_v19 = vrot.slane %v423_v34, 4  ;;  %1728 = vmatprep.mubr.bf16.mxu0 %v4272_v53  ;;  %v4300_v34 = vcombine.low %v693_v60, %v696_v35  ;;  %v447_v49 = vshrl.u32 %v4265_v44, 16  ;;  %v445_v60 = vrot.slane %v443_v55, 5 }
  0x5a   : > { %3462 = vmatprep.subr.bf16.mxu1 %v3728_v13  ;;  %v416_v17 = vor.u32 %v415_v41, %v412_v56  ;;  %v436_v5 = vrot.slane %v434_v31, 4  ;;  %v4304_v56 = vld [vmem:[%s3842_s9 + $0x6c] sm:$0xf]  ;;  %v453_v35 = vshll.u32 %v4296_v48, 16 }
  0x5b   : > { %v426_v13 = vor.u32 %v425_v19, %v421_v42  ;;  %v449_v1 = vrot.slane %v447_v49, 4  ;;  %v461_v55 = vshll.u32 %v4304_v56, 16  ;;  %v471_v49 = vshrl.u32 %v4307_v57, 16 }
  0x5c   : > { %1850 = vmatmul.mubr.bf16.gmra.mrb[20].mxu1 %v4233_v6  ;;  %v417_v32 = vrot.slane %v416_v17, 4  ;;  %v700_v17 = vsel %vm4080_vm5, %v2820_v11, %v699_v27  ;;  %v709_v11 = vrot.slane %v4135_v47, 5  ;;  %v4332_v27 = vld [vmem:[%s3842_s9 + $0x74] sm:$0x1]  ;;  %v4344_v47 = vcombine.low %v4236_v18, %v4239_v20 }
  0x5d   : > { %1857 = vmatprep.mubr.bf16.mxu1 %v4097_v4  ;;  %3463 = vmatpush3.bf16.msra.mxu1 %v3729_v51  ;;  %v427_v61 = vrot.slane %v426_v13, 4  ;;  %v439_v51 = vrot.slane %v437_v33, 5  ;;  %v703_v13 = vsel %vm4080_vm5, %v701_v62, %v702_v30  ;;  %v450_v31 = vor.u32 %v449_v1, %v445_v60 }
  0x5e   : > { %v422_v41 = vsel %vm3887_vm2, %v417_v32, %v421_v42  ;;  %3464 = vmatprep.subr.bf16.mxu1 %v3734_v59  ;;  %v2821_v42 = vrot.slane %v4115_v14, 9  ;;  %v455_v32 = vrot.slane %v453_v35, 5  ;;  %v3736_v14 = vld [vmem:[%s5107_s1 + $0x178] sm:$0xff]   ;;  %v458_v33 = vshrl.u32 %v4304_v56, 16 }
  0x5f   : > { %v432_v19 = vsel %vm3887_vm2, %v427_v61, %v431_v28  ;;  %v440_v43 = vor.u32 %v439_v51, %v436_v5  ;;  %v3735_v28 = vld [vmem:[%s5107_s1 + $0x198] sm:$0xff]   ;;  %v706_v61 = vrot.slane %v4118_v21, 5  ;;  %v467_v21 = vshll.u32 %v4307_v57, 16  ;;  %3360 = vmatprep.subr.bf16.mxu0 %v3736_v14 }
  0x60   : > { %v4316_v50 = vcombine.low %v422_v41, %v432_v19  ;;  %1729 = vmatmul.mubr.bf16.gmra.mrb[24].mxu0 %v4276_v58  ;;  %v451_v62 = vrot.slane %v450_v31, 4  ;;  %v4348_v59 = vld [vmem:[%s3842_s9 + $0x78] sm:$0xf]  ;;  %v460_v51 = vrot.slane %v458_v33, 4  ;;  %v463_v1 = vrot.slane %v461_v55, 5  ;;  %v3739_v31 = vld [vmem:[%s5107_s1 + $0x1e0] sm:$0xff]  }
  0x61   : > { %v441_v30 = vrot.slane %v440_v43, 4  ;;  %v708_v5 = vrot.slane %v706_v61, 4  ;;  %3465 = vmatpush3.bf16.msra.mxu1 %v3735_v28  ;;  %v3737_v41 = vld [vmem:[%s5107_s1 + $0x138] sm:$0xff]   ;;  %v469_v35 = vrot.slane %v467_v21, 5  ;;  %v4361_v29 = vcombine.low %v700_v17, %v703_v13  ;;  %v4371_v21 = vld [vmem:[%s5107_s1 + $0x200] sm:$0xff]  }
  0x62   : > { %1736 = vmatprep.mubr.bf16.mxu0 %v4316_v50  ;;  %v4356_v43 = vld [vmem:[%s3842_s9 + $0x7c] sm:$0xf]  ;;  %v456_v28 = vsel %vm3887_vm2, %v451_v62, %v455_v32  ;;  %v473_v14 = vrot.slane %v471_v49, 4  ;;  %v477_v26 = vshll.u32 %v4332_v27, 16  ;;  %3361 = vmatpush3.bf16.msra.mxu0 %v3737_v41  ;;  %v4374_v13 = vld [vmem:[%s3842_s9 + $0x80] sm:$0x1] }
  0x63   : > { %v446_v19 = vsel %vm3887_vm2, %v441_v30, %v445_v60  ;;  %v464_v30 = vor.u32 %v463_v1, %v460_v51  ;;  %3466 = vmatprep.subr.bf16.mxu1 %v3739_v31  ;;  %v482_v32 = vshrl.u32 %v4348_v59, 16  ;;  %v485_v62 = vshll.u32 %v4348_v59, 16  ;;  %v4385_v51 = vld [vmem:[%s3842_s9 + $0x84] sm:$0xf]  ;;  %3594 = vmatprep.subr.bf16.mxu0 %v4371_v21 }
  0x64   : > { %1858 = vmatmul.mubr.bf16.gmra.mrb[24].mxu1 %v4300_v34  ;;  %v4366_v60 = vcombine.low %v446_v19, %v456_v28  ;;  %v474_v33 = vor.u32 %v473_v14, %v469_v35  ;;  %v479_v55 = vrot.slane %v477_v26, 5  ;;  %v707_v26 = vsel %vm4080_vm5, %v2821_v42, %v706_v61  ;;  %v3741_v1 = vld [vmem:[%s5107_s1 + $0x1a0] sm:$0xff]   ;;  %v3742_v14 = vld [vmem:[%s5107_s1 + $0x1e8] sm:$0xff]  }
  0x65   : > { %1865 = vmatprep.mubr.bf16.mxu1 %v4173_v54  ;;  %v465_v17 = vrot.slane %v464_v30, 4  ;;  %v713_v41 = vrot.slane %v4162_v38, 5  ;;  %v491_v19 = vshll.u32 %v4356_v43, 16  ;;  %v710_v31 = vsel %vm4080_vm5, %v708_v5, %v709_v11  ;;  %v4396_v38 = vld [vmem:[%s3842_s9 + $0x88] sm:$0xf]  ;;  %3467 = vmatpush3.bf16.msra.mxu1 %v3741_v1 }
  0x66   : > { %v475_v49 = vrot.slane %v474_v33, 4  ;;  %v484_v28 = vrot.slane %v482_v32, 4  ;;  %v487_v42 = vrot.slane %v485_v62, 5  ;;  %v495_v61 = vshrl.u32 %v4356_v43, 16  ;;  %3468 = vmatprep.subr.bf16.mxu1 %v3742_v14 }
  0x67   : > { %v470_v30 = vsel %vm3887_vm2, %v465_v17, %v469_v35  ;;  %v493_v9 = vrot.slane %v491_v19, 5  ;;  %v501_v11 = vshll.u32 %v4374_v13, 16  ;;  %v4409_v5 = vcombine.low %v4260_v2, %v4265_v44 }
  0x68   : > { %1737 = vmatmul.mubr.bf16.gmra.mrb[28].mxu0 %v4344_v47  ;;  %v480_v33 = vsel %vm3887_vm2, %v475_v49, %v479_v55  ;;  %v488_v32 = vor.u32 %v487_v42, %v484_v28  ;;  %v497_v62 = vrot.slane %v495_v61, 4  ;;  %v2822_v35 = vrot.slane %v4159_v36, 9  ;;  %v3744_v49 = vld [vmem:[%s5107_s1 + $0x1a8] sm:$0xff]  }
  0x69   : > { %1744 = vmatprep.mubr.bf16.mxu0 %v4366_v60  ;;  %v715_v17 = vrot.slane %v713_v41, 4  ;;  %v716_v55 = vrot.slane %v4165_v39, 5  ;;  %v4418_v19 = vcombine.low %v470_v30, %v480_v33  ;;  %v506_v28 = vshrl.u32 %v4385_v51, 16  ;;  %3469 = vmatpush3.bf16.msra.mxu1 %v3744_v49  ;;  %v3747_v33 = vld [vmem:[%s5107_s1 + $0x1b0] sm:$0xff]   ;;  %v3748_v49 = vld [vmem:[%s5107_s1 + $0x1f8] sm:$0xff]  }
  0x6a   : > { %v498_v1 = vor.u32 %v497_v62, %v493_v9  ;;  %v503_v36 = vrot.slane %v501_v11, 5  ;;  %v509_v42 = vshll.u32 %v4385_v51, 16  ;;  %v515_v39 = vshll.u32 %v4396_v38, 16 }
  0x6b   : > { %v508_v14 = vrot.slane %v506_v28, 4  ;;  %v519_v30 = vshrl.u32 %v4396_v38, 16  ;;  %v720_v11 = vrot.slane %v4189_v10, 5  ;;  %v717_v28 = vsel %vm4080_vm5, %v715_v17, %v716_v55 }
  0x6c   : > { %1866 = vmatmul.mubr.bf16.gmra.mrb[28].mxu1 %v4361_v29  ;;  %v499_v61 = vrot.slane %v498_v1, 4  ;;  %v517_v62 = vrot.slane %v515_v39, 5  ;;  %v714_v1 = vsel %vm4080_vm5, %v2822_v35, %v713_v41  ;;  %v525_v54 = vshll.u32 %v4421_v15, 16  ;;  %v3750_v41 = vld [vmem:[%s5107_s1 + $0x1b8] sm:$0xff]  }
  0x6d   : > { %1873 = vmatprep.mubr.bf16.mxu1 %v4231_v16  ;;  %v4411_v16 = vcombine.low %v707_v26, %v710_v31  ;;  %v3745_v26 = vld [vmem:[%s5107_s1 + $0x1f0] sm:$0xff]   ;;  %v489_v31 = vrot.slane %v488_v32, 4  ;;  %v511_v32 = vrot.slane %v509_v42, 5  ;;  %v4455_v35 = vcombine.low %v4304_v56, %v4307_v57 }
  0x6e   : > { %3470 = vmatprep.subr.bf16.mxu1 %v3745_v26  ;;  %v521_v26 = vrot.slane %v519_v30, 4  ;;  %v504_v42 = vsel %vm3887_vm2, %v499_v61, %v503_v36  ;;  %v4457_v17 = vcombine.low %v714_v1, %v717_v28  ;;  %v2823_v55 = vrot.slane %v4178_v0, 9 }
  0x6f   : > { %v494_v10 = vsel %vm3887_vm2, %v489_v31, %v493_v9  ;;  %v512_v39 = vor.u32 %v511_v32, %v508_v14  ;;  %3471 = vmatpush3.bf16.msra.mxu1 %v3747_v33  ;;  %v722_v31 = vrot.slane %v720_v11, 4  ;;  %v723_v36 = vrot.slane %v4195_v12, 5 }
  0x70   : > { %1745 = vmatmul.mubr.bf16.gmra.mrb[32].mxu0 %v4409_v5  ;;  %v522_v4 = vor.u32 %v521_v26, %v517_v62  ;;  %3472 = vmatprep.subr.bf16.mxu1 %v3748_v49  ;;  %v4460_v9 = vcombine.low %v494_v10, %v504_v42  ;;  %v527_v61 = vrot.slane %v525_v54, 5  ;;  %v721_v0 = vsel %vm4080_vm5, %v2823_v55, %v720_v11 }
  0x71   : > { %1752 = vmatprep.mubr.bf16.mxu0 %v4418_v19  ;;  %v513_v14 = vrot.slane %v512_v39, 4  ;;  %v724_v33 = vsel %vm4080_vm5, %v722_v31, %v723_v36  ;;  %v727_v12 = vrot.slane %v4239_v20, 5  ;;  %v4478_v32 = vcombine.low %v4348_v59, %v4356_v43 }
  0x72   : > { %v523_v30 = vrot.slane %v522_v4, 4  ;;  %v4480_v49 = vcombine.low %v721_v0, %v724_v33  ;;  %v2824_v1 = vrot.slane %v4236_v18, 9  ;;  %v730_v26 = vrot.slane %v4248_v25, 5 }
  0x73   : > { %3473 = vmatpush3.bf16.msra.mxu1 %v3750_v41  ;;  %v518_v4 = vsel %vm3887_vm2, %v513_v14, %v517_v62  ;;  %v729_v28 = vrot.slane %v727_v12, 4  ;;  %v734_v18 = vrot.slane %v4265_v44, 5  ;;  %v4497_v10 = vcombine.low %v4385_v51, %v4396_v38  ;;  %v3743_v14 = vld [vmem:[%s5107_s1 + $0x208] sm:$0xff]  }
  0x74   : > { %1874 = vmatmul.mubr.bf16.gmra.mrb[32].mxu1 %v4411_v16  ;;  %v528_v54 = vsel %vm3887_vm2, %v523_v30, %v527_v61  ;;  %v728_v20 = vsel %vm4080_vm5, %v2824_v1, %v727_v12  ;;  %v2825_v42 = vrot.slane %v4260_v2, 9  ;;  %v737_v41 = vrot.slane %v4296_v48, 5  ;;  %v3752_v12 = vld [vmem:[%s5107_s1 + $0x220] sm:$0xff]  }
  0x75   : > { %1881 = vmatprep.mubr.bf16.mxu1 %v4276_v58  ;;  %v4483_v11 = vcombine.low %v518_v4, %v528_v54  ;;  %v731_v62 = vsel %vm4080_vm5, %v729_v28, %v730_v26  ;;  %v736_v39 = vrot.slane %v734_v18, 4  ;;  %v741_v31 = vrot.slane %v4307_v57, 5  ;;  %v3757_v26 = vld [vmem:[%s3842_s9 + $0x94] sm:$0xf] }
  0x76   : > { %v4499_v25 = vcombine.low %v728_v20, %v731_v62  ;;  %v735_v44 = vsel %vm4080_vm5, %v2825_v42, %v734_v18  ;;  %v2826_v48 = vrot.slane %v4304_v56, 9  ;;  %v744_v61 = vrot.slane %v4332_v27, 5  ;;  %v3746_v27 = vld [vmem:[%s5107_s1 + $0x210] sm:$0xff]  }
  0x77   : > { %v738_v55 = vsel %vm4080_vm5, %v736_v39, %v737_v41  ;;  %v743_v36 = vrot.slane %v741_v31, 4  ;;  %v748_v57 = vrot.slane %v4356_v43, 5  ;;  %v751_v0 = vrot.slane %v4374_v13, 5  ;;  %v3749_v43 = vld [vmem:[%s5107_s1 + $0x218] sm:$0xff]   ;;  %v3754_v62 = vld [vmem:[%s5107_s1 + $0x230] sm:$0xff]  }
  0x78   : > { %1753 = vmatmul.mubr.bf16.gmra.mrb[36].mxu0 %v4455_v35  ;;  %v4512_v2 = vcombine.low %v735_v44, %v738_v55  ;;  %v755_v33 = vrot.slane %v4396_v38, 5  ;;  %v2828_v54 = vrot.slane %v4385_v51, 9  ;;  %v758_v28 = vrot.slane %v4421_v15, 5  ;;  %v3753_v38 = vld [vmem:[%s5107_s1 + $0x228] sm:$0xff]   ;;  %v3758_v42 = vld [vmem:[%s3842_s9 + $0x90] sm:$0xf] }
  0x79   : > { %1760 = vmatprep.mubr.bf16.mxu0 %v4460_v9  ;;  %v745_v56 = vsel %vm4080_vm5, %v743_v36, %v744_v61  ;;  %v750_v30 = vrot.slane %v748_v57, 4  ;;  %v762_v20 = vrot.slane %v3757_v26, 5  ;;  %v2829_v39 = vrot.slane %v3758_v42, 9  ;;  %v3759_v44 = vld [vmem:[%s3842_s9 + $0x98] sm:$0x1] }
  0x7a   : > { %v757_v1 = vrot.slane %v755_v33, 4  ;;  %v756_v51 = vsel %vm4080_vm5, %v2828_v54, %v755_v33  ;;  %v765_v55 = vrot.slane %v3759_v44, 5  ;;  %v3760_v61 = vld [vmem:[%s3842_s9 + $0xa0] sm:$0xf]  ;;  %v3766_v26 = vld [vmem:[%s3842_s9 + $0xb8] sm:$0xf] }
  0x7b   : > { %v752_v13 = vsel %vm4080_vm5, %v750_v30, %v751_v0  ;;  %v764_v41 = vrot.slane %v762_v20, 4  ;;  %v233_v42 = vld [vmem:[%s3842_s9 + $0xc4] sm:$0xf]  ;;  %v3767_v44 = vld [vmem:[%s3842_s9 + $0xb4] sm:$0xf] }
  0x7c   : > { %1882 = vmatmul.mubr.bf16.gmra.mrb[36].mxu1 %v4457_v17  ;;  %v759_v15 = vsel %vm4080_vm5, %v757_v1, %v758_v28  ;;  %v3765_v28 = vld [vmem:[%s3842_s9 + $0xb0] sm:$0x1] }
  0x7d   : > { %1889 = vmatprep.mubr.bf16.mxu1 %v4344_v47  ;;  %v4570_v18 = vcombine.low %v756_v51, %v759_v15  ;;  %v766_v36 = vsel %vm4080_vm5, %v764_v41, %v765_v55  ;;  %v2832_v55 = vrot.slane %v3767_v44, 9 }
  0x80   : > { %1761 = vmatmul.mubr.bf16.gmra.mrb[40].mxu0 %v4478_v32 }
  0x81   : > { %1768 = vmatprep.mubr.bf16.mxu0 %v4483_v11 }
  0x84   : > { %1890 = vmatmul.mubr.bf16.gmra.mrb[40].mxu1 %v4480_v49 }
  0x85   : > { %1897 = vmatprep.mubr.bf16.mxu1 %v4409_v5 }
  0x88   : > { %1769 = vmatmul.mubr.bf16.gmra.mrb[44].mxu0 %v4497_v10 }
  0x89   : > { %2002 = vmatprep.mubr.bf16.mxu0 %v4233_v6  ;;  %v742_v6 = vsel %vm4080_vm5, %v2826_v48, %v741_v31  ;;  %v3755_v31 = vld [vmem:[%s5107_s1 + $0x238] sm:$0xff]   ;;  %v763_v48 = vsel %vm4080_vm5, %v2829_v39, %v762_v20  ;;  %v783_v20 = vrot.slane %v3766_v26, 5 }
  0x8c   : > { %1898 = vmatmul.mubr.bf16.gmra.mrb[44].mxu1 %v4499_v25 }
  0x8d   : > { %1905 = vmatprep.mubr.bf16.mxu1 %v4455_v35 }
  0x90   : > { %2003 = vmatmul.mubr.bf16.vlgmr.msra.gmra.mrb[48].mxu0 %v3968_v52  ;;  %v4532_v52 = vcombine.low %v742_v6, %v745_v56  ;;  %v4586_v6 = vcombine.low %v763_v48, %v766_v36  ;;  %v3761_v56 = vld [vmem:[%s3842_s9 + $0x9c] sm:$0xf] }
  0x91   : > { %3595 = vmatpush3.bf16.msra.mxu0 %v4371_v21  ;;  %2010 = vmatprep.mubr.bf16.mxu0 %v4300_v34  ;;  %v2827_v21 = vrot.slane %v4348_v59, 9  ;;  %v3768_v48 = vld [vmem:[%s3842_s9 + $0xbc] sm:$0x1] }
  0x92   : > { %3596 = vmatprep.subr.bf16.mxu0 %v3743_v14  ;;  %v786_v36 = vrot.slane %v3768_v48, 5 }
  0x93   : > { %v749_v59 = vsel %vm4080_vm5, %v2827_v21, %v748_v57  ;;  %v2830_v57 = vrot.slane %v3761_v56, 9  ;;  %v3762_v21 = vld [vmem:[%s3842_s9 + $0xa4] sm:$0x1] }
  0x94   : > { %1906 = vmatmul.mubr.bf16.gmra.mrb[48].mxu1 %v4512_v2  ;;  %v4551_v4 = vcombine.low %v749_v59, %v752_v13  ;;  %v772_v30 = vrot.slane %v3762_v21, 5  ;;  %v3763_v59 = vld [vmem:[%s3842_s9 + $0xac] sm:$0xf] }
  0x95   : > { %1913 = vmatprep.mubr.bf16.mxu1 %v4478_v32  ;;  %3597 = vmatpush3.bf16.msra.mxu0 %v3743_v14  ;;  %v769_v14 = vrot.slane %v3760_v61, 5  ;;  %v776_v13 = vrot.slane %v3763_v59, 5  ;;  %v784_v61 = vsel %vm4080_vm5, %v2832_v55, %v783_v20 }
  0x96   : > { %3598 = vmatprep.subr.bf16.mxu0 %v3746_v27 }
  0x97   : > { %v770_v0 = vsel %vm4080_vm5, %v2830_v57, %v769_v14  ;;  %v778_v1 = vrot.slane %v776_v13, 4  ;;  %v5132_v57 = vld [vmem:[#allocation5_spill] sm:$0xff] }
  0x98   : > { %2011 = vmatmul.mubr.bf16.gmra.mrb[52].mxu0 %v4041_v63 }
  0x99   : > { %2018 = vmatprep.mubr.bf16.mxu0 %v4361_v29  ;;  %3599 = vmatpush3.bf16.msra.mxu0 %v3746_v27  ;;  %v771_v27 = vrot.slane %v769_v14, 4 }
  0x9a   : > { %3600 = vmatprep.subr.bf16.mxu0 %v3749_v43 }
  0x9c   : > { %1914 = vmatmul.mubr.bf16.gmra.mrb[52].mxu1 %v4532_v52 }
  0x9d   : > { %1921 = vmatprep.mubr.bf16.mxu1 %v4497_v10  ;;  %3601 = vmatpush3.bf16.msra.mxu0 %v3749_v43  ;;  %v773_v43 = vsel %vm4080_vm5, %v771_v27, %v772_v30  ;;  %v5133_v27 = vld [vmem:[#allocation7_spill] sm:$0xff]  ;;  %v802_v30 = vshrl.u32 %v233_v42, 16 }
  0x9e   : > { %3602 = vmatprep.subr.bf16.mxu0 %v3752_v12  ;;  %v4599_v33 = vcombine.low %v770_v0, %v773_v43  ;;  %v798_v0 = vshll.u32 %v233_v42, 16  ;;  %v234_v43 = vld [vmem:[%s3842_s9 + $0xc8] sm:$0x1] }
  0x9f   : > { %v808_v26 = vshll.u32 %v234_v43, 16 }
  0xa0   : > { %2019 = vmatmul.mubr.bf16.gmra.mrb[56].mxu0 %v4102_v8 }
  0xa1   : > { %2026 = vmatprep.mubr.bf16.mxu0 %v4411_v16  ;;  %3603 = vmatpush3.bf16.msra.mxu0 %v3752_v12  ;;  %v3764_v12 = vld [vmem:[%s3842_s9 + $0xa8] sm:$0xf] }
  0xa2   : > { %3604 = vmatprep.subr.bf16.mxu0 %v3753_v38  ;;  %v2831_v54 = vrot.slane %v3764_v12, 9 }
  0xa4   : > { %1922 = vmatmul.mubr.bf16.gmra.mrb[56].mxu1 %v4551_v4  ;;  %v777_v51 = vsel %vm4080_vm5, %v2831_v54, %v776_v13 }
  0xa5   : > { %1929 = vmatprep.mubr.bf16.mxu1 %v3934_v7  ;;  %3605 = vmatpush3.bf16.msra.mxu0 %v3753_v38  ;;  %v779_v38 = vrot.slane %v3765_v28, 5  ;;  %v804_v28 = vrot.slane %v802_v30, 4 }
  0xa6   : > { %3606 = vmatprep.subr.bf16.mxu0 %v3754_v62 }
  0xa7   : > { %v780_v15 = vsel %vm4080_vm5, %v778_v1, %v779_v38  ;;  %v820_v1 = vrot.slane %v234_v43, 5  ;;  %v5137_v38 = vld [vmem:[#allocation4_spill] sm:$0xff] }
  0xa8   : > { %2027 = vmatmul.mubr.bf16.gmra.mrb[60].mxu0 %v4200_v24  ;;  %v4614_v39 = vcombine.low %v777_v51, %v780_v15 }
  0xa9   : > { %2034 = vmatprep.mubr.bf16.mxu0 %v4457_v17  ;;  %3607 = vmatpush3.bf16.msra.mxu0 %v3754_v62  ;;  %v232_v62 = vld [vmem:[%s3842_s9 + $0xc0] sm:$0xf] }
  0xaa   : > { %3608 = vmatprep.subr.bf16.mxu0 %v3755_v31  ;;  %v4616_v41 = vcombine.low %v232_v62, %v233_v42  ;;  %v792_v21 = vshll.u32 %v232_v62, 16  ;;  %v2833_v59 = vrot.slane %v232_v62, 9 }
  0xac   : > { %1930 = vmatmul.mubr.bf16.gmra.mrb[60].mxu1 %v4570_v18  ;;  %v794_v12 = vrot.slane %v792_v21, 5  ;;  %v5138_v21 = vld [vmem:[#allocation6_spill] sm:$0xff] }
  0xad   : > { %1937 = vmatprep.mubr.bf16.mxu1 %v3993_v3  ;;  %3609 = vmatpush3.bf16.msra.mxu0 %v3755_v31  ;;  %v785_v31 = vrot.slane %v783_v20, 4 }
  0xaf   : > { %v787_v14 = vsel %vm4080_vm5, %v785_v31, %v786_v36 }
  0xb0   : > { %2035 = vmatmul.mubr.bf16.gmra.mrb[64].mxu0 %v4244_v22  ;;  %v4628_v56 = vcombine.low %v784_v61, %v787_v14  ;;  %v810_v14 = vrot.slane %v808_v26, 5 }
  0xb1   : > { %2042 = vmatprep.mubr.bf16.mxu0 %v4480_v49 }
  0xb4   : > { %1938 = vmatmul.mubr.bf16.gmra.mrb[64].mxu1 %v4586_v6 }
  0xb5   : > { %1945 = vmatprep.mubr.bf16.mxu1 %v4023_v46 }
  0xb8   : > { %2043 = vmatmul.mubr.bf16.gmra.mrb[68].mxu0 %v4272_v53 }
  0xb9   : > { %2050 = vmatprep.mubr.bf16.mxu0 %v4499_v25 }
  0xbc   : > { %1946 = vmatmul.mubr.bf16.gmra.mrb[68].mxu1 %v4599_v33 }
  0xbd   : > { %1953 = vmatprep.mubr.bf16.mxu1 %v4148_v23 }
  0xc0   : > { %2051 = vmatmul.mubr.bf16.gmra.mrb[72].mxu0 %v4316_v50 }
  0xc1   : > { %2058 = vmatprep.mubr.bf16.mxu0 %v4512_v2 }
  0xc4   : > { %1954 = vmatmul.mubr.bf16.gmra.mrb[72].mxu1 %v4614_v39 }
  0xc5   : > { %1961 = vmatprep.mubr.bf16.mxu1 %v4616_v41 }
  0xc8   : > { %2059 = vmatmul.mubr.bf16.gmra.mrb[76].mxu0 %v4366_v60 }
  0xc9   : > { %2066 = vmatprep.mubr.bf16.mxu0 %v4532_v52 }
  0xcc   : > { %1962 = vmatmul.mubr.bf16.gmra.mrb[76].mxu1 %v4628_v56 }
  0xcd   : > { %2163 = vmatprep.mubr.bf16.mxu1 %v4041_v63  ;;  %v5135_v63 = vld [vmem:[#allocation8_spill] sm:$0xff] }
  0xd0   : > { %2067 = vmatmul.mubr.bf16.gmra.mrb[80].mxu0 %v4418_v19 }
  0xd1   : > { %2074 = vmatprep.mubr.bf16.mxu0 %v4551_v4 }
  0xd4   : > { %2164 = vmatmul.mubr.bf16.vlgmr.msra.gmra.mrb[80].mxu1 %v4021_v45  ;;  %v5134_v45 = vld [vmem:[#allocation2_spill] sm:$0xff] }
  0xd5   : > { %2171 = vmatprep.mubr.bf16.mxu1 %v4102_v8  ;;  %v789_v8 = vshrl.u32 %v232_v62, 16 }
  0xd7   : > { %v791_v13 = vrot.slane %v789_v8, 4 }
  0xd8   : > { %2075 = vmatmul.mubr.bf16.gmra.mrb[84].mxu0 %v4460_v9 }
  0xd9   : > { %2082 = vmatprep.mubr.bf16.mxu0 %v4570_v18 }
  0xdc   : > { %2172 = vmatmul.mubr.bf16.gmra.mrb[84].mxu1 %v5132_v57 }
  0xdd   : > { %2179 = vmatprep.mubr.bf16.mxu1 %v4200_v24  ;;  %v5136_v24 = vld [vmem:[#allocation3_spill] sm:$0xff] }
  0xe0   : > { %2083 = vmatmul.mubr.bf16.gmra.mrb[88].mxu0 %v4483_v11 }
  0xe1   : > { %2090 = vmatprep.mubr.bf16.mxu0 %v4586_v6 }
  0xe4   : > { %2180 = vmatmul.mubr.bf16.gmra.mrb[88].mxu1 %v5133_v27 }
  0xe5   : > { %2187 = vmatprep.mubr.bf16.mxu1 %v4244_v22  ;;  %v817_v22 = vrot.slane %v233_v42, 5 }
  0xe7   : > { %v819_v54 = vrot.slane %v817_v22, 4 }
  0xe8   : > { %2091 = vmatmul.mubr.bf16.gmra.mrb[92].mxu0 %v5134_v45 }
  0xe9   : > { %2098 = vmatprep.mubr.bf16.mxu0 %v4599_v33  ;;  %v821_v51 = vsel %vm4080_vm5, %v819_v54, %v820_v1 }
  0xec   : > { %2188 = vmatmul.mubr.bf16.gmra.mrb[92].mxu1 %v5135_v63 }
  0xed   : > { %2195 = vmatprep.mubr.bf16.mxu1 %v4272_v53  ;;  %v800_v53 = vrot.slane %v798_v0, 5 }
  0xef   : > { %v805_v15 = vor.u32 %v804_v28, %v800_v53 }
  0xf0   : > { %2099 = vmatmul.mubr.bf16.gmra.mrb[96].mxu0 %v5136_v24 }
  0xf1   : > { %2106 = vmatprep.mubr.bf16.mxu0 %v4614_v39  ;;  %v806_v61 = vrot.slane %v805_v15, 4 }
  0xf4   : > { %2196 = vmatmul.mubr.bf16.gmra.mrb[96].mxu1 %v4276_v58  ;;  %v795_v58 = vor.u32 %v794_v12, %v791_v13 }
  0xf5   : > { %2203 = vmatprep.mubr.bf16.mxu1 %v4316_v50  ;;  %v818_v50 = vsel %vm4080_vm5, %v2833_v59, %v817_v22  ;;  %v811_v22 = vsel %vm3887_vm2, %v806_v61, %v810_v14 }
  0xf6   : > { %v4663_v55 = vcombine.low %v818_v50, %v821_v51 }
  0xf8   : > { %2107 = vmatmul.mubr.bf16.gmra.mrb[100].mxu0 %v5137_v38 }
  0xf9   : > { %2114 = vmatprep.mubr.bf16.mxu0 %v4628_v56 }
  0xfc   : > { %2204 = vmatmul.mubr.bf16.gmra.mrb[100].mxu1 %v4344_v47  ;;  %v796_v47 = vrot.slane %v795_v58, 4 }
  0xfd   : > { %2211 = vmatprep.mubr.bf16.mxu1 %v4366_v60 }
  0xfe   : > { %v801_v30 = vsel %vm3887_vm2, %v796_v47, %v800_v53 }
  0xff   : > { %v4681_v43 = vcombine.low %v801_v30, %v811_v22 }
 0x100   : > { %2115 = vmatmul.mubr.bf16.gmra.mrb[104].mxu0 %v5138_v21 }
 0x101   : > { %v3138_v20 = vpop.f32.mrb[0].mxu0  ;;  %v3210_v62 = vpop.f32.mrb[0].mxu1  ;;  %2122 = vmatprep.mubr.bf16.mxu0 %v4663_v55 }
 0x102   : > { %v3139_v42 = vpop.f32.mrb[1].mxu0  ;;  %v3211_v44 = vpop.f32.mrb[1].mxu1 }
 0x103   : > { %v4665_v31 = vadd.f32 %v3139_v42, %v3138_v20  ;;  %v4667_v48 = vadd.f32 %v3211_v44, %v3210_v62  ;;  %v3141_v60 = vpop.f32.mrb[2].mxu0  ;;  %v3213_v36 = vpop.f32.mrb[2].mxu1 }
 0x104   : > { %v3142_v57 = vpop.f32.mrb[3].mxu0  ;;  %v3214_v27 = vpop.f32.mrb[3].mxu1  ;;  %2212 = vmatmul.mubr.bf16.gmra.mrb[104].mxu1 %v4409_v5 }
 0x105   : > { %v4669_v63 = vadd.f32 %v3142_v57, %v3141_v60  ;;  %v4671_v8 = vadd.f32 %v3214_v27, %v3213_v36  ;;  %2219 = vmatprep.mubr.bf16.mxu1 %v4418_v19 }
 0x108   : > { %2123 = vmatmul.mubr.bf16.gmra.mrb[108].mxu0 %v4681_v43 }
 0x109   : > { %v3144_v0 = vpop.f32.mrb[4].mxu0  ;;  %v3216_v54 = vpop.f32.mrb[4].mxu1  ;;  %3610 = vmatprep.mubr.bf16.mxu0 %v4300_v34 }
 0x10a   : > { %v3145_v59 = vpop.f32.mrb[5].mxu0  ;;  %v3217_v5 = vpop.f32.mrb[5].mxu1 }
 0x10b   : > { %v4683_v13 = vadd.f32 %v3145_v59, %v3144_v0  ;;  %v3147_v12 = vpop.f32.mrb[6].mxu0  ;;  %v4689_v19 = vadd.f32 %v3217_v5, %v3216_v54  ;;  %v3219_v53 = vpop.f32.mrb[6].mxu1 }
 0x10c   : > { %v3148_v1 = vpop.f32.mrb[7].mxu0  ;;  %2220 = vmatmul.mubr.bf16.gmra.mrb[108].mxu1 %v4455_v35  ;;  %v3220_v58 = vpop.f32.mrb[7].mxu1 }
 0x10d   : > { %v4685_v28 = vadd.f32 %v3148_v1, %v3147_v12  ;;  %2227 = vmatprep.mubr.bf16.mxu1 %v4460_v9  ;;  %v4693_v50 = vadd.f32 %v3220_v58, %v3219_v53  ;;  %v4731_v58 = vld [vmem:[%s3842_s9 + $0xcc] sm:$0xf] }
 0x110   : > { %3611 = vmatmul.mubr.bf16.vlgmr.msra.gmra.mrb[112].mxu0 %v4361_v29 }
 0x111   : > { %v3150_v51 = vpop.f32.mrb[8].mxu0  ;;  %3614 = vmatprep.mubr.bf16.mxu0 %v4411_v16 }
 0x112   : > { %v3151_v15 = vpop.f32.mrb[9].mxu0 }
 0x113   : > { %v4697_v26 = vadd.f32 %v3151_v15, %v3150_v51  ;;  %v3153_v20 = vpop.f32.mrb[10].mxu0  ;;  %v3222_v35 = vpop.f32.mrb[8].mxu1  ;;  %v826_v15 = vshll.u32 %v4731_v58, 16 }
 0x114   : > { %2228 = vmatmul.mubr.bf16.gmra.mrb[112].mxu1 %v4478_v32  ;;  %v3154_v62 = vpop.f32.mrb[11].mxu0  ;;  %v3223_v9 = vpop.f32.mrb[9].mxu1 }
 0x115   : > { %2235 = vmatprep.mubr.bf16.mxu1 %v4483_v11  ;;  %v4701_v42 = vadd.f32 %v3154_v62, %v3153_v20  ;;  %v4703_v34 = vadd.f32 %v3223_v9, %v3222_v35  ;;  %v3225_v44 = vpop.f32.mrb[10].mxu1 }
 0x116   : > { %v3226_v47 = vpop.f32.mrb[11].mxu1 }
 0x117   : > { %v4705_v60 = vadd.f32 %v3226_v47, %v3225_v44 }
 0x118   : > { %3615 = vmatmul.mubr.bf16.gmra.mrb[116].mxu0 %v4457_v17 }
 0x119   : > { %v3156_v32 = vpop.f32.mrb[12].mxu0  ;;  %3618 = vmatprep.mubr.bf16.mxu0 %v4480_v49 }
 0x11a   : > { %v3157_v29 = vpop.f32.mrb[13].mxu0 }
 0x11b   : > { %v4709_v36 = vadd.f32 %v3157_v29, %v3156_v32  ;;  %v3159_v11 = vpop.f32.mrb[14].mxu0 }
 0x11c   : > { %2236 = vmatmul.mubr.bf16.gmra.mrb[116].mxu1 %v4497_v10  ;;  %v3160_v16 = vpop.f32.mrb[15].mxu0 }
 0x11d   : > { %2243 = vmatprep.mubr.bf16.mxu1 %v5134_v45  ;;  %v4713_v14 = vadd.f32 %v3160_v16, %v3159_v11  ;;  %v828_v11 = vrot.slane %v826_v15, 5 }
 0x11f   : > { %v3228_v61 = vpop.f32.mrb[12].mxu1 }
 0x120   : > { %v3229_v57 = vpop.f32.mrb[13].mxu1  ;;  %3619 = vmatmul.mubr.bf16.gmra.mrb[120].mxu0 %v4499_v25 }
 0x121   : > { %v4715_v27 = vadd.f32 %v3229_v57, %v3228_v61  ;;  %v3231_v30 = vpop.f32.mrb[14].mxu1  ;;  %3622 = vmatprep.mubr.bf16.mxu0 %v4512_v2  ;;  %v4734_v2 = vld [vmem:[%s3842_s9 + $0xd0] sm:$0xf] }
 0x122   : > { %v3232_v22 = vpop.f32.mrb[15].mxu1  ;;  %v3162_v17 = vpop.f32.mrb[16].mxu0  ;;  %v832_v20 = vshll.u32 %v4734_v2, 16  ;;  %v836_v35 = vshrl.u32 %v4734_v2, 16 }
 0x123   : > { %v4717_v10 = vadd.f32 %v3232_v22, %v3231_v30  ;;  %v3163_v45 = vpop.f32.mrb[17].mxu0 }
 0x124   : > { %2244 = vmatmul.mubr.bf16.gmra.mrb[120].mxu1 %v3934_v7  ;;  %v4723_v59 = vadd.f32 %v3163_v45, %v3162_v17  ;;  %v3165_v54 = vpop.f32.mrb[18].mxu0  ;;  %v834_v16 = vrot.slane %v832_v20, 5  ;;  %v838_v61 = vrot.slane %v836_v35, 4  ;;  %v237_v17 = vld [vmem:[%s3842_s9 + $0xd4] sm:$0x1]  ;;  %s2814_s9 = sshll.u32 %s3803_s13, 5 }
 0x125   : > { %2251 = vmatprep.mubr.bf16.mxu1 %v5136_v24  ;;  %v3166_v5 = vpop.f32.mrb[19].mxu0  ;;  %p174_p4 = scmp.lt.s32.totalorder %s2814_s9, 63 }
 0x126   : > { %v4728_v25 = vadd.f32 %v3166_v5, %v3165_v54 }
 0x127   : > { %v3250_v49 = vpop.f32.mrb[16].mxu1  ;;  %s5140_s9 = smov (!%p174_p4, %s2814_s9), 63 }
 0x128   : > { %v3251_v0 = vpop.f32.mrb[17].mxu1  ;;  %3623 = vmatmul.mubr.bf16.gmra.mrb[124].mxu0 %v4532_v52  ;;  %s2815_s13 = sshll.u32 %s5140_s9, 2 }
 0x129   : > { %v3252_v12 = vadd.f32 %v3251_v0, %v3250_v49  ;;  %v3253_v1 = vpop.f32.mrb[18].mxu1  ;;  %3626 = vmatprep.mubr.bf16.mxu0 %v4551_v4  ;;  %v839_v0 = vor.u32 %v838_v61, %v834_v16  ;;  %s5034_s26 = scalar_lea.vmem %s5108_s2, %s2815_s13 }
 0x12a   : > { %v3254_v53 = vpop.f32.mrb[19].mxu1 }
 0x12b   : > { %v4726_v7 = vadd.f32 %v3252_v12, %v4665_v31  ;;  %v3255_v24 = vadd.f32 %v3254_v53, %v3253_v1  ;;  %v823_v31 = vshrl.u32 %v4731_v58, 16  ;;  %v3168_v62 = vpop.f32.mrb[20].mxu0  ;;  %v842_v12 = vshll.u32 %v237_v17, 16 }
 0x12c   : > { %2252 = vmatmul.mubr.bf16.gmra.mrb[124].mxu1 %v3993_v3  ;;  %v3169_v3 = vpop.f32.mrb[21].mxu0  ;;  %v840_v20 = vrot.slane %v839_v0, 4 }
 0x12d   : > { %v4739_v51 = vadd.f32 %v3255_v24, %v4669_v63  ;;  %2259 = vmatprep.mubr.bf16.mxu1 %v5137_v38  ;;  %v4747_v44 = vadd.f32 %v3169_v3, %v3168_v62  ;;  %v3171_v47 = vpop.f32.mrb[22].mxu0  ;;  %v825_v29 = vrot.slane %v823_v31, 4  ;;  %v844_v35 = vrot.slane %v842_v12, 5 }
 0x12e   : > { %v3172_v32 = vpop.f32.mrb[23].mxu0 }
 0x12f   : > { %v3256_v9 = vpop.f32.mrb[20].mxu1  ;;  %v4752_v30 = vadd.f32 %v3172_v32, %v3171_v47  ;;  %v829_v45 = vor.u32 %v828_v11, %v825_v29 }
 0x130   : > { %v3257_v52 = vpop.f32.mrb[21].mxu1  ;;  %3627 = vmatmul.mubr.bf16.gmra.mrb[128].mxu0 %v4570_v18 }
 0x131   : > { %v3258_v63 = vadd.f32 %v3257_v52, %v3256_v9  ;;  %v3259_v38 = vpop.f32.mrb[22].mxu1  ;;  %3630 = vmatprep.mubr.bf16.mxu0 %v4586_v6  ;;  %v851_v9 = vrot.slane %v4734_v2, 5  ;;  %v845_v52 = vsel %vm3887_vm2, %v840_v20, %v844_v35 }
 0x132   : > { %v3260_v4 = vpop.f32.mrb[23].mxu1 }
 0x133   : > { %v4750_v57 = vadd.f32 %v3258_v63, %v4683_v13  ;;  %v3261_v22 = vadd.f32 %v3260_v4, %v3259_v38  ;;  %v3174_v13 = vpop.f32.mrb[24].mxu0  ;;  %v853_v32 = vrot.slane %v851_v9, 4 }
 0x134   : > { %2260 = vmatmul.mubr.bf16.gmra.mrb[128].mxu1 %v4023_v46  ;;  %v3175_v1 = vpop.f32.mrb[25].mxu0 }
 0x135   : > { %v4758_v49 = vadd.f32 %v3261_v22, %v4685_v28  ;;  %2267 = vmatprep.mubr.bf16.mxu1 %v5138_v21  ;;  %v4762_v53 = vadd.f32 %v3175_v1, %v3174_v13  ;;  %v3177_v46 = vpop.f32.mrb[26].mxu0  ;;  %v830_v28 = vrot.slane %v829_v45, 4 }
 0x136   : > { %v3178_v18 = vpop.f32.mrb[27].mxu0 }
 0x137   : > { %v3262_v54 = vpop.f32.mrb[24].mxu1  ;;  %v4767_v6 = vadd.f32 %v3178_v18, %v3177_v46 }
 0x138   : > { %v3263_v5 = vpop.f32.mrb[25].mxu1  ;;  %3631 = vmatmul.mubr.bf16.gmra.mrb[132].mxu0 %v4599_v33  ;;  %v2834_v33 = vrot.slane %v4731_v58, 9 }
 0x139   : > { %v3264_v24 = vadd.f32 %v3263_v5, %v3262_v54  ;;  %v3265_v31 = vpop.f32.mrb[26].mxu1  ;;  %3634 = vmatprep.mubr.bf16.mxu0 %v4614_v39  ;;  %v854_v39 = vrot.slane %v237_v17, 5 }
 0x13a   : > { %v3266_v15 = vpop.f32.mrb[27].mxu1  ;;  %v852_v17 = vsel %vm4080_vm5, %v2834_v33, %v851_v9 }
 0x13b   : > { %v4765_v21 = vadd.f32 %v3264_v24, %v4697_v26  ;;  %v3267_v62 = vadd.f32 %v3266_v15, %v3265_v31  ;;  %v835_v26 = vsel %vm3887_vm2, %v830_v28, %v834_v16  ;;  %v3180_v63 = vpop.f32.mrb[28].mxu0 }
 0x13c   : > { %2268 = vmatmul.mubr.bf16.gmra.mrb[132].mxu1 %v4148_v23  ;;  %v3181_v23 = vpop.f32.mrb[29].mxu0  ;;  %v2887_v11 = vcombine.low %v835_v26, %v845_v52 }
 0x13d   : > { %v4773_v3 = vadd.f32 %v3267_v62, %v4701_v42  ;;  %2275 = vmatprep.mubr.bf16.mxu1 %v4681_v43  ;;  %v4782_v4 = vadd.f32 %v3181_v23, %v3180_v63  ;;  %v3183_v29 = vpop.f32.mrb[30].mxu0 }
 0x13e   : > { %v3184_v61 = vpop.f32.mrb[31].mxu0 }
 0x13f   : > { %v3268_v47 = vpop.f32.mrb[28].mxu1  ;;  %v4787_v37 = vadd.f32 %v3184_v61, %v3183_v29 }
 0x140   : > { %v3269_v38 = vpop.f32.mrb[29].mxu1  ;;  %3635 = vmatmul.mubr.bf16.gmra.mrb[136].mxu0 %v4628_v56 }
 0x141   : > { %v3270_v42 = vadd.f32 %v3269_v38, %v3268_v47  ;;  %v3271_v43 = vpop.f32.mrb[30].mxu1  ;;  %3638 = vmatprep.mubr.bf16.mxu0 %v4663_v55 }
 0x142   : > { %v3272_v22 = vpop.f32.mrb[31].mxu1 }
 0x143   : > { %v4785_v16 = vadd.f32 %v3270_v42, %v4709_v36  ;;  %v3273_v45 = vadd.f32 %v3272_v22, %v3271_v43  ;;  %v855_v36 = vsel %vm4080_vm5, %v853_v32, %v854_v39  ;;  %v3186_v12 = vpop.f32.mrb[32].mxu0 }
 0x144   : > { %2276 = vmatmul.mubr.bf16.gmra.mrb[136].mxu1 %v4616_v41  ;;  %v3187_v54 = vpop.f32.mrb[33].mxu0  ;;  %v2886_v41 = vcombine.low %v4731_v58, %v4734_v2  ;;  %v2888_v56 = vcombine.low %v852_v17, %v855_v36 }
 0x145   : > { %v4792_v0 = vadd.f32 %v3273_v45, %v4713_v14  ;;  %2283 = vmatprep.mubr.bf16.mxu1 %v2887_v11  ;;  %v4801_v5 = vadd.f32 %v3187_v54, %v3186_v12  ;;  %v3189_v24 = vpop.f32.mrb[34].mxu0 }
 0x146   : > { %v3190_v55 = vpop.f32.mrb[35].mxu0 }
 0x147   : > { %v3274_v13 = vpop.f32.mrb[32].mxu1  ;;  %v3191_v40 = vadd.f32 %v3190_v55, %v3189_v24 }
 0x148   : > { %v3275_v1 = vpop.f32.mrb[33].mxu1  ;;  %3639 = vmatmul.mubr.bf16.gmra.mrb[140].mxu0 %v2888_v56 }
 0x149   : > { %v3276_v14 = vadd.f32 %v3275_v1, %v3274_v13  ;;  %v3277_v46 = vpop.f32.mrb[34].mxu1 }
 0x14a   : > { %v3278_v31 = vpop.f32.mrb[35].mxu1 }
 0x14b   : > { %v4804_v18 = vadd.f32 %v3276_v14, %v4723_v59  ;;  %v3279_v15 = vadd.f32 %v3278_v31, %v3277_v46  ;;  %v3192_v20 = vpop.f32.mrb[36].mxu0 }
 0x14c   : > { %2284 = vmatmul.mubr.bf16.gmra.mrb[140].mxu1 %v2886_v41  ;;  %v3193_v2 = vpop.f32.mrb[37].mxu0 }
 0x14d   : > { %v4807_v28 = vadd.f32 %v3279_v15, %v4728_v25  ;;  %v4809_v62 = vadd.f32 %v3193_v2, %v3192_v20  ;;  %v3195_v26 = vpop.f32.mrb[38].mxu0 }
 0x14e   : > { %v3196_v63 = vpop.f32.mrb[39].mxu0 }
 0x14f   : > { %v3280_v58 = vpop.f32.mrb[36].mxu1  ;;  %v3197_v23 = vadd.f32 %v3196_v63, %v3195_v26 }
 0x150   : > { %v3281_v35 = vpop.f32.mrb[37].mxu1 }
 0x151   : > { %v3282_v9 = vadd.f32 %v3281_v35, %v3280_v58  ;;  %v3283_v52 = vpop.f32.mrb[38].mxu1 }
 0x152   : > { %v3284_v47 = vpop.f32.mrb[39].mxu1 }
 0x153   : > { %v4812_v59 = vadd.f32 %v3282_v9, %v4747_v44  ;;  %v3285_v38 = vadd.f32 %v3284_v47, %v3283_v52  ;;  %v3198_v25 = vpop.f32.mrb[40].mxu0 }
 0x154   : > { %v3199_v42 = vpop.f32.mrb[41].mxu0 }
 0x155   : > { %v4815_v33 = vadd.f32 %v3285_v38, %v4752_v30  ;;  %v4817_v43 = vadd.f32 %v3199_v42, %v3198_v25  ;;  %v3201_v39 = vpop.f32.mrb[42].mxu0 }
 0x156   : > { %v3202_v22 = vpop.f32.mrb[43].mxu0 }
 0x157   : > { %v3286_v32 = vpop.f32.mrb[40].mxu1  ;;  %v4822_v44 = vadd.f32 %v3202_v22, %v3201_v39 }
 0x158   : > { %v3287_v29 = vpop.f32.mrb[41].mxu1 }
 0x159   : > { %v3288_v11 = vadd.f32 %v3287_v29, %v3286_v32  ;;  %v3289_v61 = vpop.f32.mrb[42].mxu1 }
 0x15a   : > { %v3290_v45 = vpop.f32.mrb[43].mxu1 }
 0x15b   : > { %v4820_v17 = vadd.f32 %v3288_v11, %v4762_v53  ;;  %v3291_v36 = vadd.f32 %v3290_v45, %v3289_v61  ;;  %v3204_v12 = vpop.f32.mrb[44].mxu0 }
 0x15c   : > { %v3205_v54 = vpop.f32.mrb[45].mxu0 }
 0x15d   : > { %v4825_v30 = vadd.f32 %v3291_v36, %v4767_v6  ;;  %v4827_v41 = vadd.f32 %v3205_v54, %v3204_v12  ;;  %v3207_v14 = vpop.f32.mrb[46].mxu0 }
 0x15e   : > { %v3208_v46 = vpop.f32.mrb[47].mxu0 }
 0x15f   : > { %v3292_v13 = vpop.f32.mrb[44].mxu1  ;;  %v4832_v31 = vadd.f32 %v3208_v46, %v3207_v14 }
 0x160   : > { %v3293_v1 = vpop.f32.mrb[45].mxu1 }
 0x161   : > { %v3294_v56 = vadd.f32 %v3293_v1, %v3292_v13  ;;  %v3295_v24 = vpop.f32.mrb[46].mxu1 }
 0x162   : > { %v3296_v55 = vpop.f32.mrb[47].mxu1 }
 0x163   : > { %v4830_v53 = vadd.f32 %v3294_v56, %v4782_v4  ;;  %v3297_v15 = vadd.f32 %v3296_v55, %v3295_v24  ;;  %v3362_v58 = vpop.f32.mrb[48].mxu0 }
 0x164   : > { %v3363_v35 = vpop.f32.mrb[49].mxu0 }
 0x165   : > { %v4835_v6 = vadd.f32 %v3297_v15, %v4787_v37  ;;  %v3364_v26 = vadd.f32 %v3363_v35, %v3362_v58  ;;  %v3365_v63 = vpop.f32.mrb[50].mxu0 }
 0x166   : > { %v3366_v38 = vpop.f32.mrb[51].mxu0 }
 0x167   : > { %v3298_v20 = vpop.f32.mrb[48].mxu1  ;;  %v4841_v4 = vadd.f32 %v3364_v26, %v4726_v7  ;;  %v3367_v42 = vadd.f32 %v3366_v38, %v3365_v63 }
 0x168   : > { %v3299_v2 = vpop.f32.mrb[49].mxu1 }
 0x169   : > { %v3300_v9 = vadd.f32 %v3299_v2, %v3298_v20  ;;  %v3301_v52 = vpop.f32.mrb[50].mxu1  ;;  %v4846_v29 = vadd.f32 %v3367_v42, %v4739_v51 }
 0x16a   : > { %v3302_v47 = vpop.f32.mrb[51].mxu1 }
 0x16b   : > { %v4838_v25 = vadd.f32 %v3300_v9, %v4801_v5  ;;  %v3303_v32 = vadd.f32 %v3302_v47, %v3301_v52  ;;  %v3368_v39 = vpop.f32.mrb[52].mxu0 }
 0x16c   : > { %v3369_v22 = vpop.f32.mrb[53].mxu0 }
 0x16d   : > { %v4843_v37 = vadd.f32 %v3303_v32, %v3191_v40  ;;  %v3370_v36 = vadd.f32 %v3369_v22, %v3368_v39  ;;  %v3371_v13 = vpop.f32.mrb[54].mxu0 }
 0x16e   : > { %v3372_v54 = vpop.f32.mrb[55].mxu0 }
 0x16f   : > { %v3304_v11 = vpop.f32.mrb[52].mxu1  ;;  %v4852_v1 = vadd.f32 %v3370_v36, %v4750_v57  ;;  %v3373_v56 = vadd.f32 %v3372_v54, %v3371_v13 }
 0x170   : > { %v3305_v61 = vpop.f32.mrb[53].mxu1 }
 0x171   : > { %v3306_v45 = vadd.f32 %v3305_v61, %v3304_v11  ;;  %v3307_v12 = vpop.f32.mrb[54].mxu1  ;;  %v4857_v14 = vadd.f32 %v3373_v56, %v4758_v49 }
 0x172   : > { %v3308_v5 = vpop.f32.mrb[55].mxu1 }
 0x173   : > { %v4849_v7 = vadd.f32 %v3306_v45, %v4809_v62  ;;  %v3309_v40 = vadd.f32 %v3308_v5, %v3307_v12  ;;  %v3374_v46 = vpop.f32.mrb[56].mxu0 }
 0x174   : > { %v3375_v15 = vpop.f32.mrb[57].mxu0 }
 0x175   : > { %v4854_v51 = vadd.f32 %v3309_v40, %v3197_v23  ;;  %v3376_v58 = vadd.f32 %v3375_v15, %v3374_v46  ;;  %v3377_v35 = vpop.f32.mrb[58].mxu0 }
 0x176   : > { %v3378_v9 = vpop.f32.mrb[59].mxu0 }
 0x177   : > { %v3310_v24 = vpop.f32.mrb[56].mxu1  ;;  %v4863_v26 = vadd.f32 %v3376_v58, %v4765_v21  ;;  %v3379_v52 = vadd.f32 %v3378_v9, %v3377_v35 }
 0x178   : > { %v3311_v55 = vpop.f32.mrb[57].mxu1 }
 0x179   : > { %v3312_v20 = vadd.f32 %v3311_v55, %v3310_v24  ;;  %v3313_v2 = vpop.f32.mrb[58].mxu1  ;;  %v4869_v63 = vadd.f32 %v3379_v52, %v4773_v3 }
 0x17a   : > { %v3314_v62 = vpop.f32.mrb[59].mxu1 }
 0x17b   : > { %v4860_v57 = vadd.f32 %v3312_v20, %v4817_v43  ;;  %v3315_v23 = vadd.f32 %v3314_v62, %v3313_v2  ;;  %v3380_v38 = vpop.f32.mrb[60].mxu0 }
 0x17c   : > { %v3381_v42 = vpop.f32.mrb[61].mxu0 }
 0x17d   : > { %v4866_v49 = vadd.f32 %v3315_v23, %v4822_v44  ;;  %v3382_v39 = vadd.f32 %v3381_v42, %v3380_v38  ;;  %v3383_v43 = vpop.f32.mrb[62].mxu0 }
 0x17e   : > { %v3384_v45 = vpop.f32.mrb[63].mxu0 }
 0x17f   : > { %v3316_v47 = vpop.f32.mrb[60].mxu1  ;;  %v4875_v36 = vadd.f32 %v3382_v39, %v4785_v16  ;;  %v3385_v12 = vadd.f32 %v3384_v45, %v3383_v43 }
 0x180   : > { %v3317_v32 = vpop.f32.mrb[61].mxu1 }
 0x181   : > { %v3318_v11 = vadd.f32 %v3317_v32, %v3316_v47  ;;  %v3319_v61 = vpop.f32.mrb[62].mxu1  ;;  %v4881_v13 = vadd.f32 %v3385_v12, %v4792_v0 }
 0x182   : > { %v3320_v22 = vpop.f32.mrb[63].mxu1 }
 0x183   : > { %v4872_v21 = vadd.f32 %v3318_v11, %v4827_v41  ;;  %v3321_v44 = vadd.f32 %v3320_v22, %v3319_v61  ;;  %v3386_v54 = vpop.f32.mrb[64].mxu0 }
 0x184   : > { %v3387_v56 = vpop.f32.mrb[65].mxu0 }
 0x185   : > { %v4878_v3 = vadd.f32 %v3321_v44, %v4832_v31  ;;  %v3388_v46 = vadd.f32 %v3387_v56, %v3386_v54  ;;  %v3389_v41 = vpop.f32.mrb[66].mxu0 }
 0x186   : > { %v3390_v20 = vpop.f32.mrb[67].mxu0 }
 0x187   : > { %v3322_v5 = vpop.f32.mrb[64].mxu1  ;;  %v4887_v58 = vadd.f32 %v3388_v46, %v4804_v18  ;;  %v3391_v2 = vadd.f32 %v3390_v20, %v3389_v41 }
 0x188   : > { %v3323_v40 = vpop.f32.mrb[65].mxu1 }
 0x189   : > { %v3324_v24 = vadd.f32 %v3323_v40, %v3322_v5  ;;  %v3325_v55 = vpop.f32.mrb[66].mxu1  ;;  %v4893_v35 = vadd.f32 %v3391_v2, %v4807_v28 }
 0x18a   : > { %v3326_v15 = vpop.f32.mrb[67].mxu1 }
 0x18b   : > { %v4884_v16 = vadd.f32 %v3324_v24, %v4667_v48  ;;  %v3327_v31 = vadd.f32 %v3326_v15, %v3325_v55  ;;  %v3392_v9 = vpop.f32.mrb[68].mxu0 }
 0x18c   : > { %v3393_v52 = vpop.f32.mrb[69].mxu0 }
 0x18d   : > { %v4890_v0 = vadd.f32 %v3327_v31, %v4671_v8  ;;  %v3394_v38 = vadd.f32 %v3393_v52, %v3392_v9  ;;  %v3395_v48 = vpop.f32.mrb[70].mxu0 }
 0x18e   : > { %v3396_v11 = vpop.f32.mrb[71].mxu0 }
 0x18f   : > { %v3328_v62 = vpop.f32.mrb[68].mxu1  ;;  %v4899_v39 = vadd.f32 %v3394_v38, %v4812_v59  ;;  %v3397_v61 = vadd.f32 %v3396_v11, %v3395_v48 }
 0x190   : > { %v3329_v23 = vpop.f32.mrb[69].mxu1 }
 0x191   : > { %v3330_v47 = vadd.f32 %v3329_v23, %v3328_v62  ;;  %v3331_v32 = vpop.f32.mrb[70].mxu1  ;;  %v4905_v43 = vadd.f32 %v3397_v61, %v4815_v33 }
 0x192   : > { %v3332_v42 = vpop.f32.mrb[71].mxu1 }
 0x193   : > { %v4896_v18 = vadd.f32 %v3330_v47, %v4689_v19  ;;  %v3333_v8 = vadd.f32 %v3332_v42, %v3331_v32  ;;  %v3398_v45 = vpop.f32.mrb[72].mxu0 }
 0x194   : > { %v3399_v12 = vpop.f32.mrb[73].mxu0 }
 0x195   : > { %v4902_v28 = vadd.f32 %v3333_v8, %v4693_v50  ;;  %v3400_v54 = vadd.f32 %v3399_v12, %v3398_v45  ;;  %v3401_v19 = vpop.f32.mrb[74].mxu0 }
 0x196   : > { %v3402_v24 = vpop.f32.mrb[75].mxu0 }
 0x197   : > { %v3334_v22 = vpop.f32.mrb[72].mxu1  ;;  %v4911_v46 = vadd.f32 %v3400_v54, %v4820_v17  ;;  %v3403_v55 = vadd.f32 %v3402_v24, %v3401_v19 }
 0x198   : > { %v3335_v44 = vpop.f32.mrb[73].mxu1 }
 0x199   : > { %v3336_v5 = vadd.f32 %v3335_v44, %v3334_v22  ;;  %v3337_v40 = vpop.f32.mrb[74].mxu1  ;;  %v4917_v41 = vadd.f32 %v3403_v55, %v4825_v30 }
 0x19a   : > { %v3338_v56 = vpop.f32.mrb[75].mxu1 }
 0x19b   : > { %v4908_v59 = vadd.f32 %v3336_v5, %v4703_v34  ;;  %v3339_v50 = vadd.f32 %v3338_v56, %v3337_v40  ;;  %v3404_v20 = vpop.f32.mrb[76].mxu0 }
 0x19c   : > { %v3405_v2 = vpop.f32.mrb[77].mxu0 }
 0x19d   : > { %v4914_v33 = vadd.f32 %v3339_v50, %v4705_v60  ;;  %v3406_v9 = vadd.f32 %v3405_v2, %v3404_v20  ;;  %v3407_v34 = vpop.f32.mrb[78].mxu0 }
 0x19e   : > { %v3408_v47 = vpop.f32.mrb[79].mxu0 }
 0x19f   : > { %v3340_v15 = vpop.f32.mrb[76].mxu1  ;;  %v4923_v38 = vadd.f32 %v3406_v9, %v4830_v53  ;;  %v3409_v32 = vadd.f32 %v3408_v47, %v3407_v34 }
 0x1a0   : > { %v3341_v31 = vpop.f32.mrb[77].mxu1 }
 0x1a1   : > { %v3342_v62 = vadd.f32 %v3341_v31, %v3340_v15  ;;  %v3343_v23 = vpop.f32.mrb[78].mxu1  ;;  %v4929_v48 = vadd.f32 %v3409_v32, %v4835_v6 }
 0x1a2   : > { %v3344_v52 = vpop.f32.mrb[79].mxu1 }
 0x1a3   : > { %v4920_v17 = vadd.f32 %v3342_v62, %v4715_v27  ;;  %v3345_v60 = vadd.f32 %v3344_v52, %v3343_v23  ;;  %v3410_v42 = vpop.f32.mrb[80].mxu0 }
 0x1a4   : > { %v3411_v8 = vpop.f32.mrb[81].mxu0 }
 0x1a5   : > { %v4926_v30 = vadd.f32 %v3345_v60, %v4717_v10  ;;  %v3412_v22 = vadd.f32 %v3411_v8, %v3410_v42  ;;  %v3413_v44 = vpop.f32.mrb[82].mxu0 }
 0x1a6   : > { %v3414_v12 = vpop.f32.mrb[83].mxu0 }
 0x1a7   : > { %v3474_v11 = vpop.f32.mrb[80].mxu1  ;;  %v4932_v53 = vadd.f32 %v3412_v22, %v4838_v25  ;;  %v3415_v54 = vadd.f32 %v3414_v12, %v3413_v44 }
 0x1a8   : > { %v3475_v61 = vpop.f32.mrb[81].mxu1 }
 0x1a9   : > { %v3476_v45 = vadd.f32 %v3475_v61, %v3474_v11  ;;  %v3477_v27 = vpop.f32.mrb[82].mxu1  ;;  %v4938_v6 = vadd.f32 %v3415_v54, %v4843_v37 }
 0x1aa   : > { %v3478_v5 = vpop.f32.mrb[83].mxu1 }
 0x1ab   : > { %v3479_v40 = vadd.f32 %v3478_v5, %v3477_v27  ;;  %v4935_v10 = vadd.f32 %v3476_v45, %v4841_v4  ;;  %v3416_v56 = vpop.f32.mrb[84].mxu0 }
 0x1ac   : > { %v3417_v50 = vpop.f32.mrb[85].mxu0 }
 0x1ad   : > { %v4941_v19 = vadd.f32 %v3479_v40, %v4846_v29  ;;  %v3418_v15 = vadd.f32 %v3417_v50, %v3416_v56  ;;  %v3419_v31 = vpop.f32.mrb[86].mxu0 }
 0x1ae   : > { %v3420_v2 = vpop.f32.mrb[87].mxu0 }
 0x1af   : > { %v3480_v24 = vpop.f32.mrb[84].mxu1  ;;  %v4944_v9 = vadd.f32 %v3418_v15, %v4849_v7  ;;  %v3421_v4 = vadd.f32 %v3420_v2, %v3419_v31 }
 0x1b0   : > { %v3481_v55 = vpop.f32.mrb[85].mxu1 }
 0x1b1   : > { %v3482_v20 = vadd.f32 %v3481_v55, %v3480_v24  ;;  %v3483_v25 = vpop.f32.mrb[86].mxu1  ;;  %v4950_v29 = vadd.f32 %v3421_v4, %v4854_v51 }
 0x1b2   : > { %v3484_v62 = vpop.f32.mrb[87].mxu1 }
 0x1b3   : > { %v3485_v23 = vadd.f32 %v3484_v62, %v3483_v25  ;;  %v4947_v37 = vadd.f32 %v3482_v20, %v4852_v1  ;;  %v3422_v52 = vpop.f32.mrb[88].mxu0 }
 0x1b4   : > { %v3423_v60 = vpop.f32.mrb[89].mxu0 }
 0x1b5   : > { %v4953_v34 = vadd.f32 %v3485_v23, %v4857_v14  ;;  %v3424_v42 = vadd.f32 %v3423_v60, %v3422_v52  ;;  %v3425_v8 = vpop.f32.mrb[90].mxu0 }
 0x1b6   : > { %v3426_v61 = vpop.f32.mrb[91].mxu0 }
 0x1b7   : > { %v3486_v47 = vpop.f32.mrb[88].mxu1  ;;  %v4956_v45 = vadd.f32 %v3424_v42, %v4860_v57  ;;  %v3427_v1 = vadd.f32 %v3426_v61, %v3425_v8 }
 0x1b8   : > { %v3487_v32 = vpop.f32.mrb[89].mxu1 }
 0x1b9   : > { %v3488_v11 = vadd.f32 %v3487_v32, %v3486_v47  ;;  %v3489_v7 = vpop.f32.mrb[90].mxu1  ;;  %v4962_v14 = vadd.f32 %v3427_v1, %v4866_v49 }
 0x1ba   : > { %v3490_v22 = vpop.f32.mrb[91].mxu1 }
 0x1bb   : > { %v3491_v44 = vadd.f32 %v3490_v22, %v3489_v7  ;;  %v4959_v51 = vadd.f32 %v3488_v11, %v4863_v26  ;;  %v3428_v12 = vpop.f32.mrb[92].mxu0 }
 0x1bc   : > { %v3429_v54 = vpop.f32.mrb[93].mxu0 }
 0x1bd   : > { %v4965_v27 = vadd.f32 %v3491_v44, %v4869_v63  ;;  %v3430_v56 = vadd.f32 %v3429_v54, %v3428_v12  ;;  %v3431_v50 = vpop.f32.mrb[94].mxu0 }
 0x1be   : > { %v3432_v55 = vpop.f32.mrb[95].mxu0 }
 0x1bf   : > { %v3492_v5 = vpop.f32.mrb[92].mxu1  ;;  %v4968_v20 = vadd.f32 %v3430_v56, %v4872_v21  ;;  %v3433_v26 = vadd.f32 %v3432_v55, %v3431_v50 }
 0x1c0   : > { %v3493_v40 = vpop.f32.mrb[93].mxu1 }
 0x1c1   : > { %v3494_v24 = vadd.f32 %v3493_v40, %v3492_v5  ;;  %v3495_v57 = vpop.f32.mrb[94].mxu1  ;;  %v4974_v63 = vadd.f32 %v3433_v26, %v4878_v3 }
 0x1c2   : > { %v3496_v15 = vpop.f32.mrb[95].mxu1 }
 0x1c3   : > { %v3497_v31 = vadd.f32 %v3496_v15, %v3495_v57  ;;  %v4971_v49 = vadd.f32 %v3494_v24, %v4875_v36  ;;  %v3434_v2 = vpop.f32.mrb[96].mxu0 }
 0x1c4   : > { %v3435_v4 = vpop.f32.mrb[97].mxu0 }
 0x1c5   : > { %v4977_v25 = vadd.f32 %v3497_v31, %v4881_v13  ;;  %v3436_v52 = vadd.f32 %v3435_v4, %v3434_v2  ;;  %v3437_v60 = vpop.f32.mrb[98].mxu0 }
 0x1c6   : > { %v3438_v32 = vpop.f32.mrb[99].mxu0 }
 0x1c7   : > { %v3498_v62 = vpop.f32.mrb[96].mxu1  ;;  %v4980_v11 = vadd.f32 %v3436_v52, %v4884_v16  ;;  %v3439_v36 = vadd.f32 %v3438_v32, %v3437_v60 }
 0x1c8   : > { %v3499_v23 = vpop.f32.mrb[97].mxu1 }
 0x1c9   : > { %v3500_v47 = vadd.f32 %v3499_v23, %v3498_v62  ;;  %v3501_v21 = vpop.f32.mrb[98].mxu1  ;;  %v4986_v13 = vadd.f32 %v3439_v36, %v4890_v0 }
 0x1ca   : > { %v3502_v42 = vpop.f32.mrb[99].mxu1 }
 0x1cb   : > { %v3503_v8 = vadd.f32 %v3502_v42, %v3501_v21  ;;  %v4983_v3 = vadd.f32 %v3500_v47, %v4887_v58  ;;  %v3440_v61 = vpop.f32.mrb[100].mxu0 }
 0x1cc   : > { %v3441_v1 = vpop.f32.mrb[101].mxu0 }
 0x1cd   : > { %v4989_v7 = vadd.f32 %v3503_v8, %v4893_v35  ;;  %v3442_v12 = vadd.f32 %v3441_v1, %v3440_v61  ;;  %v3443_v54 = vpop.f32.mrb[102].mxu0 }
 0x1ce   : > { %v3444_v40 = vpop.f32.mrb[103].mxu0 }
 0x1cf   : > { %v3504_v22 = vpop.f32.mrb[100].mxu1  ;;  %v4992_v24 = vadd.f32 %v3442_v12, %v4896_v18  ;;  %v3445_v58 = vadd.f32 %v3444_v40, %v3443_v54 }
 0x1d0   : > { %v3505_v44 = vpop.f32.mrb[101].mxu1 }
 0x1d1   : > { %v3506_v5 = vadd.f32 %v3505_v44, %v3504_v22  ;;  %v3507_v16 = vpop.f32.mrb[102].mxu1  ;;  %v4998_v35 = vadd.f32 %v3445_v58, %v4902_v28 }
 0x1d2   : > { %v3508_v56 = vpop.f32.mrb[103].mxu1 }
 0x1d3   : > { %v3509_v50 = vadd.f32 %v3508_v56, %v3507_v16  ;;  %v4995_v0 = vadd.f32 %v3506_v5, %v4899_v39  ;;  %v3446_v55 = vpop.f32.mrb[104].mxu0 }
 0x1d4   : > { %v3447_v26 = vpop.f32.mrb[105].mxu0 }
 0x1d5   : > { %v5001_v57 = vadd.f32 %v3509_v50, %v4905_v43  ;;  %v3448_v2 = vadd.f32 %v3447_v26, %v3446_v55  ;;  %v3449_v18 = vpop.f32.mrb[106].mxu0 }
 0x1d6   : > { %v3450_v23 = vpop.f32.mrb[107].mxu0 }
 0x1d7   : > { %v3510_v15 = vpop.f32.mrb[104].mxu1  ;;  %v5004_v39 = vadd.f32 %v3448_v2, %v4908_v59  ;;  %v3451_v47 = vadd.f32 %v3450_v23, %v3449_v18 }
 0x1d8   : > { %v3511_v31 = vpop.f32.mrb[105].mxu1 }
 0x1d9   : > { %v3512_v62 = vadd.f32 %v3511_v31, %v3510_v15  ;;  %v3513_v4 = vpop.f32.mrb[106].mxu1  ;;  %v5010_v43 = vadd.f32 %v3451_v47, %v4914_v33 }
 0x1da   : > { %v3514_v52 = vpop.f32.mrb[107].mxu1 }
 0x1db   : > { %v3515_v28 = vadd.f32 %v3514_v52, %v3513_v4  ;;  %v5007_v60 = vadd.f32 %v3512_v62, %v4911_v46  ;;  %v3452_v32 = vpop.f32.mrb[108].mxu0 }
 0x1dc   : > { %v3453_v36 = vpop.f32.mrb[109].mxu0 }
 0x1dd   : > { %v5014_v21 = vadd.f32 %v3515_v28, %v4917_v41  ;;  %v3454_v61 = vadd.f32 %v3453_v36, %v3452_v32  ;;  %v3455_v22 = vpop.f32.mrb[110].mxu0 }
 0x1de   : > { %v3456_v44 = vpop.f32.mrb[111].mxu0 }
 0x1df   : > { %v3516_v42 = vpop.f32.mrb[108].mxu1  ;;  %v5017_v46 = vadd.f32 %v3454_v61, %v4920_v17  ;;  %v3457_v33 = vadd.f32 %v3456_v44, %v3455_v22 }
 0x1e0   : > { %v3517_v8 = vpop.f32.mrb[109].mxu1 }
 0x1e1   : > { %v3518_v59 = vadd.f32 %v3517_v8, %v3516_v42  ;;  %v3519_v1 = vpop.f32.mrb[110].mxu1  ;;  %v5023_v41 = vadd.f32 %v3457_v33, %v4926_v30 }
 0x1e2   : > { %v3520_v12 = vpop.f32.mrb[111].mxu1 }
 0x1e3   : > { %v3521_v5 = vadd.f32 %v3520_v12, %v3519_v1  ;;  %v5020_v54 = vadd.f32 %v3518_v59, %v4923_v38  ;;  %v3612_v56 = vpop.f32.mrb[112].mxu0 }
 0x1e4   : > { %v2335_v58 = vadd.f32 %v3612_v56, %v4947_v37  ;;  %v2326_v55 = vpop.f32.mrb[113].mxu0 }
 0x1e5   : > { %v5026_v16 = vadd.f32 %v3521_v5, %v4929_v48  ;;  %v2327_v15 = vadd.f32 %v2326_v55, %v4935_v10  ;;  %v3613_v38 = vpop.f32.mrb[114].mxu0 }
 0x1e6   : > { %v2338_v31 = vadd.f32 %v3613_v38, %v4953_v34  ;;  %v2329_v30 = vpop.f32.mrb[115].mxu0  ;;  %v2653_v47 = vmul.f32 %v2335_v58, %v2335_v58 }
 0x1e7   : > { %v3522_v40 = vpop.f32.mrb[112].mxu1  ;;  %v2330_v37 = vadd.f32 %v2329_v30, %v4941_v19  ;;  %v2651_v10 = vmul.f32 %v2327_v15, %v2327_v15 }
 0x1e8   : > { %v3523_v50 = vpop.f32.mrb[113].mxu1  ;;  %v3035_v18 = vpack.c.bf16 %v2338_v31, %v2335_v58  ;;  %v2654_v8 = vmul.f32 %v2338_v31, %v2338_v31 }
 0x1e9   : > { %v3524_v17 = vadd.f32 %v3523_v50, %v3522_v40  ;;  %v3525_v26 = vpop.f32.mrb[114].mxu1  ;;  %v3030_v4 = vpack.c.bf16 %v2330_v37, %v2327_v15  ;;  %v2613_v23 = vadd.f32 %v2330_v37, %v2327_v15  ;;  %v2652_v34 = vmul.f32 %v2330_v37, %v2330_v37 }
 0x1ea   : > { %v3526_v2 = vpop.f32.mrb[115].mxu1  ;;  %3107 = vst [vmem:[%s5034_s26 + $0x8] sm:$0xff] %v3035_v18  }
 0x1eb   : > { %v3527_v48 = vadd.f32 %v3526_v2, %v3525_v26  ;;  %v5038_v62 = vadd.f32 %v3524_v17, %v4932_v53  ;;  %3031 = vst [vmem:[%s5034_s26] sm:$0xff] %v3030_v4   ;;  %v2614_v28 = vadd.f32 %v2613_v23, %v2335_v58  ;;  %v2683_v32 = vadd.f32 %v2652_v34, %v2651_v10  ;;  %v3616_v36 = vpop.f32.mrb[116].mxu0 }
 0x1ec   : > { %v2351_v19 = vadd.f32 %v3616_v36, %v4971_v49  ;;  %v2342_v61 = vpop.f32.mrb[117].mxu0 }
 0x1ed   : > { %v5041_v52 = vadd.f32 %v3527_v48, %v4938_v6  ;;  %v2684_v59 = vadd.f32 %v2683_v32, %v2653_v47  ;;  %v2343_v1 = vadd.f32 %v2342_v61, %v4959_v51  ;;  %v2615_v44 = vadd.f32 %v2614_v28, %v2338_v31  ;;  %v3617_v12 = vpop.f32.mrb[118].mxu0 }
 0x1ee   : > { %v2354_v33 = vadd.f32 %v3617_v12, %v4977_v25  ;;  %v2345_v40 = vpop.f32.mrb[119].mxu0  ;;  %v2657_v48 = vmul.f32 %v2351_v19, %v2351_v19 }
 0x1ef   : > { %v3528_v42 = vpop.f32.mrb[116].mxu1  ;;  %v2616_v56 = vadd.f32 %v2615_v44, %v2343_v1  ;;  %v2655_v58 = vmul.f32 %v2343_v1, %v2343_v1  ;;  %v2685_v50 = vadd.f32 %v2684_v59, %v2654_v8  ;;  %v2346_v17 = vadd.f32 %v2345_v40, %v4965_v27 }
 0x1f0   : > { %v3529_v53 = vpop.f32.mrb[117].mxu1  ;;  %v3045_v49 = vpack.c.bf16 %v2354_v33, %v2351_v19  ;;  %v2658_v47 = vmul.f32 %v2354_v33, %v2354_v33 }
 0x1f1   : > { %v3530_v22 = vadd.f32 %v3529_v53, %v3528_v42  ;;  %v3531_v6 = vpop.f32.mrb[118].mxu1  ;;  %v2686_v51 = vadd.f32 %v2685_v50, %v2655_v58  ;;  %v3040_v38 = vpack.c.bf16 %v2346_v17, %v2343_v1  ;;  %v2617_v25 = vadd.f32 %v2616_v56, %v2346_v17 }
 0x1f2   : > { %v3532_v5 = vpop.f32.mrb[119].mxu1  ;;  %3109 = vst [vmem:[%s5034_s26 + $0x18] sm:$0xff] %v3045_v49   ;;  %v2656_v31 = vmul.f32 %v2346_v17, %v2346_v17 }
 0x1f3   : > { %v3533_v55 = vadd.f32 %v3532_v5, %v3531_v6  ;;  %v5050_v15 = vadd.f32 %v3530_v22, %v4944_v9  ;;  %v3620_v30 = vpop.f32.mrb[120].mxu0  ;;  %3108 = vst [vmem:[%s5034_s26 + $0x10] sm:$0xff] %v3040_v38   ;;  %v2618_v37 = vadd.f32 %v2617_v25, %v2351_v19 }
 0x1f4   : > { %v2687_v10 = vadd.f32 %v2686_v51, %v2656_v31  ;;  %v2367_v18 = vadd.f32 %v3620_v30, %v4995_v0  ;;  %v2358_v4 = vpop.f32.mrb[121].mxu0 }
 0x1f5   : > { %v5053_v26 = vadd.f32 %v3533_v55, %v4950_v29  ;;  %v2359_v23 = vadd.f32 %v2358_v4, %v4983_v3  ;;  %v3621_v29 = vpop.f32.mrb[122].mxu0  ;;  %v2619_v32 = vadd.f32 %v2618_v37, %v2354_v33 }
 0x1f6   : > { %v2688_v28 = vadd.f32 %v2687_v10, %v2657_v48  ;;  %v2370_v42 = vadd.f32 %v3621_v29, %v5001_v57  ;;  %v2361_v8 = vpop.f32.mrb[123].mxu0  ;;  %v2661_v40 = vmul.f32 %v2367_v18, %v2367_v18 }
 0x1f7   : > { %v3534_v2 = vpop.f32.mrb[120].mxu1  ;;  %v2659_v19 = vmul.f32 %v2359_v23, %v2359_v23  ;;  %v2362_v0 = vadd.f32 %v2361_v8, %v4989_v7  ;;  %v2620_v59 = vadd.f32 %v2619_v32, %v2359_v23 }
 0x1f8   : > { %v3535_v27 = vpop.f32.mrb[121].mxu1  ;;  %v2689_v3 = vadd.f32 %v2688_v28, %v2658_v47  ;;  %v3055_v22 = vpack.c.bf16 %v2370_v42, %v2367_v18 }
 0x1f9   : > { %v3536_v9 = vadd.f32 %v3535_v27, %v3534_v2  ;;  %v3537_v34 = vpop.f32.mrb[122].mxu1  ;;  %v3050_v1 = vpack.c.bf16 %v2362_v0, %v2359_v23  ;;  %v2660_v44 = vmul.f32 %v2362_v0, %v2362_v0  ;;  %v2621_v57 = vadd.f32 %v2620_v59, %v2362_v0 }
 0x1fa   : > { %v3538_v36 = vpop.f32.mrb[123].mxu1  ;;  %v2690_v12 = vadd.f32 %v2689_v3, %v2659_v19  ;;  %3111 = vst [vmem:[%s5034_s26 + $0x28] sm:$0xff] %v3055_v22  }
 0x1fb   : > { %v3539_v53 = vadd.f32 %v3538_v36, %v3537_v34  ;;  %v5062_v61 = vadd.f32 %v3536_v9, %v4956_v45  ;;  %3110 = vst [vmem:[%s5034_s26 + $0x20] sm:$0xff] %v3050_v1   ;;  %v3624_v5 = vpop.f32.mrb[124].mxu0  ;;  %v2622_v56 = vadd.f32 %v2621_v57, %v2367_v18 }
 0x1fc   : > { %v2691_v7 = vadd.f32 %v2690_v12, %v2660_v44  ;;  %v2383_v45 = vadd.f32 %v3624_v5, %v5020_v54  ;;  %v2374_v50 = vpop.f32.mrb[125].mxu0 }
 0x1fd   : > { %v5065_v6 = vadd.f32 %v3539_v53, %v4962_v14  ;;  %v2375_v49 = vadd.f32 %v2374_v50, %v5007_v60  ;;  %v3625_v51 = vpop.f32.mrb[126].mxu0  ;;  %v2662_v14 = vmul.f32 %v2370_v42, %v2370_v42  ;;  %v2623_v25 = vadd.f32 %v2622_v56, %v2370_v42 }
 0x1fe   : > { %v2692_v38 = vadd.f32 %v2691_v7, %v2661_v40  ;;  %v2386_v31 = vadd.f32 %v3625_v51, %v5026_v16  ;;  %v2377_v30 = vpop.f32.mrb[127].mxu0  ;;  %v2665_v28 = vmul.f32 %v2383_v45, %v2383_v45 }
 0x1ff   : > { %v3540_v33 = vpop.f32.mrb[124].mxu1  ;;  %v2663_v48 = vmul.f32 %v2375_v49, %v2375_v49  ;;  %v2378_v54 = vadd.f32 %v2377_v30, %v5014_v21  ;;  %v2624_v18 = vadd.f32 %v2623_v25, %v2375_v49 }
 0x200   : > { %v3541_v58 = vpop.f32.mrb[125].mxu1  ;;  %v2693_v27 = vadd.f32 %v2692_v38, %v2662_v14  ;;  %v3065_v60 = vpack.c.bf16 %v2386_v31, %v2383_v45  ;;  %v2666_v59 = vmul.f32 %v2386_v31, %v2386_v31 }
 0x201   : > { %v3542_v55 = vadd.f32 %v3541_v58, %v3540_v33  ;;  %v3543_v17 = vpop.f32.mrb[126].mxu1  ;;  %v3060_v4 = vpack.c.bf16 %v2378_v54, %v2375_v49  ;;  %v2664_v9 = vmul.f32 %v2378_v54, %v2378_v54  ;;  %v2625_v29 = vadd.f32 %v2624_v18, %v2378_v54 }
 0x202   : > { %v3544_v2 = vpop.f32.mrb[127].mxu1  ;;  %v2694_v34 = vadd.f32 %v2693_v27, %v2663_v48  ;;  %3113 = vst [vmem:[%s5034_s26 + $0x38] sm:$0xff] %v3065_v60  }
 0x203   : > { %v3545_v37 = vadd.f32 %v3544_v2, %v3543_v17  ;;  %v2254_v10 = vadd.f32 %v3542_v55, %v4968_v20  ;;  %3112 = vst [vmem:[%s5034_s26 + $0x30] sm:$0xff] %v3060_v4   ;;  %v3628_v47 = vpop.f32.mrb[128].mxu0  ;;  %v2626_v32 = vadd.f32 %v2625_v29, %v2383_v45 }
 0x204   : > { %v2695_v42 = vadd.f32 %v2694_v34, %v2664_v9  ;;  %v2399_v21 = vadd.f32 %v3628_v47, %v5050_v15  ;;  %v2390_v20 = vpop.f32.mrb[129].mxu0 }
 0x205   : > { %v2257_v23 = vadd.f32 %v3545_v37, %v4974_v63  ;;  %v2391_v19 = vadd.f32 %v2390_v20, %v5038_v62  ;;  %v3629_v0 = vpop.f32.mrb[130].mxu0  ;;  %v2627_v3 = vadd.f32 %v2626_v32, %v2386_v31 }
 0x206   : > { %v2696_v63 = vadd.f32 %v2695_v42, %v2665_v28  ;;  %v2402_v22 = vadd.f32 %v3629_v0, %v5053_v26  ;;  %v2393_v44 = vpop.f32.mrb[131].mxu0  ;;  %v2669_v49 = vmul.f32 %v2399_v21, %v2399_v21 }
 0x207   : > { %v3546_v16 = vpop.f32.mrb[128].mxu1  ;;  %v2667_v12 = vmul.f32 %v2391_v19, %v2391_v19  ;;  %v2394_v15 = vadd.f32 %v2393_v44, %v5041_v52  ;;  %v2628_v5 = vadd.f32 %v2627_v3, %v2391_v19 }
 0x208   : > { %v3547_v36 = vpop.f32.mrb[129].mxu1  ;;  %v2697_v40 = vadd.f32 %v2696_v63, %v2666_v59  ;;  %v3075_v62 = vpack.c.bf16 %v2402_v22, %v2399_v21  ;;  %v2670_v30 = vmul.f32 %v2402_v22, %v2402_v22 }
 0x209   : > { %v3548_v8 = vadd.f32 %v3547_v36, %v3546_v16  ;;  %v3549_v53 = vpop.f32.mrb[130].mxu1  ;;  %v3070_v56 = vpack.c.bf16 %v2394_v15, %v2391_v19  ;;  %v2668_v7 = vmul.f32 %v2394_v15, %v2394_v15  ;;  %v2629_v50 = vadd.f32 %v2628_v5, %v2394_v15 }
 0x20a   : > { %v3550_v1 = vpop.f32.mrb[131].mxu1  ;;  %v2698_v58 = vadd.f32 %v2697_v40, %v2667_v12  ;;  %3115 = vst [vmem:[%s5034_s26 + $0x48] sm:$0xff] %v3075_v62  }
 0x20b   : > { %v3551_v57 = vadd.f32 %v3550_v1, %v3549_v53  ;;  %v2262_v33 = vadd.f32 %v3548_v8, %v4980_v11  ;;  %3114 = vst [vmem:[%s5034_s26 + $0x40] sm:$0xff] %v3070_v56   ;;  %v3632_v55 = vpop.f32.mrb[132].mxu0  ;;  %v2630_v17 = vadd.f32 %v2629_v50, %v2399_v21 }
 0x20c   : > { %v2699_v51 = vadd.f32 %v2698_v58, %v2668_v7  ;;  %v2415_v14 = vadd.f32 %v3632_v55, %v2254_v10  ;;  %v2406_v38 = vpop.f32.mrb[133].mxu0 }
 0x20d   : > { %v2265_v45 = vadd.f32 %v3551_v57, %v4986_v13  ;;  %v2407_v25 = vadd.f32 %v2406_v38, %v5062_v61  ;;  %v3633_v2 = vpop.f32.mrb[134].mxu0  ;;  %v2631_v13 = vadd.f32 %v2630_v17, %v2402_v22 }
 0x20e   : > { %v2700_v48 = vadd.f32 %v2699_v51, %v2669_v49  ;;  %v2418_v37 = vadd.f32 %v3633_v2, %v2257_v23  ;;  %v2409_v18 = vpop.f32.mrb[135].mxu0  ;;  %v2673_v21 = vmul.f32 %v2415_v14, %v2415_v14 }
 0x20f   : > { %v3552_v26 = vpop.f32.mrb[132].mxu1  ;;  %v2671_v27 = vmul.f32 %v2407_v25, %v2407_v25  ;;  %v2410_v4 = vadd.f32 %v2409_v18, %v5065_v6  ;;  %v2632_v9 = vadd.f32 %v2631_v13, %v2407_v25 }
 0x210   : > { %v3553_v52 = vpop.f32.mrb[133].mxu1  ;;  %v2701_v34 = vadd.f32 %v2700_v48, %v2670_v30  ;;  %v3085_v29 = vpack.c.bf16 %v2418_v37, %v2415_v14  ;;  %v2674_v63 = vmul.f32 %v2418_v37, %v2418_v37 }
 0x211   : > { %v3554_v11 = vadd.f32 %v3553_v52, %v3552_v26  ;;  %v3555_v31 = vpop.f32.mrb[134].mxu1  ;;  %v3080_v61 = vpack.c.bf16 %v2410_v4, %v2407_v25  ;;  %v2672_v16 = vmul.f32 %v2410_v4, %v2410_v4  ;;  %v2633_v32 = vadd.f32 %v2632_v9, %v2410_v4 }
 0x212   : > { %v3556_v54 = vpop.f32.mrb[135].mxu1  ;;  %v2702_v28 = vadd.f32 %v2701_v34, %v2671_v27  ;;  %3117 = vst [vmem:[%s5034_s26 + $0x58] sm:$0xff] %v3085_v29  }
 0x213   : > { %v3557_v60 = vadd.f32 %v3556_v54, %v3555_v31  ;;  %v2270_v10 = vadd.f32 %v3554_v11, %v4992_v24  ;;  %3116 = vst [vmem:[%s5034_s26 + $0x50] sm:$0xff] %v3080_v61   ;;  %v3636_v42 = vpop.f32.mrb[136].mxu0  ;;  %v2634_v36 = vadd.f32 %v2633_v32, %v2415_v14 }
 0x214   : > { %v2703_v20 = vadd.f32 %v2702_v28, %v2672_v16  ;;  %v2422_v19 = vpop.f32.mrb[137].mxu0 }
 0x215   : > { %v2273_v47 = vadd.f32 %v3557_v60, %v4998_v35  ;;  %v2431_v8 = vadd.f32 %v3636_v42, %v2270_v10  ;;  %v2423_v53 = vadd.f32 %v2422_v19, %v2262_v33  ;;  %v3637_v59 = vpop.f32.mrb[138].mxu0  ;;  %v2635_v35 = vadd.f32 %v2634_v36, %v2418_v37 }
 0x216   : > { %v2704_v3 = vadd.f32 %v2703_v20, %v2673_v21  ;;  %v2425_v44 = vpop.f32.mrb[139].mxu0 }
 0x217   : > { %v3558_v23 = vpop.f32.mrb[136].mxu1  ;;  %v2434_v22 = vadd.f32 %v3637_v59, %v2273_v47  ;;  %v2675_v12 = vmul.f32 %v2423_v53, %v2423_v53  ;;  %v2426_v15 = vadd.f32 %v2425_v44, %v2265_v45  ;;  %v2636_v40 = vadd.f32 %v2635_v35, %v2423_v53 }
 0x218   : > { %v3559_v6 = vpop.f32.mrb[137].mxu1  ;;  %v2705_v62 = vadd.f32 %v2704_v3, %v2674_v63  ;;  %v2677_v17 = vmul.f32 %v2431_v8, %v2431_v8 }
 0x219   : > { %v3560_v24 = vadd.f32 %v3559_v6, %v3558_v23  ;;  %v3561_v0 = vpop.f32.mrb[138].mxu1  ;;  %v3095_v56 = vpack.c.bf16 %v2434_v22, %v2431_v8  ;;  %v3090_v7 = vpack.c.bf16 %v2426_v15, %v2423_v53  ;;  %v2676_v33 = vmul.f32 %v2426_v15, %v2426_v15 }
 0x21a   : > { %v3562_v1 = vpop.f32.mrb[139].mxu1  ;;  %v2706_v50 = vadd.f32 %v2705_v62, %v2675_v12  ;;  %v2637_v26 = vadd.f32 %v2636_v40, %v2426_v15  ;;  %v2678_v31 = vmul.f32 %v2434_v22, %v2434_v22 }
 0x21b   : > { %v3563_v57 = vadd.f32 %v3562_v1, %v3561_v0  ;;  %v2278_v5 = vadd.f32 %v3560_v24, %v5004_v39  ;;  %3119 = vst [vmem:[%s5034_s26 + $0x68] sm:$0xff] %v3095_v56   ;;  %3118 = vst [vmem:[%s5034_s26 + $0x60] sm:$0xff] %v3090_v7   ;;  %v3640_v49 = vpop.f32.mrb[140].mxu0 }
 0x21c   : > { %v2638_v51 = vadd.f32 %v2637_v26, %v2431_v8  ;;  %v2707_v14 = vadd.f32 %v2706_v50, %v2676_v33  ;;  %v2438_v45 = vpop.f32.mrb[141].mxu0 }
 0x21d   : > { %v2281_v58 = vadd.f32 %v3563_v57, %v5010_v43  ;;  %v2439_v39 = vadd.f32 %v2438_v45, %v2278_v5  ;;  %v3641_v25 = vpop.f32.mrb[142].mxu0 }
 0x21e   : > { %v2708_v2 = vadd.f32 %v2707_v14, %v2677_v17  ;;  %v2639_v30 = vadd.f32 %v2638_v51, %v2434_v22  ;;  %v2441_v43 = vpop.f32.mrb[143].mxu0 }
 0x21f   : > { %v3564_v55 = vpop.f32.mrb[140].mxu1  ;;  %v2679_v37 = vmul.f32 %v2439_v39, %v2439_v39  ;;  %v2442_v18 = vadd.f32 %v2441_v43, %v2281_v58 }
 0x220   : > { %v3565_v52 = vpop.f32.mrb[141].mxu1  ;;  %v2640_v27 = vadd.f32 %v2639_v30, %v2439_v39  ;;  %v2709_v60 = vadd.f32 %v2708_v2, %v2678_v31 }
 0x221   : > { %v3566_v38 = vadd.f32 %v3565_v52, %v3564_v55  ;;  %v3567_v11 = vpop.f32.mrb[142].mxu1  ;;  %v3100_v9 = vpack.c.bf16 %v2442_v18, %v2439_v39  ;;  %v2680_v34 = vmul.f32 %v2442_v18, %v2442_v18 }
 0x222   : > { %v3568_v48 = vpop.f32.mrb[143].mxu1  ;;  %v2710_v29 = vadd.f32 %v2709_v60, %v2679_v37  ;;  %v2641_v61 = vadd.f32 %v2640_v27, %v2442_v18 }
 0x223   : > { %v2286_v13 = vadd.f32 %v3566_v38, %v5017_v46  ;;  %v3569_v54 = vadd.f32 %v3568_v48, %v3567_v11  ;;  %3120 = vst [vmem:[%s5034_s26 + $0x70] sm:$0xff] %v3100_v9  }
 0x224   : > { %v2711_v32 = vadd.f32 %v2710_v29, %v2680_v34 }
 0x225   : > { %v2447_v4 = vadd.f32 %v3640_v49, %v2286_v13  ;;  %v2289_v10 = vadd.f32 %v3569_v54, %v5023_v41 }
 0x227   : > { %v2681_v16 = vmul.f32 %v2447_v4, %v2447_v4  ;;  %v2450_v47 = vadd.f32 %v3641_v25, %v2289_v10  ;;  %v2642_v28 = vadd.f32 %v2641_v61, %v2447_v4 }
 0x229   : > { %v3105_v46 = vpack.c.bf16 %v2450_v47, %v2447_v4  ;;  %v2682_v23 = vmul.f32 %v2450_v47, %v2450_v47  ;;  %v2643_v42 = vadd.f32 %v2642_v28, %v2450_v47  ;;  %v2712_v21 = vadd.f32 %v2711_v32, %v2681_v16 }
 0x22b   : > { %3121 = vst [vmem:[%s5034_s26 + $0x78] sm:$0xff] %v3105_v46   ;;  %v2644_v36 = vrot.slane %v2643_v42, 4  ;;  %v2713_v20 = vadd.f32 %v2712_v21, %v2682_v23 }
 0x22d   : > { %v2645_v8 = vadd.f32 %v2644_v36, %v2643_v42  ;;  %v2714_v6 = vrot.slane %v2713_v20, 4 }
 0x22f   : > { %v2646_v41 = vrot.slane %v2645_v8, 2  ;;  %v2715_v19 = vadd.f32 %v2714_v6, %v2713_v20 }
 0x231   : > { %v2647_v24 = vadd.f32 %v2646_v41, %v2645_v8  ;;  %v2716_v53 = vrot.slane %v2715_v19, 2 }
 0x233   : > { %v2648_v0 = vrot.slane %v2647_v24, 1  ;;  %v2717_v59 = vadd.f32 %v2716_v53, %v2715_v19 }
 0x235   : > { %v2649_v63 = vadd.f32 %v2648_v0, %v2647_v24  ;;  %v2718_v3 = vrot.slane %v2717_v59, 1 }
 0x237   : > { %2650 = vst [vmem:[%s182_s30] sm:$0x1] %v2649_v63  ;;  %v2719_v35 = vadd.f32 %v2718_v3, %v2717_v59 }
 0x239   : > { %2720 = vst [vmem:[%s182_s30 + $0x1] sm:$0x1] %v2719_v35 }
 0x23a PF: > { %s14_s12 = sadd.s32 1, %s3775_s12  }
 0x23b   : > { %p11_p5 = scmp.ge.s32.totalorder %s14_s12, 4  }
 0x23d   :  { %13 = sbr.rel (!%p11_p5) target bundleno = 1 (0x1), region = 70 }

// kernel: decoder_block_forward.4
= control target key start
LH: loop header
LB: loop body
LE: loop exit
PB: predicated region body
PF: predicated region fallthrough
CT: control target
= control target key end

     0   :  { %s3820_s18 = smov 0   ;;  %s5234_s0 = inlined_call_operand.vmem [shape: bf16[2,18,18,128], index: 0, kind: input, shape index: {}]   ;;  %s5235_s1 = inlined_call_operand.vmem [shape: bf16[1152,128], index: 1, kind: input, shape index: {}]   ;;  %s5236_s2 = inlined_call_operand.vmem [shape: f32[1,128], index: 2, kind: input, shape index: {}]   ;;  %s5237_s3 = inlined_call_operand.vmem [shape: f32[1,128], index: 3, kind: input, shape index: {}]   ;;  %s5238_s4 = inlined_call_operand.vmem [shape: bf16[512,128], index: 4, kind: output, shape index: {0}]   ;;  %s5239_s5 = inlined_call_operand.vmem [shape: f32[2,2,128], index: 5, kind: output, shape index: {1}]  }
   0x1 LB: > { %s3826_s19 = sadd.s32 4294967295, %s3785_s18   ;;  %p2739_p0 = scmp.ge.s32.totalorder %s3785_s18, 1  ;;  %s3785_s18 = sphi %s3820_s18, %s16_s18  }
   0x2   : > { %p190_p1 = scmp.lt.s32.totalorder %s3785_s18, 3 }
   0x4   : > { %p191_p2 = pnand %p2739_p0, %p190_p1 }
   0x6   : > { %194 = sbr.rel (%p191_p2) target bundleno = 572 (0x23c), region = 36 }
   0xd   : > { %v3705_v0 = vld [vmem:[%s5235_s1 + $0x40] sm:$0xff]   ;;  %v3787_v2 = vmov 0   ;;  %v3707_v4 = vld [vmem:[%s5235_s1 + $0x48] sm:$0xff]   ;;  %p222_p3 = scmp.lt.s32.totalorder %s3826_s19, 1  ;;  %v3709_v6 = vld [vmem:[%s5235_s1 + $0x50] sm:$0xff]   ;;  %v292_v9 = vlaneseq  ;;  %vm3788_vm3 = vmmov 1  }
   0xe   : > { %v3706_v1 = vld [vmem:[%s5235_s1] sm:$0xff]   ;;  %v3836_v3 = vrot.slane %v3787_v2, 1  ;;  %3157 = vmatprep.subr.bf16.mxu0 %v3705_v0  ;;  %3677 = vmatprep.subr.bf16.mxu1 %v3705_v0  ;;  %v3708_v5 = vld [vmem:[%s5235_s1 + $0x8] sm:$0xff]   ;;  %v3710_v7 = vld [vmem:[%s5235_s1 + $0x10] sm:$0xff]   ;;  %vm655_vm2 = vsmask.f32 7424 }
   0xf   : > { %3158 = vmatpush3.bf16.msra.mxu0 %v3706_v1  ;;  %3685 = vmatpush3.bf16.msra.mxu1 %v3706_v1  ;;  %s3850_s30 = scalar_select %p222_p3, %s3826_s19, 1  ;;  %v3711_v8 = vld [vmem:[%s5235_s1 + $0x58] sm:$0xff]   ;;  %v3713_v11 = vld [vmem:[%s5235_s1 + $0x60] sm:$0xff]   ;;  %v3870_v12 = vshrl.u32 %v292_v9, 7  ;;  %v3715_v14 = vld [vmem:[%s5235_s1 + $0x68] sm:$0xff]   ;;  %vm896_vm5 = vcmask 1046528  }
  0x10   : > { %5269 = vst [vmem:[#allocation2_spill] sm:$0xff] %v3836_v3  ;;  %3159 = vmatprep.subr.bf16.mxu0 %v3707_v4  ;;  %3678 = vmatprep.subr.bf16.mxu1 %v3707_v4  ;;  %v3712_v10 = vld [vmem:[%s5235_s1 + $0x18] sm:$0xff]   ;;  %v3714_v13 = vld [vmem:[%s5235_s1 + $0x20] sm:$0xff]   ;;  %v3716_v23 = vld [vmem:[%s5235_s1 + $0x28] sm:$0xff]  }
  0x11   : > { %1607 = vmatprep.mubr.bf16.mxu0 %v3836_v3  ;;  %s3693_s10 = smul.u32 216, %s3850_s30  ;;  %v3883_v17 = vld [vmem:[%s5236_s2] ss:$0 sm:$0xff]  ;;  %v3886_v20 = vadd.s32 16, %v3870_v12  ;;  %v3717_v27 = vld [vmem:[%s5235_s1 + $0x70] sm:$0xff]   ;;  %vm296_vm0 = vcmp.ge.s32.totalorder %v3870_v12, 1 }
  0x12   : > { %v3891_v22 = vld [vmem:[%s5237_s3] ss:$0 sm:$0xff]  ;;  %v3718_v31 = vld [vmem:[%s5235_s1 + $0x30] sm:$0xff]   ;;  %v3719_v32 = vld [vmem:[%s5235_s1 + $0x78] sm:$0xff]   ;;  %s2743_s7 = sshll.u32 %s3850_s30, 1 }
  0x13   : > { %3160 = vmatpush3.bf16.msra.mxu0 %v3708_v5  ;;  %3686 = vmatpush3.bf16.msra.mxu1 %v3708_v5  ;;  %s3868_s17 = scalar_lea.vmem %s5234_s0, %s3693_s10  ;;  %vm301_vm1 = vcmp.le.s32.totalorder %v3886_v20, 16  ;;  %v3720_v43 = vld [vmem:[%s5235_s1 + $0x38] sm:$0xff]   ;;  %v3721_v48 = vld [vmem:[%s5235_s1 + $0xc0] sm:$0xff]   ;;  %vm3963_vm4 = vmpackc.low %vm3788_vm3, %vm296_vm0  ;;  %s236_s10 = scalar_lea.vmem %s5239_s5, %s2743_s7 }
  0x14   : > { %3161 = vmatprep.subr.bf16.mxu0 %v3709_v6  ;;  %3679 = vmatprep.subr.bf16.mxu1 %v3709_v6  ;;  %v3139_v15 = vld [vmem:[%s3868_s17 + $0x90] sm:$0xff]   ;;  %v276_v16 = vld [vmem:[%s3868_s17 + $0x98] sm:$0x1]  ;;  %v277_v38 = vld [vmem:[%s3868_s17 + $0x9c] sm:$0xff]  }
  0x15   : > { %v3044_v18 = vunpack.c.l.bf16 %v3139_v15  ;;  %v3045_v19 = vunpack.c.h.bf16 %v3139_v15  ;;  %v355_v21 = vunpack.c.l.bf16 %v276_v16  ;;  %v241_v36 = vld [vmem:[%s3868_s17 + $0xc] sm:$0xff]   ;;  %v243_v37 = vld [vmem:[%s3868_s17 + $0x14] sm:$0x1]  ;;  %v279_v42 = vld [vmem:[%s3868_s17 + $0xa4] sm:$0x1]  ;;  %v356_v50 = vunpack.c.l.bf16 %v277_v38 }
  0x16   : > { %v320_v41 = vunpack.c.l.bf16 %v241_v36  ;;  %v321_v46 = vunpack.c.h.bf16 %v241_v36  ;;  %v322_v47 = vunpack.c.l.bf16 %v243_v37  ;;  %v357_v51 = vunpack.c.h.bf16 %v277_v38  ;;  %v3722_v56 = vld [vmem:[%s5235_s1 + $0x140] sm:$0xff]   ;;  %v3134_v15 = vld [vmem:[%s3868_s17 + $0x18] sm:$0xff]   ;;  %v3726_v37 = vld [vmem:[%s5235_s1 + $0x88] sm:$0xff]  }
  0x17   : > { %3162 = vmatpush3.bf16.msra.mxu0 %v3710_v7  ;;  %3687 = vmatpush3.bf16.msra.mxu1 %v3710_v7  ;;  %v414_v24 = vmul.f32 %v3044_v18, %v3883_v17  ;;  %v415_v25 = vmul.f32 %v3045_v19, %v3883_v17  ;;  %v416_v26 = vmul.f32 %v3883_v17, %v355_v21  ;;  %v358_v52 = vunpack.c.l.bf16 %v279_v42  ;;  %v3724_v2 = vld [vmem:[%s5235_s1 + $0x100] sm:$0xff]   ;;  %v3725_v18 = vld [vmem:[%s5235_s1 + $0xc8] sm:$0xff]  }
  0x18   : > { %3163 = vmatprep.subr.bf16.mxu0 %v3711_v8  ;;  %3680 = vmatprep.subr.bf16.mxu1 %v3711_v8  ;;  %v381_v49 = vmul.f32 %v3883_v17, %v320_v41  ;;  %v382_v57 = vmul.f32 %v3883_v17, %v321_v46  ;;  %v383_v58 = vmul.f32 %v3883_v17, %v322_v47  ;;  %v3024_v36 = vunpack.c.l.bf16 %v3134_v15 }
  0x19   : > { %v475_v28 = vadd.f32 %v3891_v22, %v414_v24  ;;  %v476_v29 = vadd.f32 %v3891_v22, %v415_v25  ;;  %v477_v30 = vadd.f32 %v3891_v22, %v416_v26  ;;  %v417_v60 = vmul.f32 %v3883_v17, %v356_v50  ;;  %v3732_v25 = vld [vmem:[%s5235_s1 + $0x108] sm:$0xff]   ;;  %v3727_v50 = vld [vmem:[%s5235_s1 + $0xd0] sm:$0xff]  }
  0x1a   : > { %v442_v59 = vadd.f32 %v3891_v22, %v381_v49  ;;  %v418_v61 = vmul.f32 %v3883_v17, %v357_v51  ;;  %v443_v0 = vadd.f32 %v3891_v22, %v382_v57  ;;  %v419_v1 = vmul.f32 %v3883_v17, %v358_v52 }
  0x1b   : > { %3164 = vmatpush3.bf16.msra.mxu0 %v3712_v10  ;;  %3688 = vmatpush3.bf16.msra.mxu1 %v3712_v10  ;;  %v529_v33 = vmax.f32 %v475_v28, 0.0  ;;  %v530_v34 = vmax.f32 %v476_v29, 0.0  ;;  %v531_v35 = vmax.f32 %v477_v30, 0.0  ;;  %v444_v4 = vadd.f32 %v3891_v22, %v383_v58  ;;  %v3723_v10 = vld [vmem:[%s5235_s1 + $0x80] sm:$0xff]   ;;  %v282_v58 = vld [vmem:[%s3868_s17 + $0xb0] sm:$0x1] }
  0x1c   : > { %3165 = vmatprep.subr.bf16.mxu0 %v3713_v11  ;;  %3681 = vmatprep.subr.bf16.mxu1 %v3713_v11  ;;  %v496_v5 = vmax.f32 %v442_v59, 0.0  ;;  %v478_v6 = vadd.f32 %v3891_v22, %v417_v60  ;;  %v479_v7 = vadd.f32 %v3891_v22, %v418_v61  ;;  %v497_v11 = vmax.f32 %v443_v0, 0.0  ;;  %v3729_v61 = vld [vmem:[%s5235_s1 + $0xd8] sm:$0xff]   ;;  %v247_v0 = vld [vmem:[%s3868_s17 + $0x24] sm:$0xff]  }
  0x1d   : > { %v601_v39 = vsel %vm296_vm0, %v529_v33, 0.0  ;;  %v603_v40 = vsel %vm301_vm1, %v531_v35, 0.0  ;;  %v3951_v9 = vpack.c.bf16 %v530_v34, %v529_v33  ;;  %v498_v19 = vmax.f32 %v444_v4, 0.0 }
  0x1e   : > { %v3924_v44 = vpack.c.bf16 %v530_v34, %v601_v39  ;;  %v3926_v45 = vpack.c.bf16 %v603_v40, %v603_v40  ;;  %v568_v21 = vsel %vm296_vm0, %v496_v5, 0.0  ;;  %v533_v24 = vmax.f32 %v479_v7, 0.0 }
  0x1f   : > { %3166 = vmatpush3.bf16.msra.mxu0 %v3714_v13  ;;  %3689 = vmatpush3.bf16.msra.mxu1 %v3714_v13  ;;  %v480_v13 = vadd.f32 %v3891_v22, %v419_v1  ;;  %v3979_v28 = vpack.c.bf16 %v497_v11, %v568_v21  ;;  %v3981_v30 = vpack.c.bf16 %v497_v11, %v496_v5  ;;  %v570_v33 = vsel %vm301_vm1, %v498_v19, 0.0  ;;  %v3738_v11 = vld [vmem:[%s5235_s1 + $0x150] sm:$0xff]   ;;  %v249_v19 = vld [vmem:[%s3868_s17 + $0x2c] sm:$0x1]  ;;  %v3731_v21 = vld [vmem:[%s5235_s1 + $0x98] sm:$0xff]  }
  0x20   : > { %3167 = vmatprep.subr.bf16.mxu0 %v3715_v14  ;;  %3682 = vmatprep.subr.bf16.mxu1 %v3715_v14  ;;  %v801_v53 = vshrl.u32 %v3924_v44, 16  ;;  %v803_v54 = vshll.u32 %v3924_v44, 16  ;;  %v808_v55 = vshll.u32 %v3926_v45, 16  ;;  %v3730_v14 = vld [vmem:[%s5235_s1 + $0x148] sm:$0xff]   ;;  %v3998_v38 = vpack.c.bf16 %v570_v33, %v570_v33 }
  0x21   : > { %v534_v29 = vmax.f32 %v480_v13, 0.0  ;;  %v669_v39 = vshrl.u32 %v3979_v28, 16  ;;  %v671_v40 = vshll.u32 %v3979_v28, 16  ;;  %v3025_v46 = vunpack.c.h.bf16 %v3134_v15 }
  0x22   : > { %v805_v62 = vrot.slane %v803_v54, 1  ;;  %v810_v63 = vrot.slane %v808_v55, 1  ;;  %v676_v49 = vshll.u32 %v3998_v38, 16  ;;  %v384_v51 = vmul.f32 %v3024_v36, %v3883_v17 }
  0x23   : > { %3168 = vmatpush3.bf16.msra.mxu0 %v3716_v23  ;;  %3690 = vmatpush3.bf16.msra.mxu1 %v3716_v23  ;;  %v532_v23 = vmax.f32 %v478_v6, 0.0  ;;  %v606_v41 = vsel %vm301_vm1, %v534_v29, 0.0  ;;  %v385_v57 = vmul.f32 %v3025_v46, %v3883_v17  ;;  %v326_v29 = vunpack.c.l.bf16 %v247_v0 }
  0x24   : > { %3169 = vmatprep.subr.bf16.mxu0 %v3717_v27  ;;  %3683 = vmatprep.subr.bf16.mxu1 %v3717_v27  ;;  %v806_v8 = vor.u32 %v805_v62, %v801_v53  ;;  %v5240_v27 = vmov 0.0|0.0   ;;  %v678_v60 = vrot.slane %v676_v49, 1  ;;  %v327_v46 = vunpack.c.h.bf16 %v247_v0 }
  0x25   : > { %v604_v34 = vsel %vm296_vm0, %v532_v23, 0.0  ;;  %v3990_v35 = vpack.c.bf16 %v533_v24, %v532_v23  ;;  %v446_v4 = vadd.f32 %v3891_v22, %v385_v57 }
  0x26   : > { %v3976_v26 = vsel %vm655_vm2, %v806_v8, %v810_v63  ;;  %v4004_v42 = vpack.c.bf16 %v533_v24, %v604_v34  ;;  %v445_v63 = vadd.f32 %v3891_v22, %v384_v51  ;;  %v3734_v51 = vld [vmem:[%s5235_s1 + $0xa0] sm:$0xff]  }
  0x27   : > { %3170 = vmatpush3.bf16.msra.mxu0 %v3718_v31  ;;  %3691 = vmatpush3.bf16.msra.mxu1 %v3718_v31  ;;  %5272 = vst [vmem:[#allocation3_spill] sm:$0xff] %v3976_v26  ;;  %v246_v31 = vld [vmem:[%s3868_s17 + $0x20] sm:$0x1] }
  0x28   : > { %3171 = vmatprep.subr.bf16.mxu0 %v3719_v32  ;;  %3684 = vmatprep.subr.bf16.mxu1 %v3719_v32  ;;  %v3140_v32 = vld [vmem:[%s3868_s17 + $0xa8] sm:$0xff]   ;;  %v325_v47 = vunpack.c.l.bf16 %v246_v31  ;;  %v813_v53 = vshrl.u32 %v4004_v42, 16  ;;  %v815_v54 = vshll.u32 %v4004_v42, 16  ;;  %v499_v8 = vmax.f32 %v445_v63, 0.0  ;;  %v3740_v31 = vld [vmem:[%s5235_s1 + $0x110] sm:$0xff]  }
  0x29   : > { %1703 = vmatprep.mubr.bf16.mxu1 %v3976_v26  ;;  %v3048_v52 = vunpack.c.l.bf16 %v3140_v32  ;;  %v3049_v5 = vunpack.c.h.bf16 %v3140_v32 }
  0x2a   : > { %v386_v62 = vmul.f32 %v3883_v17, %v325_v47  ;;  %v817_v1 = vrot.slane %v815_v54, 1  ;;  %v571_v24 = vsel %vm296_vm0, %v499_v8, 0.0  ;;  %v3735_v54 = vld [vmem:[%s5235_s1 + $0xe8] sm:$0xff]  }
  0x2b   : > { %3172 = vmatpush3.bf16.msra.mxu0 %v3720_v43  ;;  %3692 = vmatpush3.bf16.msra.mxu1 %v3720_v43  ;;  %v4006_v43 = vpack.c.bf16 %v606_v41, %v606_v41  ;;  %v420_v15 = vmul.f32 %v3048_v52, %v3883_v17  ;;  %v3733_v41 = vld [vmem:[%s5235_s1 + $0xe0] sm:$0xff]  }
  0x2c   : > { %3269 = vmatprep.subr.bf16.mxu1 %v3721_v48  ;;  %3381 = vmatprep.subr.bf16.mxu0 %v3722_v56  ;;  %v673_v48 = vrot.slane %v671_v40, 1  ;;  %v3728_v56 = vld [vmem:[%s5235_s1 + $0x90] sm:$0xff]   ;;  %v447_v7 = vadd.f32 %v3891_v22, %v386_v62  ;;  %v818_v13 = vor.u32 %v817_v1, %v813_v53 }
  0x2d   : > { %v820_v55 = vshll.u32 %v4006_v43, 16  ;;  %v481_v34 = vadd.f32 %v3891_v22, %v420_v15 }
  0x2e   : > { %1608 = vmatmul.mubr.bf16.vlgmr.msra.gmra.mrb[0].mxu0 %v5240_v27  ;;  %2853 = vmatmul.mubr.msk.bf16.vlgmr.msra.gmra.mrb[0].mxu1 %vm3963_vm4, %v3951_v9  ;;  %v674_v59 = vor.u32 %v673_v48, %v669_v39  ;;  %v501_v23 = vmax.f32 %v447_v7, 0.0 }
  0x2f   : > { %3382 = vmatpush3.bf16.msra.mxu0 %v3724_v2  ;;  %3270 = vmatpush3.bf16.msra.mxu1 %v3723_v10  ;;  %v822_v2 = vrot.slane %v820_v55, 1  ;;  %v361_v10 = vunpack.c.l.bf16 %v282_v58  ;;  %v328_v55 = vunpack.c.l.bf16 %v249_v19 }
  0x30   : > { %3383 = vmatprep.subr.bf16.mxu0 %v3730_v14  ;;  %3271 = vmatprep.subr.bf16.mxu1 %v3725_v18  ;;  %v4029_v6 = vsel %vm655_vm2, %v674_v59, %v678_v60  ;;  %v500_v14 = vmax.f32 %v446_v4, 0.0  ;;  %v421_v18 = vmul.f32 %v3049_v5, %v3883_v17  ;;  %v388_v60 = vmul.f32 %v3883_v17, %v327_v46 }
  0x31   : > { %1615 = vmatprep.mubr.bf16.mxu0 %v4029_v6  ;;  %v4052_v32 = vsel %vm655_vm2, %v818_v13, %v822_v2  ;;  %v389_v1 = vmul.f32 %v3883_v17, %v328_v55  ;;  %v3745_v2 = vld [vmem:[%s5235_s1 + $0x158] sm:$0xff]  }
  0x32   : > { %5273 = vst [vmem:[#allocation4_spill] sm:$0xff] %v4052_v32  ;;  %v4054_v33 = vpack.c.bf16 %v500_v14, %v571_v24  ;;  %v482_v36 = vadd.f32 %v3891_v22, %v421_v18  ;;  %1711 = vmatprep.mubr.bf16.mxu1 %v4052_v32  ;;  %v4062_v40 = vpack.c.bf16 %v500_v14, %v499_v8  ;;  %v285_v18 = vld [vmem:[%s3868_s17 + $0xbc] sm:$0x1] }
  0x33   : > { %3384 = vmatpush3.bf16.msra.mxu0 %v3732_v25  ;;  %3272 = vmatpush3.bf16.msra.mxu1 %v3726_v37  ;;  %v422_v25 = vmul.f32 %v3883_v17, %v361_v10  ;;  %v573_v37 = vsel %vm301_vm1, %v501_v23, 0.0  ;;  %v3746_v10 = vld [vmem:[%s5235_s1 + $0x118] sm:$0xff]   ;;  %v449_v14 = vadd.f32 %v3891_v22, %v388_v60  ;;  %v450_v15 = vadd.f32 %v3891_v22, %v389_v1  ;;  %v3736_v23 = vld [vmem:[%s5235_s1 + $0xa8] sm:$0xff]  }
  0x34   : > { %3273 = vmatprep.subr.bf16.mxu1 %v3727_v50  ;;  %3385 = vmatprep.subr.bf16.mxu0 %v3738_v11  ;;  %5274 = vst [vmem:[#allocation5_spill] sm:$0xff] %v4062_v40  ;;  %v4070_v47 = vpack.c.bf16 %v573_v37, %v573_v37  ;;  %v681_v48 = vshrl.u32 %v4054_v33, 16  ;;  %v683_v49 = vshll.u32 %v4054_v33, 16  ;;  %v535_v50 = vmax.f32 %v481_v34, 0.0 }
  0x35   : > { %v483_v39 = vadd.f32 %v3891_v22, %v422_v25  ;;  %v536_v52 = vmax.f32 %v482_v36, 0.0  ;;  %v503_v34 = vmax.f32 %v449_v14, 0.0  ;;  %v504_v36 = vmax.f32 %v450_v15, 0.0  ;;  %v253_v15 = vld [vmem:[%s3868_s17 + $0x3c] sm:$0xff]  }
  0x36   : > { %2820 = vmatmul.mubr.msk.bf16.gmra.mrb[4].mxu0 %vm3963_vm4, %v3981_v30  ;;  %2856 = vmatmul.mubr.msk.bf16.gmra.mrb[4].mxu1 %vm3963_vm4, %v3990_v35  ;;  %v685_v57 = vrot.slane %v683_v49, 1  ;;  %v688_v58 = vshll.u32 %v4070_v47, 16  ;;  %v607_v59 = vsel %vm296_vm0, %v535_v50, 0.0 }
  0x37   : > { %3274 = vmatpush3.bf16.msra.mxu1 %v3728_v56  ;;  %3386 = vmatpush3.bf16.msra.mxu0 %v3740_v31  ;;  %v537_v53 = vmax.f32 %v483_v39, 0.0  ;;  %v387_v56 = vmul.f32 %v3883_v17, %v326_v29  ;;  %v4088_v63 = vpack.c.bf16 %v536_v52, %v607_v59  ;;  %v4090_v0 = vpack.c.bf16 %v536_v52, %v535_v50  ;;  %v3737_v29 = vld [vmem:[%s5235_s1 + $0xf0] sm:$0xff]   ;;  %v3747_v39 = vld [vmem:[%s5235_s1 + $0x160] sm:$0xff]  }
  0x38   : > { %3275 = vmatprep.subr.bf16.mxu1 %v3729_v61  ;;  %v283_v61 = vld [vmem:[%s3868_s17 + $0xb4] sm:$0xff]   ;;  %v686_v4 = vor.u32 %v685_v57, %v681_v48  ;;  %v690_v5 = vrot.slane %v688_v58, 1  ;;  %3387 = vmatprep.subr.bf16.mxu0 %v3745_v2  ;;  %v364_v48 = vunpack.c.l.bf16 %v285_v18 }
  0x39   : > { %v609_v62 = vsel %vm301_vm1, %v537_v53, 0.0  ;;  %5275 = vst [vmem:[#allocation6_spill] sm:$0xff] %v4088_v63  ;;  %v448_v8 = vadd.f32 %v3891_v22, %v387_v56  ;;  %v825_v11 = vshrl.u32 %v4088_v63, 16  ;;  %v827_v13 = vshll.u32 %v4088_v63, 16  ;;  %v3739_v50 = vld [vmem:[%s5235_s1 + $0xb0] sm:$0xff]  }
  0x3a   : > { %v4096_v7 = vpack.c.bf16 %v609_v62, %v609_v62  ;;  %v4108_v19 = vsel %vm655_vm2, %v686_v4, %v690_v5  ;;  %v362_v25 = vunpack.c.l.bf16 %v283_v61  ;;  %v363_v37 = vunpack.c.h.bf16 %v283_v61  ;;  %v3135_v56 = vld [vmem:[%s3868_s17 + $0x30] sm:$0xff]   ;;  %v3749_v61 = vld [vmem:[%s5235_s1 + $0x120] sm:$0xff]   ;;  %v3741_v5 = vld [vmem:[%s5235_s1 + $0xf8] sm:$0xff]  }
  0x3b   : > { %3276 = vmatpush3.bf16.msra.mxu1 %v3731_v21  ;;  %v502_v24 = vmax.f32 %v448_v8, 0.0  ;;  %3388 = vmatpush3.bf16.msra.mxu0 %v3746_v10  ;;  %v829_v31 = vrot.slane %v827_v13, 1  ;;  %v576_v53 = vsel %vm301_vm1, %v504_v36, 0.0  ;;  %v425_v58 = vmul.f32 %v3883_v17, %v364_v48  ;;  %v3742_v13 = vld [vmem:[%s5235_s1 + $0xb8] sm:$0xff]  }
  0x3c   : > { %3277 = vmatprep.subr.bf16.mxu1 %v3733_v41  ;;  %5276 = vst [vmem:[#allocation7_spill] sm:$0xff] %v4096_v7  ;;  %v832_v21 = vshll.u32 %v4096_v7, 16  ;;  %1623 = vmatprep.mubr.bf16.mxu0 %v4108_v19  ;;  %v423_v49 = vmul.f32 %v3883_v17, %v362_v25  ;;  %v424_v55 = vmul.f32 %v3883_v17, %v363_v37  ;;  %v3028_v14 = vunpack.c.l.bf16 %v3135_v56  ;;  %v3751_v25 = vld [vmem:[%s5235_s1 + $0x168] sm:$0xff]  }
  0x3d   : > { %v574_v46 = vsel %vm296_vm0, %v502_v24, 0.0  ;;  %v830_v52 = vor.u32 %v829_v31, %v825_v11  ;;  %3389 = vmatprep.subr.bf16.mxu0 %v3747_v39  ;;  %v4137_v57 = vpack.c.bf16 %v576_v53, %v576_v53  ;;  %v4141_v60 = vpack.c.bf16 %v503_v34, %v502_v24  ;;  %v3743_v39 = vld [vmem:[%s5235_s1 + $0x1c0] sm:$0xff]  }
  0x3e   : > { %v834_v41 = vrot.slane %v832_v21, 1  ;;  %2823 = vmatmul.mubr.msk.bf16.gmra.mrb[8].mxu0 %vm3963_vm4, %v4062_v40  ;;  %v484_v59 = vadd.f32 %v3891_v22, %v423_v49  ;;  %v485_v4 = vadd.f32 %v3891_v22, %v424_v55  ;;  %v486_v10 = vadd.f32 %v3891_v22, %v425_v58 }
  0x3f   : > { %3278 = vmatpush3.bf16.msra.mxu1 %v3734_v51  ;;  %v252_v51 = vld [vmem:[%s3868_s17 + $0x38] sm:$0x1]  ;;  %5277 = vst [vmem:[#allocation8_spill] sm:$0xff] %v4141_v60  ;;  %v700_v8 = vshll.u32 %v4137_v57, 16  ;;  %3390 = vmatpush3.bf16.msra.mxu0 %v3749_v61  ;;  %v390_v37 = vmul.f32 %v3028_v14, %v3883_v17  ;;  %v332_v55 = vunpack.c.l.bf16 %v253_v15 }
  0x40   : > { %3279 = vmatprep.subr.bf16.mxu1 %v3735_v54  ;;  %v4133_v54 = vpack.c.bf16 %v503_v34, %v574_v46  ;;  %v4147_v62 = vsel %vm655_vm2, %v830_v52, %v834_v41  ;;  %v538_v11 = vmax.f32 %v484_v59, 0.0  ;;  %v539_v21 = vmax.f32 %v485_v4, 0.0  ;;  %3391 = vmatprep.subr.bf16.mxu0 %v3751_v25 }
  0x41   : > { %5278 = vst [vmem:[#allocation9_spill] sm:$0xff] %v4147_v62  ;;  %1719 = vmatprep.mubr.bf16.mxu1 %v4147_v62  ;;  %v331_v24 = vunpack.c.l.bf16 %v252_v51  ;;  %v702_v31 = vrot.slane %v700_v8, 1  ;;  %v540_v34 = vmax.f32 %v486_v10, 0.0  ;;  %v255_v51 = vld [vmem:[%s3868_s17 + $0x44] sm:$0x1]  ;;  %v451_v53 = vadd.f32 %v3891_v22, %v390_v37  ;;  %v3755_v8 = vld [vmem:[%s5235_s1 + $0x170] sm:$0xff]  }
  0x42   : > { %v693_v1 = vshrl.u32 %v4133_v54, 16  ;;  %v695_v2 = vshll.u32 %v4133_v54, 16  ;;  %2859 = vmatmul.mubr.msk.bf16.gmra.mrb[8].mxu1 %vm3963_vm4, %v4090_v0  ;;  %v610_v36 = vsel %vm296_vm0, %v538_v11, 0.0  ;;  %v4179_v48 = vpack.c.bf16 %v539_v21, %v538_v11 }
  0x43   : > { %3280 = vmatpush3.bf16.msra.mxu1 %v3736_v23  ;;  %v3029_v23 = vunpack.c.h.bf16 %v3135_v56  ;;  %v4177_v46 = vpack.c.bf16 %v539_v21, %v610_v36  ;;  %v612_v52 = vsel %vm301_vm1, %v540_v34, 0.0  ;;  %v505_v4 = vmax.f32 %v451_v53, 0.0 }
  0x44   : > { %3281 = vmatprep.subr.bf16.mxu1 %v3737_v29  ;;  %v697_v18 = vrot.slane %v695_v2, 1  ;;  %v3752_v29 = vld [vmem:[%s5235_s1 + $0x128] sm:$0xff]   ;;  %v4190_v58 = vpack.c.bf16 %v612_v52, %v612_v52  ;;  %v334_v14 = vunpack.c.l.bf16 %v255_v51 }
  0x45   : > { %v391_v49 = vmul.f32 %v3029_v23, %v3883_v17  ;;  %v837_v59 = vshrl.u32 %v4177_v46, 16  ;;  %v839_v61 = vshll.u32 %v4177_v46, 16  ;;  %3392 = vmatpush3.bf16.msra.mxu0 %v3752_v29 }
  0x46   : > { %v698_v41 = vor.u32 %v697_v18, %v693_v1  ;;  %v844_v11 = vshll.u32 %v4190_v58, 16  ;;  %3393 = vmatprep.subr.bf16.mxu0 %v3755_v8 }
  0x47   : > { %3282 = vmatpush3.bf16.msra.mxu1 %v3739_v50  ;;  %v392_v50 = vmul.f32 %v3883_v17, %v331_v24  ;;  %v452_v1 = vadd.f32 %v3891_v22, %v391_v49  ;;  %v841_v10 = vrot.slane %v839_v61, 1  ;;  %v3756_v24 = vld [vmem:[%s5235_s1 + $0x130] sm:$0xff]  }
  0x48   : > { %3283 = vmatprep.subr.bf16.mxu1 %v3741_v5  ;;  %v4188_v56 = vsel %vm655_vm2, %v698_v41, %v702_v31  ;;  %v333_v5 = vunpack.c.h.bf16 %v253_v15  ;;  %v577_v15 = vsel %vm296_vm0, %v505_v4, 0.0  ;;  %v846_v29 = vrot.slane %v844_v11, 1  ;;  %v258_v61 = vld [vmem:[%s3868_s17 + $0x50] sm:$0x1]  ;;  %v3760_v11 = vld [vmem:[%s5235_s1 + $0x138] sm:$0xff]  }
  0x49   : > { %1631 = vmatprep.mubr.bf16.mxu0 %v4188_v56  ;;  %v453_v2 = vadd.f32 %v3891_v22, %v392_v50  ;;  %v506_v18 = vmax.f32 %v452_v1, 0.0  ;;  %v842_v25 = vor.u32 %v841_v10, %v837_v59  ;;  %v395_v31 = vmul.f32 %v3883_v17, %v334_v14  ;;  %3394 = vmatpush3.bf16.msra.mxu0 %v3756_v24  ;;  %v3136_v50 = vld [vmem:[%s3868_s17 + $0x48] sm:$0xff]   ;;  %v3759_v10 = vld [vmem:[%s5235_s1 + $0x178] sm:$0xff]  }
  0x4a   : > { %2826 = vmatmul.mubr.msk.bf16.gmra.mrb[12].mxu0 %vm3963_vm4, %v4141_v60  ;;  %v394_v23 = vmul.f32 %v3883_v17, %v333_v5  ;;  %v4230_v1 = vrot.slane %v5240_v27, 1  ;;  %3395 = vmatprep.subr.bf16.mxu0 %v3759_v10  ;;  %v901_v10 = vrot.slane %v3998_v38, 1 }
  0x4b   : > { %3284 = vmatpush3.bf16.msra.mxu1 %v3742_v13  ;;  %v393_v13 = vmul.f32 %v3883_v17, %v332_v55  ;;  %v507_v21 = vmax.f32 %v453_v2, 0.0  ;;  %v4215_v37 = vpack.c.bf16 %v506_v18, %v577_v15  ;;  %v4219_v41 = vsel %vm655_vm2, %v842_v25, %v846_v29 }
  0x4c   : > { %3493 = vmatprep.subr.bf16.mxu1 %v3743_v39  ;;  %v455_v39 = vadd.f32 %v3891_v22, %v394_v23  ;;  %5279 = vst [vmem:[#allocation10_spill] sm:$0xff] %v4219_v41  ;;  %v456_v51 = vadd.f32 %v3891_v22, %v395_v31  ;;  %1727 = vmatprep.mubr.bf16.mxu1 %v4219_v41  ;;  %5280 = vst [vmem:[#allocation11_spill] sm:$0xff] %v4230_v1  ;;  %v3033_v25 = vunpack.c.h.bf16 %v3136_v50 }
  0x4d   : > { %v454_v34 = vadd.f32 %v3891_v22, %v393_v13  ;;  %v579_v36 = vsel %vm301_vm1, %v507_v21, 0.0  ;;  %v705_v53 = vshrl.u32 %v4215_v37, 16  ;;  %v707_v55 = vshll.u32 %v4215_v37, 16  ;;  %2862 = vmatmul.mubr.msk.bf16.gmra.mrb[12].mxu1 %vm3963_vm4, %v4179_v48  ;;  %3396 = vmatpush3.bf16.msra.mxu0 %v3760_v11  ;;  %v3748_v11 = vld [vmem:[%s5235_s1 + $0x1c8] sm:$0xff]  }
  0x4e   : > { %v4221_v49 = vpack.c.bf16 %v579_v36, %v579_v36  ;;  %v509_v59 = vmax.f32 %v455_v39, 0.0  ;;  %v510_v5 = vmax.f32 %v456_v51, 0.0  ;;  %2865 = vmatprep.mubr.msk.bf16.mxu1 %vm3963_vm4, %v3981_v30  ;;  %v3032_v21 = vunpack.c.l.bf16 %v3136_v50  ;;  %v259_v30 = vld [vmem:[%s3868_s17 + $0x54] sm:$0xff]   ;;  %v261_v39 = vld [vmem:[%s3868_s17 + $0x5c] sm:$0x1] }
  0x4f   : > { %v508_v52 = vmax.f32 %v454_v34, 0.0  ;;  %v709_v14 = vrot.slane %v707_v55, 1  ;;  %v4249_v23 = vpack.c.bf16 %v506_v18, %v505_v4  ;;  %v4262_v4 = vld [vmem:[%s5235_s1 + $0x200] sm:$0xff]   ;;  %v900_v51 = vrot.slane %v3979_v28, 1 }
  0x50   : > { %v712_v2 = vshll.u32 %v4221_v49, 16  ;;  %v582_v24 = vsel %vm301_vm1, %v510_v5, 0.0  ;;  %v3744_v18 = vld [vmem:[%s5235_s1 + $0x180] sm:$0xff]   ;;  %v337_v50 = vunpack.c.l.bf16 %v258_v61  ;;  %v397_v55 = vmul.f32 %v3033_v25, %v3883_v17  ;;  %3629 = vmatprep.subr.bf16.mxu0 %v4262_v4  ;;  %v3750_v25 = vld [vmem:[%s5235_s1 + $0x188] sm:$0xff]  }
  0x51   : > { %v580_v8 = vsel %vm296_vm0, %v508_v52, 0.0  ;;  %5281 = vst [vmem:[#allocation12_spill] sm:$0xff] %v4249_v23  ;;  %v710_v29 = vor.u32 %v709_v14, %v705_v53  ;;  %v4253_v31 = vpack.c.bf16 %v582_v24, %v582_v24  ;;  %v396_v53 = vmul.f32 %v3032_v21, %v3883_v17 }
  0x52   : > { %v4247_v13 = vpack.c.bf16 %v509_v59, %v580_v8  ;;  %v714_v15 = vrot.slane %v712_v2, 1  ;;  %v398_v28 = vmul.f32 %v3883_v17, %v337_v50  ;;  %v4285_v14 = vadd.f32 %v3891_v22, %v397_v55 }
  0x53   : > { %v724_v8 = vshll.u32 %v4253_v31, 16  ;;  %v4282_v61 = vadd.f32 %v3891_v22, %v396_v53  ;;  %v338_v21 = vunpack.c.l.bf16 %v259_v30  ;;  %v4290_v24 = vpack.c.bf16 %v509_v59, %v508_v52 }
  0x54   : > { %v717_v34 = vshrl.u32 %v4247_v13, 16  ;;  %v719_v36 = vshll.u32 %v4247_v13, 16  ;;  %v4271_v2 = vsel %vm655_vm2, %v710_v29, %v714_v15  ;;  %v339_v29 = vunpack.c.h.bf16 %v259_v30  ;;  %v264_v30 = vld [vmem:[%s3868_s17 + $0x68] sm:$0x1] }
  0x55   : > { %1639 = vmatprep.mubr.bf16.mxu0 %v4271_v2  ;;  %v726_v15 = vrot.slane %v724_v8, 1  ;;  %5282 = vst [vmem:[#allocation13_spill] sm:$0xff] %v4290_v24  ;;  %1769 = vmatmul.mubr.bf16.vlgmr.msra.gmra.mrb[16].mxu1 %v4230_v1  ;;  %v459_v50 = vadd.f32 %v3891_v22, %v398_v28  ;;  %v5242_v53 = vmax.f32 %v4282_v61, 0.0  ;;  %v5241_v55 = vmax.f32 %v4285_v14, 0.0  ;;  %v3753_v28 = vld [vmem:[%s5235_s1 + $0x1d0] sm:$0xff]  }
  0x56   : > { %v721_v5 = vrot.slane %v719_v36, 1  ;;  %2829 = vmatmul.mubr.msk.bf16.gmra.mrb[16].mxu0 %vm3963_vm4, %v4249_v23  ;;  %v3137_v36 = vld [vmem:[%s3868_s17 + $0x60] sm:$0xff]   ;;  %v340_v27 = vunpack.c.l.bf16 %v261_v39  ;;  %3494 = vmatpush3.bf16.msra.mxu1 %v3744_v18  ;;  %v399_v52 = vmul.f32 %v3883_v17, %v338_v21  ;;  %v400_v59 = vmul.f32 %v3883_v17, %v339_v29 }
  0x57   : > { %2868 = vmatprep.mubr.msk.bf16.mxu1 %vm3963_vm4, %v4062_v40  ;;  %v513_v8 = vmax.f32 %v459_v50, 0.0  ;;  %v583_v39 = vsel %vm296_vm0, %v5242_v53, 0.0  ;;  %3495 = vmatprep.subr.bf16.mxu1 %v3748_v11  ;;  %v3037_v29 = vunpack.c.h.bf16 %v3137_v36  ;;  %v3754_v50 = vld [vmem:[%s5235_s1 + $0x190] sm:$0xff]   ;;  %v5284_v41 = vmax.f32 %v4285_v14, 0.0 }
  0x58   : > { %v722_v38 = vor.u32 %v721_v5, %v717_v34  ;;  %v4311_v5 = vsel %vm896_vm5, %v900_v51, %v901_v10  ;;  %v401_v18 = vmul.f32 %v3883_v17, %v340_v27  ;;  %v4323_v21 = vpack.c.bf16 %v5241_v55, %v583_v39 }
  0x59   : > { %v903_v51 = vrot.slane %v4054_v33, 1  ;;  %v4327_v10 = vadd.f32 %v3891_v22, %v399_v52  ;;  %v585_v11 = vsel %vm301_vm1, %v513_v8, 0.0  ;;  %v3757_v8 = vld [vmem:[%s5235_s1 + $0x1d8] sm:$0xff]  }
  0x5a   : > { %v4301_v34 = vsel %vm655_vm2, %v722_v38, %v726_v15  ;;  %v4330_v38 = vadd.f32 %v3891_v22, %v400_v59  ;;  %v462_v27 = vadd.f32 %v3891_v22, %v401_v18  ;;  %v3036_v15 = vunpack.c.l.bf16 %v3137_v36  ;;  %3496 = vmatpush3.bf16.msra.mxu1 %v3750_v25 }
  0x5b   : > { %1647 = vmatprep.mubr.bf16.mxu0 %v4301_v34  ;;  %v4338_v39 = vpack.c.bf16 %v585_v11, %v585_v11  ;;  %v729_v33 = vshrl.u32 %v4323_v21, 16  ;;  %v731_v52 = vshll.u32 %v4323_v21, 16  ;;  %v5243_v59 = vmax.f32 %v4327_v10, 0.0  ;;  %3497 = vmatprep.subr.bf16.mxu1 %v3753_v28 }
  0x5c   : > { %v5246_v22 = vmax.f32 %v4330_v38, 0.0  ;;  %v516_v36 = vmax.f32 %v462_v27, 0.0  ;;  %v343_v18 = vunpack.c.l.bf16 %v264_v30  ;;  %v402_v53 = vmul.f32 %v3036_v15, %v3883_v17  ;;  %v3758_v27 = vld [vmem:[%s5235_s1 + $0x198] sm:$0xff]   ;;  %v4370_v17 = vld [vmem:[%s5236_s2] ss:$0 sm:$0xff] }
  0x5d   : > { %v733_v11 = vrot.slane %v731_v52, 1  ;;  %v736_v55 = vshll.u32 %v4338_v39, 16  ;;  %v586_v25 = vsel %vm296_vm0, %v5243_v59, 0.0  ;;  %1777 = vmatmul.mubr.bf16.gmra.mrb[20].mxu1 %v4311_v5  ;;  %v904_v30 = vrot.slane %v4070_v47, 1  ;;  %v265_v59 = vld [vmem:[%s3868_s17 + $0x6c] sm:$0xff]  }
  0x5e   : > { %2832 = vmatmul.mubr.msk.bf16.gmra.mrb[20].mxu0 %vm3963_vm4, %v4290_v24  ;;  %v588_v28 = vsel %vm301_vm1, %v516_v36, 0.0  ;;  %v4365_v52 = vpack.c.bf16 %v5246_v22, %v586_v25  ;;  %v403_v15 = vmul.f32 %v4370_v17, %v3037_v29  ;;  %2871 = vmatprep.mubr.msk.bf16.mxu1 %vm3963_vm4, %v4141_v60  ;;  %v404_v36 = vmul.f32 %v4370_v17, %v343_v18  ;;  %v3761_v25 = vld [vmem:[%s5235_s1 + $0x1e0] sm:$0xff]  }
  0x5f   : > { %v734_v1 = vor.u32 %v733_v11, %v729_v33  ;;  %v738_v3 = vrot.slane %v736_v55, 1  ;;  %v4377_v47 = vpack.c.bf16 %v588_v28, %v588_v28  ;;  %3498 = vmatpush3.bf16.msra.mxu1 %v3754_v50  ;;  %v4388_v55 = vld [vmem:[%s5237_s3] ss:$0 sm:$0xff]  ;;  %v267_v50 = vld [vmem:[%s3868_s17 + $0x74] sm:$0x1]  ;;  %v5283_v28 = vmax.f32 %v4282_v61, 0.0 }
  0x60   : > { %v741_v22 = vshrl.u32 %v4365_v52, 16  ;;  %v743_v29 = vshll.u32 %v4365_v52, 16  ;;  %v4391_v33 = vadd.f32 %v4388_v55, %v402_v53  ;;  %v4394_v11 = vadd.f32 %v4388_v55, %v403_v15  ;;  %3499 = vmatprep.subr.bf16.mxu1 %v3757_v8 }
  0x61   : > { %v4398_v18 = vsel %vm655_vm2, %v734_v1, %v738_v3  ;;  %v4404_v62 = vpack.c.bf16 %v5284_v41, %v5283_v28  ;;  %v748_v32 = vshll.u32 %v4377_v47, 16  ;;  %v465_v26 = vadd.f32 %v4388_v55, %v404_v36 }
  0x62   : > { %1655 = vmatprep.mubr.bf16.mxu0 %v4398_v18  ;;  %v4410_v53 = vsel %vm896_vm5, %v903_v51, %v904_v30  ;;  %v745_v15 = vrot.slane %v743_v29, 1  ;;  %v5257_v8 = vmax.f32 %v4391_v33, 0.0  ;;  %v5256_v3 = vmax.f32 %v4394_v11, 0.0  ;;  %v3763_v30 = vld [vmem:[%s5235_s1 + $0x1a0] sm:$0xff]  }
  0x63   : > { %v750_v1 = vrot.slane %v748_v32, 1  ;;  %v519_v61 = vmax.f32 %v465_v26, 0.0  ;;  %v344_v14 = vunpack.c.l.bf16 %v265_v59  ;;  %v345_v41 = vunpack.c.h.bf16 %v265_v59  ;;  %3500 = vmatpush3.bf16.msra.mxu1 %v3758_v27  ;;  %v3764_v27 = vld [vmem:[%s5235_s1 + $0x1e8] sm:$0xff]  }
  0x64   : > { %v746_v28 = vor.u32 %v745_v15, %v741_v22  ;;  %v906_v60 = vrot.slane %v4133_v54, 1  ;;  %v589_v51 = vsel %vm296_vm0, %v5257_v8, 0.0  ;;  %3501 = vmatprep.subr.bf16.mxu1 %v3761_v25  ;;  %v346_v54 = vunpack.c.l.bf16 %v267_v50  ;;  %v3138_v22 = vld [vmem:[%s3868_s17 + $0x78] sm:$0xff]  }
  0x65   : > { %v591_v26 = vsel %vm301_vm1, %v519_v61, 0.0  ;;  %v4429_v32 = vpack.c.bf16 %v5256_v3, %v589_v51  ;;  %v405_v59 = vmul.f32 %v4370_v17, %v344_v14  ;;  %1785 = vmatmul.mubr.bf16.gmra.mrb[24].mxu1 %v4410_v53  ;;  %v907_v25 = vrot.slane %v4137_v57, 1  ;;  %v270_v57 = vld [vmem:[%s3868_s17 + $0x80] sm:$0x1] }
  0x66   : > { %2835 = vmatmul.mubr.msk.bf16.gmra.mrb[24].mxu0 %vm3963_vm4, %v4404_v62  ;;  %v4438_v36 = vsel %vm655_vm2, %v746_v28, %v750_v1  ;;  %v4441_v29 = vpack.c.bf16 %v591_v26, %v591_v26  ;;  %v406_v15 = vmul.f32 %v4370_v17, %v345_v41  ;;  %2874 = vmatprep.mubr.msk.bf16.mxu1 %vm3963_vm4, %v4249_v23  ;;  %v5286_v28 = vmax.f32 %v4327_v10, 0.0 }
  0x67   : > { %5285 = vst [vmem:[#allocation14_spill] sm:$0xff] %v4438_v36  ;;  %1663 = vmatprep.mubr.bf16.mxu0 %v4438_v36  ;;  %v753_v50 = vshrl.u32 %v4429_v32, 16  ;;  %v755_v61 = vshll.u32 %v4429_v32, 16  ;;  %v407_v14 = vmul.f32 %v4370_v17, %v346_v54  ;;  %v4452_v1 = vadd.f32 %v4388_v55, %v405_v59  ;;  %3502 = vmatpush3.bf16.msra.mxu1 %v3763_v30  ;;  %v3766_v54 = vld [vmem:[%s5235_s1 + $0x1a8] sm:$0xff]  }
  0x68   : > { %v5287_v41 = vmax.f32 %v4330_v38, 0.0  ;;  %v760_v26 = vshll.u32 %v4441_v29, 16  ;;  %v4463_v3 = vadd.f32 %v4388_v55, %v406_v15  ;;  %v3040_v8 = vunpack.c.l.bf16 %v3138_v22  ;;  %3503 = vmatprep.subr.bf16.mxu1 %v3764_v27 }
  0x69   : > { %v757_v59 = vrot.slane %v755_v61, 1  ;;  %v468_v23 = vadd.f32 %v4388_v55, %v407_v14  ;;  %v5264_v10 = vmax.f32 %v4452_v1, 0.0  ;;  %v3041_v38 = vunpack.c.h.bf16 %v3138_v22 }
  0x6a   : > { %v4459_v51 = vpack.c.bf16 %v5287_v41, %v5286_v28  ;;  %v3767_v28 = vld [vmem:[%s5235_s1 + $0x1f0] sm:$0xff]   ;;  %v4474_v15 = vsel %vm896_vm5, %v906_v60, %v907_v25  ;;  %v762_v30 = vrot.slane %v760_v26, 1  ;;  %v5263_v41 = vmax.f32 %v4463_v3, 0.0  ;;  %v3770_v26 = vld [vmem:[%s5235_s1 + $0x1f8] sm:$0xff]  }
  0x6b   : > { %v349_v40 = vunpack.c.l.bf16 %v270_v57  ;;  %v758_v36 = vor.u32 %v757_v59, %v753_v50  ;;  %v522_v61 = vmax.f32 %v468_v23, 0.0  ;;  %v592_v14 = vsel %vm296_vm0, %v5264_v10, 0.0  ;;  %v271_v57 = vld [vmem:[%s3868_s17 + $0x84] sm:$0xff]   ;;  %3504 = vmatpush3.bf16.msra.mxu1 %v3766_v54  ;;  %v3769_v23 = vld [vmem:[%s5235_s1 + $0x1b0] sm:$0xff]  }
  0x6c   : > { %v408_v22 = vmul.f32 %v4370_v17, %v3040_v8  ;;  %v909_v27 = vrot.slane %v4215_v37, 1  ;;  %v4485_v7 = vpack.c.bf16 %v5263_v41, %v592_v14  ;;  %v409_v60 = vmul.f32 %v4370_v17, %v3041_v38  ;;  %3505 = vmatprep.subr.bf16.mxu1 %v3767_v28  ;;  %v273_v38 = vld [vmem:[%s3868_s17 + $0x8c] sm:$0x1] }
  0x6d   : > { %v410_v25 = vmul.f32 %v4370_v17, %v349_v40  ;;  %v4497_v37 = vsel %vm655_vm2, %v758_v36, %v762_v30  ;;  %v910_v8 = vrot.slane %v4221_v49, 1  ;;  %v594_v50 = vsel %vm301_vm1, %v522_v61, 0.0  ;;  %1793 = vmatmul.mubr.bf16.gmra.mrb[28].mxu1 %v4474_v15 }
  0x6e   : > { %2838 = vmatmul.mubr.msk.bf16.gmra.mrb[28].mxu0 %vm3963_vm4, %v4459_v51  ;;  %5288 = vst [vmem:[#allocation15_spill] sm:$0xff] %v4497_v37  ;;  %v4503_v40 = vadd.f32 %v4388_v55, %v408_v22  ;;  %v4510_v54 = vpack.c.bf16 %v594_v50, %v594_v50  ;;  %v765_v36 = vshrl.u32 %v4485_v7, 16  ;;  %v767_v49 = vshll.u32 %v4485_v7, 16  ;;  %2877 = vmatprep.mubr.msk.bf16.mxu1 %vm3963_vm4, %v4290_v24 }
  0x6f   : > { %1671 = vmatprep.mubr.bf16.mxu0 %v4497_v37  ;;  %v4515_v59 = vadd.f32 %v4388_v55, %v409_v60  ;;  %v471_v28 = vadd.f32 %v4388_v55, %v410_v25  ;;  %v350_v61 = vunpack.c.l.bf16 %v271_v57  ;;  %v351_v41 = vunpack.c.h.bf16 %v271_v57  ;;  %3506 = vmatpush3.bf16.msra.mxu1 %v3769_v23  ;;  %v3772_v60 = vld [vmem:[%s5235_s1 + $0x1b8] sm:$0xff]  }
  0x70   : > { %v523_v30 = vmax.f32 %v4503_v40, 0.0  ;;  %v769_v14 = vrot.slane %v767_v49, 1  ;;  %v772_v22 = vshll.u32 %v4510_v54, 16  ;;  %v5289_v10 = vmax.f32 %v4391_v33, 0.0  ;;  %3507 = vmatprep.subr.bf16.mxu1 %v3770_v26 }
  0x71   : > { %v524_v50 = vmax.f32 %v4515_v59, 0.0  ;;  %v5290_v24 = vmax.f32 %v4394_v11, 0.0  ;;  %v525_v25 = vmax.f32 %v471_v28, 0.0  ;;  %v352_v49 = vunpack.c.l.bf16 %v273_v38 }
  0x72   : > { %v595_v40 = vsel %vm296_vm0, %v523_v30, 0.0  ;;  %v4537_v59 = vsel %vm896_vm5, %v909_v27, %v910_v8  ;;  %v770_v57 = vor.u32 %v769_v14, %v765_v36  ;;  %v774_v23 = vrot.slane %v772_v22, 1 }
  0x73   : > { %v4532_v37 = vpack.c.bf16 %v5290_v24, %v5289_v10  ;;  %v4539_v63 = vpack.c.bf16 %v524_v50, %v595_v40  ;;  %v597_v33 = vsel %vm301_vm1, %v525_v25, 0.0  ;;  %v411_v11 = vmul.f32 %v4370_v17, %v350_v61  ;;  %3508 = vmatpush3.bf16.msra.mxu1 %v3772_v60 }
  0x74   : > { %v412_v24 = vmul.f32 %v4370_v17, %v351_v41  ;;  %v413_v10 = vmul.f32 %v4370_v17, %v352_v49  ;;  %v4547_v28 = vsel %vm655_vm2, %v770_v57, %v774_v23  ;;  %v4549_v26 = vpack.c.bf16 %v597_v33, %v597_v33 }
  0x75   : > { %v777_v27 = vshrl.u32 %v4539_v63, 16  ;;  %v779_v8 = vshll.u32 %v4539_v63, 16  ;;  %v472_v36 = vadd.f32 %v4388_v55, %v411_v11  ;;  %1801 = vmatmul.mubr.bf16.gmra.mrb[32].mxu1 %v4537_v59  ;;  %v912_v61 = vrot.slane %v4247_v13, 1 }
  0x76   : > { %2841 = vmatmul.mubr.msk.bf16.gmra.mrb[32].mxu0 %vm3963_vm4, %v4532_v37  ;;  %v473_v41 = vadd.f32 %v4388_v55, %v412_v24  ;;  %v474_v38 = vadd.f32 %v4388_v55, %v413_v10  ;;  %v784_v22 = vshll.u32 %v4549_v26, 16  ;;  %2880 = vmatprep.mubr.msk.bf16.mxu1 %vm3963_vm4, %v4404_v62  ;;  %v913_v60 = vrot.slane %v4253_v31, 1 }
  0x77   : > { %1679 = vmatprep.mubr.bf16.mxu0 %v4547_v28  ;;  %v781_v14 = vrot.slane %v779_v8, 1  ;;  %v526_v25 = vmax.f32 %v472_v36, 0.0  ;;  %v5291_v33 = vmax.f32 %v4452_v1, 0.0  ;;  %v5292_v11 = vmax.f32 %v4463_v3, 0.0 }
  0x78   : > { %v527_v40 = vmax.f32 %v473_v41, 0.0  ;;  %v528_v49 = vmax.f32 %v474_v38, 0.0  ;;  %v786_v23 = vrot.slane %v784_v22, 1  ;;  %v4582_v36 = vsel %vm896_vm5, %v912_v61, %v913_v60 }
  0x79   : > { %v782_v57 = vor.u32 %v781_v14, %v777_v27  ;;  %v4571_v24 = vpack.c.bf16 %v5292_v11, %v5291_v33  ;;  %v598_v13 = vsel %vm296_vm0, %v526_v25, 0.0  ;;  %v915_v61 = vrot.slane %v4323_v21, 1 }
  0x7a   : > { %v600_v10 = vsel %vm301_vm1, %v528_v49, 0.0  ;;  %v4577_v8 = vpack.c.bf16 %v527_v40, %v598_v13  ;;  %v916_v14 = vrot.slane %v4338_v39, 1  ;;  %v942_v49 = vrot.slane %v4177_v46, 1 }
  0x7b   : > { %v4579_v31 = vpack.c.bf16 %v600_v10, %v600_v10  ;;  %v4585_v27 = vsel %vm655_vm2, %v782_v57, %v786_v23  ;;  %v4601_v57 = vpack.c.bf16 %v524_v50, %v523_v30  ;;  %v943_v23 = vrot.slane %v4190_v58, 1  ;;  %v3765_v50 = vld [vmem:[%s5235_s1 + $0x208] sm:$0xff]  }
  0x7c   : > { %v789_v3 = vshrl.u32 %v4577_v8, 16  ;;  %v791_v1 = vshll.u32 %v4577_v8, 16  ;;  %v4605_v33 = vsel %vm896_vm5, %v915_v61, %v916_v14  ;;  %v918_v46 = vrot.slane %v4365_v52, 1  ;;  %v3774_v10 = vld [vmem:[%s5235_s1 + $0x228] sm:$0xff]  }
  0x7d   : > { %v796_v41 = vshll.u32 %v4579_v31, 16  ;;  %1809 = vmatmul.mubr.bf16.gmra.mrb[36].mxu1 %v4582_v36  ;;  %v4611_v13 = vsel %vm896_vm5, %v942_v49, %v943_v23  ;;  %v919_v58 = vrot.slane %v4377_v47, 1  ;;  %v4623_v21 = vpack.c.bf16 %v527_v40, %v526_v25  ;;  %v3773_v25 = vld [vmem:[%s5235_s1 + $0x220] sm:$0xff]  }
  0x7e   : > { %2844 = vmatmul.mubr.msk.bf16.gmra.mrb[36].mxu0 %vm3963_vm4, %v4571_v24  ;;  %v793_v38 = vrot.slane %v791_v1, 1  ;;  %2883 = vmatprep.mubr.msk.bf16.mxu1 %vm3963_vm4, %v4459_v51  ;;  %v921_v52 = vrot.slane %v4429_v32, 1  ;;  %v922_v47 = vrot.slane %v4441_v29, 1  ;;  %v925_v32 = vrot.slane %v4510_v54, 1  ;;  %v3768_v29 = vld [vmem:[%s5235_s1 + $0x210] sm:$0xff]  }
  0x7f   : > { %1687 = vmatprep.mubr.bf16.mxu0 %v4585_v27  ;;  %v798_v22 = vrot.slane %v796_v41, 1  ;;  %v4626_v39 = vsel %vm896_vm5, %v918_v46, %v919_v58  ;;  %v928_v54 = vrot.slane %v4549_v26, 1  ;;  %v931_v26 = vrot.slane %v4579_v31, 1  ;;  %v3776_v41 = vld [vmem:[%s5235_s1 + $0x238] sm:$0xff]  }
  0x80   : > { %v794_v60 = vor.u32 %v793_v38, %v789_v3  ;;  %v4639_v30 = vsel %vm896_vm5, %v921_v52, %v922_v47  ;;  %v3775_v3 = vld [vmem:[%s5235_s1 + $0x230] sm:$0xff]   ;;  %v934_v31 = vrot.slane %v3926_v45, 1  ;;  %v3141_v38 = vld [vmem:[%s3868_s17 + $0xc0] sm:$0xff]   ;;  %v937_v45 = vrot.slane %v4006_v43, 1  ;;  %v5294_v52 = vld [vmem:[#allocation7_spill] sm:$0xff] }
  0x81   : > { %v3052_v14 = vunpack.c.l.bf16 %v3141_v38  ;;  %v940_v47 = vrot.slane %v5294_v52, 1 }
  0x82   : > { %v4608_v11 = vsel %vm655_vm2, %v794_v60, %v798_v22  ;;  %v3053_v22 = vunpack.c.h.bf16 %v3141_v38 }
  0x83   : > { %v426_v60 = vmul.f32 %v4370_v17, %v3052_v14  ;;  %v5303_v14 = vld [vmem:[#allocation9_spill] sm:$0xff] }
  0x84   : > { %v427_v49 = vmul.f32 %v4370_v17, %v3053_v22 }
  0x85   : > { %1817 = vmatmul.mubr.bf16.gmra.mrb[40].mxu1 %v4605_v33  ;;  %v487_v46 = vadd.f32 %v4388_v55, %v426_v60 }
  0x86   : > { %2847 = vmatmul.mubr.msk.bf16.gmra.mrb[40].mxu0 %vm3963_vm4, %v4601_v57  ;;  %2886 = vmatprep.mubr.msk.bf16.mxu1 %vm3963_vm4, %v4532_v37  ;;  %v488_v58 = vadd.f32 %v4388_v55, %v427_v49 }
  0x87   : > { %1695 = vmatprep.mubr.bf16.mxu0 %v4608_v11 }
  0x8d   : > { %1825 = vmatmul.mubr.bf16.gmra.mrb[44].mxu1 %v4626_v39 }
  0x8e   : > { %2850 = vmatmul.mubr.msk.bf16.gmra.mrb[44].mxu0 %vm3963_vm4, %v4623_v21  ;;  %2889 = vmatprep.mubr.msk.bf16.mxu1 %vm3963_vm4, %v4571_v24 }
  0x8f   : > { %1929 = vmatprep.mubr.bf16.mxu0 %v4311_v5  ;;  %v924_v5 = vrot.slane %v4485_v7, 1  ;;  %v927_v7 = vrot.slane %v4539_v63, 1  ;;  %v930_v63 = vrot.slane %v4577_v8, 1  ;;  %v933_v8 = vrot.slane %v3924_v44, 1 }
  0x90   : > { %v936_v44 = vrot.slane %v4004_v42, 1  ;;  %v5293_v42 = vld [vmem:[#allocation6_spill] sm:$0xff] }
  0x91   : > { %v4674_v40 = vsel %vm896_vm5, %v927_v7, %v928_v54  ;;  %v4691_v1 = vsel %vm896_vm5, %v930_v63, %v931_v26  ;;  %v4706_v61 = vsel %vm896_vm5, %v933_v8, %v934_v31  ;;  %v939_v43 = vrot.slane %v5293_v42, 1  ;;  %v5296_v7 = vld [vmem:[#allocation15_spill] sm:$0xff]  ;;  %v5297_v54 = vld [vmem:[#allocation5_spill] sm:$0xff]  ;;  %v5302_v8 = vld [vmem:[#allocation4_spill] sm:$0xff] }
  0x92   : > { %v4719_v23 = vsel %vm896_vm5, %v936_v44, %v937_v45  ;;  %v5300_v26 = vld [vmem:[#allocation3_spill] sm:$0xff] }
  0x95   : > { %1833 = vmatmul.mubr.bf16.gmra.mrb[48].mxu1 %v4639_v30 }
  0x96   : > { %1930 = vmatmul.mubr.bf16.vlgmr.msra.gmra.mrb[48].mxu0 %v4029_v6  ;;  %2892 = vmatprep.mubr.msk.bf16.mxu1 %vm3963_vm4, %v4601_v57  ;;  %v4657_v6 = vsel %vm896_vm5, %v924_v5, %v925_v32  ;;  %v542_v5 = vmax.f32 %v488_v58, 0.0  ;;  %v4732_v32 = vsel %vm896_vm5, %v939_v43, %v940_v47 }
  0x97   : > { %3630 = vmatpush3.bf16.msra.mxu0 %v4262_v4  ;;  %1937 = vmatprep.mubr.bf16.mxu0 %v4410_v53  ;;  %v3771_v4 = vld [vmem:[%s5235_s1 + $0x218] sm:$0xff]  }
  0x98   : > { %3631 = vmatprep.subr.bf16.mxu0 %v3765_v50 }
  0x9b   : > { %3632 = vmatpush3.bf16.msra.mxu0 %v3765_v50  ;;  %v541_v50 = vmax.f32 %v487_v46, 0.0 }
  0x9c   : > { %3633 = vmatprep.subr.bf16.mxu0 %v3768_v29 }
  0x9d   : > { %1841 = vmatmul.mubr.bf16.gmra.mrb[52].mxu1 %v4657_v6 }
  0x9e   : > { %1938 = vmatmul.mubr.bf16.gmra.mrb[52].mxu0 %v4108_v19  ;;  %2895 = vmatprep.mubr.msk.bf16.mxu1 %vm3963_vm4, %v4623_v21 }
  0x9f   : > { %1945 = vmatprep.mubr.bf16.mxu0 %v4474_v15  ;;  %3634 = vmatpush3.bf16.msra.mxu0 %v3768_v29  ;;  %v4734_v29 = vpack.c.bf16 %v542_v5, %v541_v50 }
  0xa0   : > { %3635 = vmatprep.subr.bf16.mxu0 %v3771_v4 }
  0xa3   : > { %3636 = vmatpush3.bf16.msra.mxu0 %v3771_v4  ;;  %v5295_v4 = vld [vmem:[#allocation14_spill] sm:$0xff] }
  0xa4   : > { %3637 = vmatprep.subr.bf16.mxu0 %v3773_v25 }
  0xa5   : > { %1849 = vmatmul.mubr.bf16.gmra.mrb[56].mxu1 %v4674_v40 }
  0xa6   : > { %1946 = vmatmul.mubr.bf16.gmra.mrb[56].mxu0 %v4188_v56  ;;  %2898 = vmatprep.mubr.msk.bf16.mxu1 %vm3963_vm4, %v3951_v9 }
  0xa7   : > { %1953 = vmatprep.mubr.bf16.mxu0 %v4537_v59  ;;  %3638 = vmatpush3.bf16.msra.mxu0 %v3773_v25  ;;  %v5298_v25 = vld [vmem:[#allocation8_spill] sm:$0xff] }
  0xa8   : > { %3639 = vmatprep.subr.bf16.mxu0 %v3774_v10 }
  0xab   : > { %3640 = vmatpush3.bf16.msra.mxu0 %v3774_v10  ;;  %v5299_v10 = vld [vmem:[#allocation12_spill] sm:$0xff] }
  0xac   : > { %3641 = vmatprep.subr.bf16.mxu0 %v3775_v3 }
  0xad   : > { %1857 = vmatmul.mubr.bf16.gmra.mrb[60].mxu1 %v4691_v1 }
  0xae   : > { %1954 = vmatmul.mubr.bf16.gmra.mrb[60].mxu0 %v4271_v2  ;;  %2901 = vmatprep.mubr.msk.bf16.mxu1 %vm3963_vm4, %v3990_v35 }
  0xaf   : > { %1961 = vmatprep.mubr.bf16.mxu0 %v4582_v36  ;;  %3642 = vmatpush3.bf16.msra.mxu0 %v3775_v3  ;;  %v5301_v3 = vld [vmem:[#allocation13_spill] sm:$0xff] }
  0xb0   : > { %3643 = vmatprep.subr.bf16.mxu0 %v3776_v41 }
  0xb3   : > { %3644 = vmatpush3.bf16.msra.mxu0 %v3776_v41 }
  0xb5   : > { %1865 = vmatmul.mubr.bf16.gmra.mrb[64].mxu1 %v4706_v61 }
  0xb6   : > { %1962 = vmatmul.mubr.bf16.gmra.mrb[64].mxu0 %v4301_v34  ;;  %2904 = vmatprep.mubr.msk.bf16.mxu1 %vm3963_vm4, %v4090_v0 }
  0xb7   : > { %1969 = vmatprep.mubr.bf16.mxu0 %v4605_v33 }
  0xbd   : > { %1873 = vmatmul.mubr.bf16.gmra.mrb[68].mxu1 %v4719_v23 }
  0xbe   : > { %1970 = vmatmul.mubr.bf16.gmra.mrb[68].mxu0 %v4398_v18  ;;  %2907 = vmatprep.mubr.msk.bf16.mxu1 %vm3963_vm4, %v4179_v48 }
  0xbf   : > { %1977 = vmatprep.mubr.bf16.mxu0 %v4626_v39 }
  0xc5   : > { %1881 = vmatmul.mubr.bf16.gmra.mrb[72].mxu1 %v4732_v32 }
  0xc6   : > { %1978 = vmatmul.mubr.bf16.gmra.mrb[72].mxu0 %v5295_v4  ;;  %2910 = vmatprep.mubr.msk.bf16.mxu1 %vm3963_vm4, %v4734_v29 }
  0xc7   : > { %1985 = vmatprep.mubr.bf16.mxu0 %v4639_v30 }
  0xcd   : > { %1889 = vmatmul.mubr.bf16.gmra.mrb[76].mxu1 %v4611_v13 }
  0xce   : > { %1986 = vmatmul.mubr.bf16.gmra.mrb[76].mxu0 %v5296_v7  ;;  %2090 = vmatprep.mubr.bf16.mxu1 %v4108_v19  ;;  %v288_v19 = vld [vmem:[%s3868_s17 + $0xc8] sm:$0x1]  ;;  %s2741_s17 = sshll.u32 %s3826_s19, 5 }
  0xcf   : > { %1993 = vmatprep.mubr.bf16.mxu0 %v4657_v6  ;;  %p228_p4 = scmp.lt.s32.totalorder %s2741_s17, 63 }
  0xd1   : > { %s5309_s17 = smov (!%p228_p4, %s2741_s17), 63 }
  0xd2   : > { %s2742_s19 = sshll.u32 %s5309_s17, 2 }
  0xd3   : > { %s5162_s6 = scalar_lea.vmem %s5238_s4, %s2742_s19 }
  0xd5   : > { %2913 = vmatmul.mubr.msk.bf16.vlgmr.msra.gmra.mrb[80].mxu1 %vm3963_vm4, %v5297_v54 }
  0xd6   : > { %1994 = vmatmul.mubr.bf16.gmra.mrb[80].mxu0 %v4547_v28  ;;  %2098 = vmatprep.mubr.bf16.mxu1 %v4188_v56  ;;  %v367_v56 = vunpack.c.l.bf16 %v288_v19 }
  0xd7   : > { %2001 = vmatprep.mubr.bf16.mxu0 %v4674_v40 }
  0xd8   : > { %v428_v63 = vmul.f32 %v4370_v17, %v367_v56 }
  0xdd   : > { %2916 = vmatmul.mubr.msk.bf16.gmra.mrb[84].mxu1 %vm3963_vm4, %v5298_v25 }
  0xde   : > { %2002 = vmatmul.mubr.bf16.gmra.mrb[84].mxu0 %v4585_v27  ;;  %2106 = vmatprep.mubr.bf16.mxu1 %v4271_v2  ;;  %v489_v2 = vadd.f32 %v4388_v55, %v428_v63 }
  0xdf   : > { %2009 = vmatprep.mubr.bf16.mxu0 %v4691_v1 }
  0xe0   : > { %v543_v41 = vmax.f32 %v489_v2, 0.0 }
  0xe2   : > { %v615_v17 = vsel %vm301_vm1, %v543_v41, 0.0 }
  0xe3   : > { %v652_v55 = vpack.c.bf16 %v615_v17, %v615_v17 }
  0xe5   : > { %2919 = vmatmul.mubr.msk.bf16.gmra.mrb[88].mxu1 %vm3963_vm4, %v5299_v10  ;;  %v977_v42 = vrot.slane %v652_v55, 1 }
  0xe6   : > { %2010 = vmatmul.mubr.bf16.gmra.mrb[88].mxu0 %v4608_v11  ;;  %2114 = vmatprep.mubr.bf16.mxu1 %v4301_v34  ;;  %v613_v34 = vsel %vm296_vm0, %v541_v50, 0.0 }
  0xe7   : > { %2017 = vmatprep.mubr.bf16.mxu0 %v4706_v61 }
  0xed   : > { %2922 = vmatmul.mubr.msk.bf16.gmra.mrb[92].mxu1 %vm3963_vm4, %v5301_v3 }
  0xee   : > { %2018 = vmatmul.mubr.bf16.gmra.mrb[92].mxu0 %v5300_v26  ;;  %2122 = vmatprep.mubr.bf16.mxu1 %v4398_v18  ;;  %v651_v18 = vpack.c.bf16 %v542_v5, %v613_v34 }
  0xef   : > { %2025 = vmatprep.mubr.bf16.mxu0 %v4719_v23 }
  0xf0   : > { %v964_v20 = vshll.u32 %v651_v18, 16  ;;  %v976_v58 = vrot.slane %v651_v18, 1  ;;  %v962_v47 = vshrl.u32 %v651_v18, 16 }
  0xf2   : > { %v966_v50 = vrot.slane %v964_v20, 1  ;;  %v4798_v5 = vsel %vm896_vm5, %v976_v58, %v977_v42 }
  0xf5   : > { %2925 = vmatmul.mubr.msk.bf16.gmra.mrb[96].mxu1 %vm3963_vm4, %v4404_v62 }
  0xf6   : > { %2026 = vmatmul.mubr.bf16.gmra.mrb[96].mxu0 %v5302_v8  ;;  %2130 = vmatprep.mubr.bf16.mxu1 %v5295_v4  ;;  %v5304_v4 = vld [vmem:[#allocation10_spill] sm:$0xff] }
  0xf7   : > { %2033 = vmatprep.mubr.bf16.mxu0 %v4732_v32 }
  0xfd   : > { %2928 = vmatmul.mubr.msk.bf16.gmra.mrb[100].mxu1 %vm3963_vm4, %v4459_v51  ;;  %v969_v51 = vshll.u32 %v652_v55, 16 }
  0xfe   : > { %2034 = vmatmul.mubr.bf16.gmra.mrb[100].mxu0 %v5303_v14  ;;  %2138 = vmatprep.mubr.bf16.mxu1 %v5296_v7  ;;  %v967_v7 = vor.u32 %v966_v50, %v962_v47 }
  0xff   : > { %2041 = vmatprep.mubr.bf16.mxu0 %v4611_v13  ;;  %v971_v25 = vrot.slane %v969_v51, 1 }
 0x101   : > { %v3173_v31 = vpop.f32.mrb[0].mxu0  ;;  %v3245_v22 = vpop.f32.mrb[0].mxu1  ;;  %v4811_v34 = vsel %vm655_vm2, %v967_v7, %v971_v25 }
 0x102   : > { %v3174_v38 = vpop.f32.mrb[1].mxu0  ;;  %v3246_v12 = vpop.f32.mrb[1].mxu1 }
 0x103   : > { %v4784_v44 = vadd.f32 %v3174_v38, %v3173_v31  ;;  %v3176_v62 = vpop.f32.mrb[2].mxu0  ;;  %v4791_v60 = vadd.f32 %v3246_v12, %v3245_v22  ;;  %v3248_v49 = vpop.f32.mrb[2].mxu1 }
 0x104   : > { %v3177_v45 = vpop.f32.mrb[3].mxu0  ;;  %v3249_v43 = vpop.f32.mrb[3].mxu1 }
 0x105   : > { %v4793_v46 = vadd.f32 %v3177_v45, %v3176_v62  ;;  %v4795_v52 = vadd.f32 %v3249_v43, %v3248_v49  ;;  %2931 = vmatmul.mubr.msk.bf16.gmra.mrb[104].mxu1 %vm3963_vm4, %v4532_v37 }
 0x106   : > { %2042 = vmatmul.mubr.bf16.gmra.mrb[104].mxu0 %v5304_v4  ;;  %2146 = vmatprep.mubr.bf16.mxu1 %v4547_v28 }
 0x107   : > { %2049 = vmatprep.mubr.bf16.mxu0 %v4798_v5 }
 0x109   : > { %v3179_v54 = vpop.f32.mrb[4].mxu0  ;;  %v3251_v63 = vpop.f32.mrb[4].mxu1 }
 0x10a   : > { %v3180_v19 = vpop.f32.mrb[5].mxu0  ;;  %v3252_v2 = vpop.f32.mrb[5].mxu1 }
 0x10b   : > { %v4806_v10 = vadd.f32 %v3180_v19, %v3179_v54  ;;  %v3182_v56 = vpop.f32.mrb[6].mxu0  ;;  %v4813_v17 = vadd.f32 %v3252_v2, %v3251_v63  ;;  %v3254_v37 = vpop.f32.mrb[6].mxu1 }
 0x10c   : > { %v3183_v3 = vpop.f32.mrb[7].mxu0  ;;  %v3255_v18 = vpop.f32.mrb[7].mxu1 }
 0x10d   : > { %v4808_v41 = vadd.f32 %v3183_v3, %v3182_v56  ;;  %v4815_v31 = vadd.f32 %v3255_v18, %v3254_v37  ;;  %2934 = vmatmul.mubr.msk.bf16.gmra.mrb[108].mxu1 %vm3963_vm4, %v4571_v24 }
 0x10e   : > { %2050 = vmatmul.mubr.bf16.gmra.mrb[108].mxu0 %v4811_v34  ;;  %2154 = vmatprep.mubr.bf16.mxu1 %v4585_v27 }
 0x10f   : > { %3645 = vmatprep.mubr.bf16.mxu0 %v4410_v53 }
 0x111   : > { %v3185_v28 = vpop.f32.mrb[8].mxu0 }
 0x112   : > { %v3186_v55 = vpop.f32.mrb[9].mxu0 }
 0x113   : > { %v4823_v38 = vadd.f32 %v3186_v55, %v3185_v28  ;;  %v3188_v22 = vpop.f32.mrb[10].mxu0 }
 0x114   : > { %v3189_v62 = vpop.f32.mrb[11].mxu0 }
 0x115   : > { %v4825_v12 = vadd.f32 %v3189_v62, %v3188_v22  ;;  %v3257_v45 = vpop.f32.mrb[8].mxu1  ;;  %2937 = vmatmul.mubr.msk.bf16.gmra.mrb[112].mxu1 %vm3963_vm4, %v4601_v57 }
 0x116   : > { %3646 = vmatmul.mubr.bf16.vlgmr.msra.gmra.mrb[112].mxu0 %v4474_v15  ;;  %v3258_v24 = vpop.f32.mrb[9].mxu1  ;;  %2162 = vmatprep.mubr.bf16.mxu1 %v4608_v11 }
 0x117   : > { %3649 = vmatprep.mubr.bf16.mxu0 %v4537_v59  ;;  %v4832_v53 = vadd.f32 %v3258_v24, %v3257_v45  ;;  %v3260_v27 = vpop.f32.mrb[10].mxu1 }
 0x118   : > { %v3261_v20 = vpop.f32.mrb[11].mxu1 }
 0x119   : > { %v4835_v49 = vadd.f32 %v3261_v20, %v3260_v27 }
 0x11d   : > { %v3191_v58 = vpop.f32.mrb[12].mxu0  ;;  %2940 = vmatmul.mubr.msk.bf16.gmra.mrb[116].mxu1 %vm3963_vm4, %v4623_v21 }
 0x11e   : > { %v3192_v42 = vpop.f32.mrb[13].mxu0  ;;  %3650 = vmatmul.mubr.bf16.gmra.mrb[116].mxu0 %v4582_v36  ;;  %2170 = vmatprep.mubr.bf16.mxu1 %v5300_v26 }
 0x11f   : > { %v4838_v15 = vadd.f32 %v3192_v42, %v3191_v58  ;;  %v3194_v43 = vpop.f32.mrb[14].mxu0  ;;  %3653 = vmatprep.mubr.bf16.mxu0 %v4605_v33 }
 0x120   : > { %v3195_v59 = vpop.f32.mrb[15].mxu0  ;;  %v3263_v11 = vpop.f32.mrb[12].mxu1 }
 0x121   : > { %v4844_v57 = vadd.f32 %v3195_v59, %v3194_v43  ;;  %v3264_v47 = vpop.f32.mrb[13].mxu1 }
 0x122   : > { %v4847_v50 = vadd.f32 %v3264_v47, %v3263_v11  ;;  %v3266_v51 = vpop.f32.mrb[14].mxu1 }
 0x123   : > { %v3267_v36 = vpop.f32.mrb[15].mxu1 }
 0x124   : > { %v4849_v54 = vadd.f32 %v3267_v36, %v3266_v51 }
 0x125   : > { %2943 = vmatmul.mubr.msk.bf16.gmra.mrb[120].mxu1 %vm3963_vm4, %v3951_v9 }
 0x126   : > { %3654 = vmatmul.mubr.bf16.gmra.mrb[120].mxu0 %v4626_v39  ;;  %2178 = vmatprep.mubr.bf16.mxu1 %v5302_v8 }
 0x127   : > { %3657 = vmatprep.mubr.bf16.mxu0 %v4639_v30 }
 0x128   : > { %v3285_v21 = vpop.f32.mrb[16].mxu1 }
 0x129   : > { %v3197_v33 = vpop.f32.mrb[16].mxu0  ;;  %v3286_v25 = vpop.f32.mrb[17].mxu1 }
 0x12a   : > { %v3198_v26 = vpop.f32.mrb[17].mxu0  ;;  %v3287_v56 = vadd.f32 %v3286_v25, %v3285_v21  ;;  %v3288_v63 = vpop.f32.mrb[18].mxu1 }
 0x12b   : > { %v4857_v7 = vadd.f32 %v3198_v26, %v3197_v33  ;;  %v3200_v19 = vpop.f32.mrb[18].mxu0  ;;  %v3289_v39 = vpop.f32.mrb[19].mxu1 }
 0x12c   : > { %v3201_v3 = vpop.f32.mrb[19].mxu0  ;;  %v4862_v37 = vadd.f32 %v3287_v56, %v4784_v44  ;;  %v3290_v9 = vadd.f32 %v3289_v39, %v3288_v63  ;;  %v5305_v63 = vld [vmem:[#allocation2_spill] sm:$0xff] }
 0x12d   : > { %v4859_v2 = vadd.f32 %v3201_v3, %v3200_v19  ;;  %2946 = vmatmul.mubr.msk.bf16.gmra.mrb[124].mxu1 %vm3963_vm4, %v3990_v35 }
 0x12e   : > { %3658 = vmatmul.mubr.bf16.gmra.mrb[124].mxu0 %v4657_v6  ;;  %v4870_v30 = vadd.f32 %v3290_v9, %v4793_v46  ;;  %2186 = vmatprep.mubr.bf16.mxu1 %v5303_v14 }
 0x12f   : > { %3661 = vmatprep.mubr.bf16.mxu0 %v4674_v40 }
 0x130   : > { %v3291_v18 = vpop.f32.mrb[20].mxu1 }
 0x131   : > { %v3203_v8 = vpop.f32.mrb[20].mxu0  ;;  %v3292_v44 = vpop.f32.mrb[21].mxu1 }
 0x132   : > { %v3204_v28 = vpop.f32.mrb[21].mxu0  ;;  %v3293_v62 = vadd.f32 %v3292_v44, %v3291_v18  ;;  %v3294_v6 = vpop.f32.mrb[22].mxu1 }
 0x133   : > { %v4873_v55 = vadd.f32 %v3204_v28, %v3203_v8  ;;  %v3206_v22 = vpop.f32.mrb[22].mxu0  ;;  %v3295_v35 = vpop.f32.mrb[23].mxu1 }
 0x134   : > { %v3207_v45 = vpop.f32.mrb[23].mxu0  ;;  %v4878_v40 = vadd.f32 %v3293_v62, %v4806_v10  ;;  %v3296_v46 = vadd.f32 %v3295_v35, %v3294_v6  ;;  %v5307_v62 = vmov 0.0|0.0  }
 0x135   : > { %v4875_v24 = vadd.f32 %v3207_v45, %v3206_v22  ;;  %2949 = vmatmul.mubr.msk.bf16.gmra.mrb[128].mxu1 %vm3963_vm4, %v4090_v0 }
 0x136   : > { %3662 = vmatmul.mubr.bf16.gmra.mrb[128].mxu0 %v4691_v1  ;;  %v4886_v14 = vadd.f32 %v3296_v46, %v4808_v41  ;;  %2194 = vmatprep.mubr.bf16.mxu1 %v5304_v4 }
 0x137   : > { %3665 = vmatprep.mubr.bf16.mxu0 %v4706_v61 }
 0x138   : > { %v3297_v20 = vpop.f32.mrb[24].mxu1 }
 0x139   : > { %v3209_v27 = vpop.f32.mrb[24].mxu0  ;;  %v3298_v10 = vpop.f32.mrb[25].mxu1 }
 0x13a   : > { %v3210_v58 = vpop.f32.mrb[25].mxu0  ;;  %v3299_v59 = vadd.f32 %v3298_v10, %v3297_v20  ;;  %v3300_v1 = vpop.f32.mrb[26].mxu1 }
 0x13b   : > { %v4889_v42 = vadd.f32 %v3210_v58, %v3209_v27  ;;  %v3212_v43 = vpop.f32.mrb[26].mxu0  ;;  %v3301_v0 = vpop.f32.mrb[27].mxu1 }
 0x13c   : > { %v3213_v11 = vpop.f32.mrb[27].mxu0  ;;  %v4894_v61 = vadd.f32 %v3299_v59, %v4823_v38  ;;  %v3302_v41 = vadd.f32 %v3301_v0, %v3300_v1 }
 0x13d   : > { %v4891_v47 = vadd.f32 %v3213_v11, %v3212_v43  ;;  %2952 = vmatmul.mubr.msk.bf16.gmra.mrb[132].mxu1 %vm3963_vm4, %v4179_v48 }
 0x13e   : > { %3666 = vmatmul.mubr.bf16.gmra.mrb[132].mxu0 %v4719_v23  ;;  %v4902_v4 = vadd.f32 %v3302_v41, %v4825_v12  ;;  %2202 = vmatprep.mubr.bf16.mxu1 %v4811_v34 }
 0x13f   : > { %3669 = vmatprep.mubr.bf16.mxu0 %v4732_v32 }
 0x140   : > { %v3303_v36 = vpop.f32.mrb[28].mxu1 }
 0x141   : > { %v3215_v51 = vpop.f32.mrb[28].mxu0  ;;  %v3304_v38 = vpop.f32.mrb[29].mxu1 }
 0x142   : > { %v3216_v33 = vpop.f32.mrb[29].mxu0  ;;  %v3305_v25 = vadd.f32 %v3304_v38, %v3303_v36  ;;  %v3306_v23 = vpop.f32.mrb[30].mxu1 }
 0x143   : > { %v4905_v21 = vadd.f32 %v3216_v33, %v3215_v51  ;;  %v3218_v26 = vpop.f32.mrb[30].mxu0  ;;  %v3307_v48 = vpop.f32.mrb[31].mxu1 }
 0x144   : > { %v3219_v19 = vpop.f32.mrb[31].mxu0  ;;  %v4910_v32 = vadd.f32 %v3305_v25, %v4838_v15  ;;  %v3308_v12 = vadd.f32 %v3307_v48, %v3306_v23 }
 0x145   : > { %v4907_v56 = vadd.f32 %v3219_v19, %v3218_v26  ;;  %2955 = vmatmul.mubr.msk.bf16.gmra.mrb[136].mxu1 %vm3963_vm4, %v4734_v29 }
 0x146   : > { %3670 = vmatmul.mubr.bf16.gmra.mrb[136].mxu0 %v4611_v13  ;;  %v4918_v34 = vadd.f32 %v3308_v12, %v4844_v57  ;;  %2210 = vmatprep.mubr.bf16.mxu1 %v5305_v63  ;;  %v5306_v57 = vld [vmem:[#allocation11_spill] sm:$0xff] }
 0x147   : > { %3673 = vmatprep.mubr.bf16.mxu0 %v4798_v5 }
 0x148   : > { %v3309_v39 = vpop.f32.mrb[32].mxu1 }
 0x149   : > { %v3221_v3 = vpop.f32.mrb[32].mxu0  ;;  %v3310_v15 = vpop.f32.mrb[33].mxu1 }
 0x14a   : > { %v3222_v9 = vpop.f32.mrb[33].mxu0  ;;  %v3311_v28 = vadd.f32 %v3310_v15, %v3309_v39  ;;  %v3312_v13 = vpop.f32.mrb[34].mxu1 }
 0x14b   : > { %v4921_v8 = vadd.f32 %v3222_v9, %v3221_v3  ;;  %v3224_v18 = vpop.f32.mrb[34].mxu0  ;;  %v3313_v16 = vpop.f32.mrb[35].mxu1 }
 0x14c   : > { %v3225_v44 = vpop.f32.mrb[35].mxu0  ;;  %v4926_v29 = vadd.f32 %v3311_v28, %v4857_v7  ;;  %v3314_v5 = vadd.f32 %v3313_v16, %v3312_v13 }
 0x14d   : > { %v4923_v22 = vadd.f32 %v3225_v44, %v3224_v18  ;;  %2211 = vmatmul.mubr.bf16.gmra.mrb[140].mxu1 %v5307_v62 }
 0x14e   : > { %3674 = vmatmul.mubr.bf16.gmra.mrb[140].mxu0 %v5306_v57  ;;  %v4931_v6 = vadd.f32 %v3314_v5, %v4859_v2 }
 0x150   : > { %v3315_v35 = vpop.f32.mrb[36].mxu1 }
 0x151   : > { %v3227_v45 = vpop.f32.mrb[36].mxu0  ;;  %v3316_v20 = vpop.f32.mrb[37].mxu1 }
 0x152   : > { %v3228_v46 = vpop.f32.mrb[37].mxu0  ;;  %v3317_v10 = vadd.f32 %v3316_v20, %v3315_v35  ;;  %v3318_v43 = vpop.f32.mrb[38].mxu1 }
 0x153   : > { %v4933_v27 = vadd.f32 %v3228_v46, %v3227_v45  ;;  %v3230_v58 = vpop.f32.mrb[38].mxu0  ;;  %v3319_v1 = vpop.f32.mrb[39].mxu1 }
 0x154   : > { %v3231_v59 = vpop.f32.mrb[39].mxu0  ;;  %v4938_v11 = vadd.f32 %v3317_v10, %v4873_v55  ;;  %v3320_v0 = vadd.f32 %v3319_v1, %v3318_v43 }
 0x155   : > { %v4935_v7 = vadd.f32 %v3231_v59, %v3230_v58 }
 0x156   : > { %v4941_v2 = vadd.f32 %v3320_v0, %v4875_v24 }
 0x158   : > { %v3321_v51 = vpop.f32.mrb[40].mxu1 }
 0x159   : > { %v3233_v41 = vpop.f32.mrb[40].mxu0  ;;  %v3322_v38 = vpop.f32.mrb[41].mxu1 }
 0x15a   : > { %v3234_v36 = vpop.f32.mrb[41].mxu0  ;;  %v3323_v25 = vadd.f32 %v3322_v38, %v3321_v51  ;;  %v3324_v23 = vpop.f32.mrb[42].mxu1 }
 0x15b   : > { %v4943_v33 = vadd.f32 %v3234_v36, %v3233_v41  ;;  %v3236_v26 = vpop.f32.mrb[42].mxu0  ;;  %v3325_v12 = vpop.f32.mrb[43].mxu1 }
 0x15c   : > { %v3237_v19 = vpop.f32.mrb[43].mxu0  ;;  %v4948_v55 = vadd.f32 %v3323_v25, %v4889_v42  ;;  %v3326_v63 = vadd.f32 %v3325_v12, %v3324_v23 }
 0x15d   : > { %v4945_v48 = vadd.f32 %v3237_v19, %v3236_v26 }
 0x15e   : > { %v4951_v24 = vadd.f32 %v3326_v63, %v4891_v47 }
 0x160   : > { %v3327_v39 = vpop.f32.mrb[44].mxu1 }
 0x161   : > { %v3239_v3 = vpop.f32.mrb[44].mxu0  ;;  %v3328_v18 = vpop.f32.mrb[45].mxu1 }
 0x162   : > { %v3240_v9 = vpop.f32.mrb[45].mxu0  ;;  %v3329_v13 = vadd.f32 %v3328_v18, %v3327_v39  ;;  %v3330_v44 = vpop.f32.mrb[46].mxu1 }
 0x163   : > { %v4953_v15 = vadd.f32 %v3240_v9, %v3239_v3  ;;  %v3242_v28 = vpop.f32.mrb[46].mxu0  ;;  %v3331_v57 = vpop.f32.mrb[47].mxu1 }
 0x164   : > { %v3243_v16 = vpop.f32.mrb[47].mxu0  ;;  %v4958_v42 = vadd.f32 %v3329_v13, %v4905_v21  ;;  %v3332_v62 = vadd.f32 %v3331_v57, %v3330_v44 }
 0x165   : > { %v4955_v5 = vadd.f32 %v3243_v16, %v3242_v28 }
 0x166   : > { %v4961_v47 = vadd.f32 %v3332_v62, %v4907_v56 }
 0x168   : > { %v3333_v35 = vpop.f32.mrb[48].mxu1 }
 0x169   : > { %v3397_v45 = vpop.f32.mrb[48].mxu0  ;;  %v3334_v20 = vpop.f32.mrb[49].mxu1 }
 0x16a   : > { %v3398_v46 = vpop.f32.mrb[49].mxu0  ;;  %v3335_v43 = vadd.f32 %v3334_v20, %v3333_v35  ;;  %v3336_v59 = vpop.f32.mrb[50].mxu1 }
 0x16b   : > { %v3399_v58 = vadd.f32 %v3398_v46, %v3397_v45  ;;  %v3400_v10 = vpop.f32.mrb[50].mxu0  ;;  %v3337_v41 = vpop.f32.mrb[51].mxu1 }
 0x16c   : > { %v3401_v1 = vpop.f32.mrb[51].mxu0  ;;  %v4967_v21 = vadd.f32 %v3335_v43, %v4921_v8  ;;  %v3338_v36 = vadd.f32 %v3337_v41, %v3336_v59 }
 0x16d   : > { %v4964_v0 = vadd.f32 %v3399_v58, %v4862_v37  ;;  %v3402_v51 = vadd.f32 %v3401_v1, %v3400_v10 }
 0x16e   : > { %v4973_v38 = vadd.f32 %v3338_v36, %v4923_v22 }
 0x16f   : > { %v4970_v56 = vadd.f32 %v3402_v51, %v4870_v30 }
 0x170   : > { %v3339_v25 = vpop.f32.mrb[52].mxu1 }
 0x171   : > { %v3403_v26 = vpop.f32.mrb[52].mxu0  ;;  %v3340_v19 = vpop.f32.mrb[53].mxu1 }
 0x172   : > { %v3404_v23 = vpop.f32.mrb[53].mxu0  ;;  %v3341_v37 = vadd.f32 %v3340_v19, %v3339_v25  ;;  %v3342_v3 = vpop.f32.mrb[54].mxu1 }
 0x173   : > { %v3405_v12 = vadd.f32 %v3404_v23, %v3403_v26  ;;  %v3406_v63 = vpop.f32.mrb[54].mxu0  ;;  %v3343_v8 = vpop.f32.mrb[55].mxu1 }
 0x174   : > { %v3407_v39 = vpop.f32.mrb[55].mxu0  ;;  %v4979_v30 = vadd.f32 %v3341_v37, %v4933_v27  ;;  %v3344_v28 = vadd.f32 %v3343_v8, %v3342_v3 }
 0x175   : > { %v4976_v9 = vadd.f32 %v3405_v12, %v4878_v40  ;;  %v3408_v18 = vadd.f32 %v3407_v39, %v3406_v63 }
 0x176   : > { %v4985_v13 = vadd.f32 %v3344_v28, %v4935_v7 }
 0x177   : > { %v4982_v22 = vadd.f32 %v3408_v18, %v4886_v14 }
 0x178   : > { %v3345_v16 = vpop.f32.mrb[56].mxu1 }
 0x179   : > { %v3409_v44 = vpop.f32.mrb[56].mxu0  ;;  %v3346_v62 = vpop.f32.mrb[57].mxu1 }
 0x17a   : > { %v3410_v57 = vpop.f32.mrb[57].mxu0  ;;  %v3347_v40 = vadd.f32 %v3346_v62, %v3345_v16  ;;  %v3348_v46 = vpop.f32.mrb[58].mxu1 }
 0x17b   : > { %v3411_v45 = vadd.f32 %v3410_v57, %v3409_v44  ;;  %v3412_v35 = vpop.f32.mrb[58].mxu0  ;;  %v3349_v27 = vpop.f32.mrb[59].mxu1 }
 0x17c   : > { %v3413_v20 = vpop.f32.mrb[59].mxu0  ;;  %v4991_v14 = vadd.f32 %v3347_v40, %v4943_v33  ;;  %v3350_v43 = vadd.f32 %v3349_v27, %v3348_v46 }
 0x17d   : > { %v4988_v58 = vadd.f32 %v3411_v45, %v4894_v61  ;;  %v3414_v10 = vadd.f32 %v3413_v20, %v3412_v35 }
 0x17e   : > { %v4997_v59 = vadd.f32 %v3350_v43, %v4945_v48 }
 0x17f   : > { %v4994_v7 = vadd.f32 %v3414_v10, %v4902_v4 }
 0x180   : > { %v3351_v41 = vpop.f32.mrb[60].mxu1 }
 0x181   : > { %v3415_v1 = vpop.f32.mrb[60].mxu0  ;;  %v3352_v36 = vpop.f32.mrb[61].mxu1 }
 0x182   : > { %v3416_v51 = vpop.f32.mrb[61].mxu0  ;;  %v3353_v61 = vadd.f32 %v3352_v36, %v3351_v41  ;;  %v3354_v23 = vpop.f32.mrb[62].mxu1 }
 0x183   : > { %v3417_v26 = vadd.f32 %v3416_v51, %v3415_v1  ;;  %v3418_v25 = vpop.f32.mrb[62].mxu0  ;;  %v3355_v33 = vpop.f32.mrb[63].mxu1 }
 0x184   : > { %v3419_v19 = vpop.f32.mrb[63].mxu0  ;;  %v5003_v4 = vadd.f32 %v3353_v61, %v4953_v15  ;;  %v3356_v37 = vadd.f32 %v3355_v33, %v3354_v23 }
 0x185   : > { %v5000_v12 = vadd.f32 %v3417_v26, %v4910_v32  ;;  %v3420_v63 = vadd.f32 %v3419_v19, %v3418_v25 }
 0x186   : > { %v5009_v3 = vadd.f32 %v3356_v37, %v4955_v5 }
 0x187   : > { %v5006_v48 = vadd.f32 %v3420_v63, %v4918_v34 }
 0x188   : > { %v3357_v8 = vpop.f32.mrb[64].mxu1 }
 0x189   : > { %v3421_v39 = vpop.f32.mrb[64].mxu0  ;;  %v3358_v28 = vpop.f32.mrb[65].mxu1 }
 0x18a   : > { %v3422_v18 = vpop.f32.mrb[65].mxu0  ;;  %v3359_v32 = vadd.f32 %v3358_v28, %v3357_v8  ;;  %v3360_v57 = vpop.f32.mrb[66].mxu1 }
 0x18b   : > { %v3423_v44 = vadd.f32 %v3422_v18, %v3421_v39  ;;  %v3424_v16 = vpop.f32.mrb[66].mxu0  ;;  %v3361_v15 = vpop.f32.mrb[67].mxu1 }
 0x18c   : > { %v3425_v62 = vpop.f32.mrb[67].mxu0  ;;  %v5015_v34 = vadd.f32 %v3359_v32, %v4791_v60  ;;  %v3362_v40 = vadd.f32 %v3361_v15, %v3360_v57 }
 0x18d   : > { %v5012_v45 = vadd.f32 %v3423_v44, %v4926_v29  ;;  %v3426_v35 = vadd.f32 %v3425_v62, %v3424_v16 }
 0x18e   : > { %v5021_v46 = vadd.f32 %v3362_v40, %v4795_v52 }
 0x18f   : > { %v5018_v5 = vadd.f32 %v3426_v35, %v4931_v6 }
 0x190   : > { %v3363_v27 = vpop.f32.mrb[68].mxu1 }
 0x191   : > { %v3427_v20 = vpop.f32.mrb[68].mxu0  ;;  %v3364_v43 = vpop.f32.mrb[69].mxu1 }
 0x192   : > { %v3428_v10 = vpop.f32.mrb[69].mxu0  ;;  %v3365_v29 = vadd.f32 %v3364_v43, %v3363_v27  ;;  %v3366_v51 = vpop.f32.mrb[70].mxu1 }
 0x193   : > { %v3429_v1 = vadd.f32 %v3428_v10, %v3427_v20  ;;  %v3430_v41 = vpop.f32.mrb[70].mxu0  ;;  %v3367_v60 = vpop.f32.mrb[71].mxu1 }
 0x194   : > { %v3431_v36 = vpop.f32.mrb[71].mxu0  ;;  %v5027_v6 = vadd.f32 %v3365_v29, %v4813_v17  ;;  %v3368_v61 = vadd.f32 %v3367_v60, %v3366_v51 }
 0x195   : > { %v5024_v26 = vadd.f32 %v3429_v1, %v4938_v11  ;;  %v3432_v25 = vadd.f32 %v3431_v36, %v3430_v41 }
 0x196   : > { %v5033_v23 = vadd.f32 %v3368_v61, %v4815_v31 }
 0x197   : > { %v5030_v52 = vadd.f32 %v3432_v25, %v4941_v2 }
 0x198   : > { %v3369_v33 = vpop.f32.mrb[72].mxu1 }
 0x199   : > { %v3433_v19 = vpop.f32.mrb[72].mxu0  ;;  %v3370_v37 = vpop.f32.mrb[73].mxu1 }
 0x19a   : > { %v3434_v63 = vpop.f32.mrb[73].mxu0  ;;  %v3371_v11 = vadd.f32 %v3370_v37, %v3369_v33  ;;  %v3372_v18 = vpop.f32.mrb[74].mxu1 }
 0x19b   : > { %v3435_v39 = vadd.f32 %v3434_v63, %v3433_v19  ;;  %v3436_v8 = vpop.f32.mrb[74].mxu0  ;;  %v3373_v17 = vpop.f32.mrb[75].mxu1 }
 0x19c   : > { %v3437_v28 = vpop.f32.mrb[75].mxu0  ;;  %v5039_v2 = vadd.f32 %v3371_v11, %v4832_v53  ;;  %v3374_v32 = vadd.f32 %v3373_v17, %v3372_v18 }
 0x19d   : > { %v5036_v44 = vadd.f32 %v3435_v39, %v4948_v55  ;;  %v3438_v16 = vadd.f32 %v3437_v28, %v3436_v8 }
 0x19e   : > { %v5045_v57 = vadd.f32 %v3374_v32, %v4835_v49 }
 0x19f   : > { %v5042_v31 = vadd.f32 %v3438_v16, %v4951_v24 }
 0x1a0   : > { %v3375_v15 = vpop.f32.mrb[76].mxu1 }
 0x1a1   : > { %v3439_v62 = vpop.f32.mrb[76].mxu0  ;;  %v3376_v40 = vpop.f32.mrb[77].mxu1 }
 0x1a2   : > { %v3440_v35 = vpop.f32.mrb[77].mxu0  ;;  %v3377_v55 = vadd.f32 %v3376_v40, %v3375_v15  ;;  %v3378_v10 = vpop.f32.mrb[78].mxu1 }
 0x1a3   : > { %v3441_v20 = vadd.f32 %v3440_v35, %v3439_v62  ;;  %v3442_v27 = vpop.f32.mrb[78].mxu0  ;;  %v3379_v53 = vpop.f32.mrb[79].mxu1 }
 0x1a4   : > { %v3443_v43 = vpop.f32.mrb[79].mxu0  ;;  %v5051_v24 = vadd.f32 %v3377_v55, %v4847_v50  ;;  %v3380_v29 = vadd.f32 %v3379_v53, %v3378_v10 }
 0x1a5   : > { %v5048_v1 = vadd.f32 %v3441_v20, %v4958_v42  ;;  %v3444_v41 = vadd.f32 %v3443_v43, %v3442_v27 }
 0x1a6   : > { %v5057_v51 = vadd.f32 %v3380_v29, %v4849_v54 }
 0x1a7   : > { %v5054_v49 = vadd.f32 %v3444_v41, %v4961_v47 }
 0x1a8   : > { %v3509_v60 = vpop.f32.mrb[80].mxu1 }
 0x1a9   : > { %v3445_v36 = vpop.f32.mrb[80].mxu0  ;;  %v3510_v19 = vpop.f32.mrb[81].mxu1 }
 0x1aa   : > { %v3446_v25 = vpop.f32.mrb[81].mxu0  ;;  %v3511_v42 = vadd.f32 %v3510_v19, %v3509_v60  ;;  %v3512_v63 = vpop.f32.mrb[82].mxu1 }
 0x1ab   : > { %v3447_v61 = vadd.f32 %v3446_v25, %v3445_v36  ;;  %v3448_v33 = vpop.f32.mrb[82].mxu0  ;;  %v3513_v8 = vpop.f32.mrb[83].mxu1 }
 0x1ac   : > { %v3449_v37 = vpop.f32.mrb[83].mxu0  ;;  %v3514_v11 = vadd.f32 %v3513_v8, %v3512_v63  ;;  %v5063_v47 = vadd.f32 %v3511_v42, %v4964_v0 }
 0x1ad   : > { %v5060_v39 = vadd.f32 %v3447_v61, %v4967_v21  ;;  %v3450_v50 = vadd.f32 %v3449_v37, %v3448_v33 }
 0x1ae   : > { %v5069_v18 = vadd.f32 %v3514_v11, %v4970_v56 }
 0x1af   : > { %v5066_v54 = vadd.f32 %v3450_v50, %v4973_v38 }
 0x1b0   : > { %v3515_v17 = vpop.f32.mrb[84].mxu1 }
 0x1b1   : > { %v3451_v28 = vpop.f32.mrb[84].mxu0  ;;  %v3516_v62 = vpop.f32.mrb[85].mxu1 }
 0x1b2   : > { %v3452_v16 = vpop.f32.mrb[85].mxu0  ;;  %v3517_v21 = vadd.f32 %v3516_v62, %v3515_v17  ;;  %v3518_v35 = vpop.f32.mrb[86].mxu1 }
 0x1b3   : > { %v3453_v32 = vadd.f32 %v3452_v16, %v3451_v28  ;;  %v3454_v15 = vpop.f32.mrb[86].mxu0  ;;  %v3519_v27 = vpop.f32.mrb[87].mxu1 }
 0x1b4   : > { %v3455_v40 = vpop.f32.mrb[87].mxu0  ;;  %v3520_v55 = vadd.f32 %v3519_v27, %v3518_v35  ;;  %v5075_v38 = vadd.f32 %v3517_v21, %v4976_v9 }
 0x1b5   : > { %v5072_v20 = vadd.f32 %v3453_v32, %v4979_v30  ;;  %v3456_v0 = vadd.f32 %v3455_v40, %v3454_v15 }
 0x1b6   : > { %v5081_v10 = vadd.f32 %v3520_v55, %v4982_v22 }
 0x1b7   : > { %v5078_v56 = vadd.f32 %v3456_v0, %v4985_v13 }
 0x1b8   : > { %v3521_v53 = vpop.f32.mrb[88].mxu1 }
 0x1b9   : > { %v3457_v43 = vpop.f32.mrb[88].mxu0  ;;  %v3522_v36 = vpop.f32.mrb[89].mxu1 }
 0x1ba   : > { %v3458_v41 = vpop.f32.mrb[89].mxu0  ;;  %v3523_v30 = vadd.f32 %v3522_v36, %v3521_v53  ;;  %v3524_v25 = vpop.f32.mrb[90].mxu1 }
 0x1bb   : > { %v3459_v29 = vadd.f32 %v3458_v41, %v3457_v43  ;;  %v3460_v60 = vpop.f32.mrb[90].mxu0  ;;  %v3525_v33 = vpop.f32.mrb[91].mxu1 }
 0x1bc   : > { %v3461_v61 = vpop.f32.mrb[91].mxu0  ;;  %v3526_v42 = vadd.f32 %v3525_v33, %v3524_v25  ;;  %v5087_v13 = vadd.f32 %v3523_v30, %v4988_v58 }
 0x1bd   : > { %v5084_v19 = vadd.f32 %v3459_v29, %v4991_v14  ;;  %v3462_v9 = vadd.f32 %v3461_v61, %v3460_v60 }
 0x1be   : > { %v5093_v63 = vadd.f32 %v3526_v42, %v4994_v7 }
 0x1bf   : > { %v5090_v22 = vadd.f32 %v3462_v9, %v4997_v59 }
 0x1c0   : > { %v3527_v50 = vpop.f32.mrb[92].mxu1 }
 0x1c1   : > { %v3463_v37 = vpop.f32.mrb[92].mxu0  ;;  %v3528_v28 = vpop.f32.mrb[93].mxu1 }
 0x1c2   : > { %v3464_v8 = vpop.f32.mrb[93].mxu0  ;;  %v3529_v14 = vadd.f32 %v3528_v28, %v3527_v50  ;;  %v3530_v16 = vpop.f32.mrb[94].mxu1 }
 0x1c3   : > { %v3465_v11 = vadd.f32 %v3464_v8, %v3463_v37  ;;  %v3466_v17 = vpop.f32.mrb[94].mxu0  ;;  %v3531_v15 = vpop.f32.mrb[95].mxu1 }
 0x1c4   : > { %v3467_v32 = vpop.f32.mrb[95].mxu0  ;;  %v3532_v21 = vadd.f32 %v3531_v15, %v3530_v16  ;;  %v5099_v59 = vadd.f32 %v3529_v14, %v5000_v12 }
 0x1c5   : > { %v5096_v62 = vadd.f32 %v3465_v11, %v5003_v4  ;;  %v3468_v58 = vadd.f32 %v3467_v32, %v3466_v17 }
 0x1c6   : > { %v5105_v35 = vadd.f32 %v3532_v21, %v5006_v48 }
 0x1c7   : > { %v5102_v7 = vadd.f32 %v3468_v58, %v5009_v3 }
 0x1c8   : > { %v3533_v0 = vpop.f32.mrb[96].mxu1 }
 0x1c9   : > { %v3469_v40 = vpop.f32.mrb[96].mxu0  ;;  %v3534_v43 = vpop.f32.mrb[97].mxu1 }
 0x1ca   : > { %v3470_v27 = vpop.f32.mrb[97].mxu0  ;;  %v3535_v4 = vadd.f32 %v3534_v43, %v3533_v0  ;;  %v3536_v41 = vpop.f32.mrb[98].mxu1 }
 0x1cb   : > { %v3471_v55 = vadd.f32 %v3470_v27, %v3469_v40  ;;  %v3472_v53 = vpop.f32.mrb[98].mxu0  ;;  %v3537_v60 = vpop.f32.mrb[99].mxu1 }
 0x1cc   : > { %v3473_v29 = vpop.f32.mrb[99].mxu0  ;;  %v3538_v30 = vadd.f32 %v3537_v60, %v3536_v41  ;;  %v5111_v3 = vadd.f32 %v3535_v4, %v5012_v45 }
 0x1cd   : > { %v5108_v36 = vadd.f32 %v3471_v55, %v5015_v34  ;;  %v3474_v12 = vadd.f32 %v3473_v29, %v3472_v53 }
 0x1ce   : > { %v5117_v25 = vadd.f32 %v3538_v30, %v5018_v5 }
 0x1cf   : > { %v5114_v48 = vadd.f32 %v3474_v12, %v5021_v46 }
 0x1d0   : > { %v3539_v9 = vpop.f32.mrb[100].mxu1 }
 0x1d1   : > { %v3475_v61 = vpop.f32.mrb[100].mxu0  ;;  %v3540_v37 = vpop.f32.mrb[101].mxu1 }
 0x1d2   : > { %v3476_v33 = vpop.f32.mrb[101].mxu0  ;;  %v3541_v34 = vadd.f32 %v3540_v37, %v3539_v9  ;;  %v3542_v8 = vpop.f32.mrb[102].mxu1 }
 0x1d3   : > { %v3477_v42 = vadd.f32 %v3476_v33, %v3475_v61  ;;  %v3478_v50 = vpop.f32.mrb[102].mxu0  ;;  %v3543_v17 = vpop.f32.mrb[103].mxu1 }
 0x1d4   : > { %v3479_v11 = vpop.f32.mrb[103].mxu0  ;;  %v3544_v14 = vadd.f32 %v3543_v17, %v3542_v8  ;;  %v5123_v46 = vadd.f32 %v3541_v34, %v5024_v26 }
 0x1d5   : > { %v5120_v28 = vadd.f32 %v3477_v42, %v5027_v6  ;;  %v3480_v45 = vadd.f32 %v3479_v11, %v3478_v50 }
 0x1d6   : > { %v5129_v16 = vadd.f32 %v3544_v14, %v5030_v52 }
 0x1d7   : > { %v5126_v5 = vadd.f32 %v3480_v45, %v5033_v23 }
 0x1d8   : > { %v3545_v58 = vpop.f32.mrb[104].mxu1 }
 0x1d9   : > { %v3481_v32 = vpop.f32.mrb[104].mxu0  ;;  %v3546_v40 = vpop.f32.mrb[105].mxu1 }
 0x1da   : > { %v3482_v15 = vpop.f32.mrb[105].mxu0  ;;  %v3547_v0 = vadd.f32 %v3546_v40, %v3545_v58  ;;  %v3548_v27 = vpop.f32.mrb[106].mxu1 }
 0x1db   : > { %v3483_v21 = vadd.f32 %v3482_v15, %v3481_v32  ;;  %v3484_v6 = vpop.f32.mrb[106].mxu0  ;;  %v3549_v53 = vpop.f32.mrb[107].mxu1 }
 0x1dc   : > { %v3485_v55 = vpop.f32.mrb[107].mxu0  ;;  %v3550_v23 = vadd.f32 %v3549_v53, %v3548_v27  ;;  %v5135_v4 = vadd.f32 %v3547_v0, %v5036_v44 }
 0x1dd   : > { %v5132_v43 = vadd.f32 %v3483_v21, %v5039_v2  ;;  %v3486_v26 = vadd.f32 %v3485_v55, %v3484_v6 }
 0x1de   : > { %v5142_v41 = vadd.f32 %v3550_v23, %v5042_v31 }
 0x1df   : > { %v5138_v52 = vadd.f32 %v3486_v26, %v5045_v57 }
 0x1e0   : > { %v3551_v12 = vpop.f32.mrb[108].mxu1 }
 0x1e1   : > { %v3487_v29 = vpop.f32.mrb[108].mxu0  ;;  %v3552_v2 = vpop.f32.mrb[109].mxu1 }
 0x1e2   : > { %v3488_v60 = vpop.f32.mrb[109].mxu0  ;;  %v3553_v9 = vadd.f32 %v3552_v2, %v3551_v12  ;;  %v3554_v33 = vpop.f32.mrb[110].mxu1 }
 0x1e3   : > { %v3489_v30 = vadd.f32 %v3488_v60, %v3487_v29  ;;  %v3490_v61 = vpop.f32.mrb[110].mxu0  ;;  %v3555_v57 = vpop.f32.mrb[111].mxu1 }
 0x1e4   : > { %v3491_v42 = vpop.f32.mrb[111].mxu0  ;;  %v3556_v50 = vadd.f32 %v3555_v57, %v3554_v33  ;;  %v5148_v31 = vadd.f32 %v3553_v9, %v5048_v1 }
 0x1e5   : > { %v5145_v44 = vadd.f32 %v3489_v30, %v5051_v24  ;;  %v3492_v37 = vadd.f32 %v3491_v42, %v3490_v61 }
 0x1e6   : > { %v5154_v8 = vadd.f32 %v3556_v50, %v5054_v49 }
 0x1e7   : > { %v5151_v34 = vadd.f32 %v3492_v37, %v5057_v51 }
 0x1e8   : > { %v3557_v45 = vpop.f32.mrb[112].mxu1 }
 0x1e9   : > { %v3647_v11 = vpop.f32.mrb[112].mxu0  ;;  %v3558_v24 = vpop.f32.mrb[113].mxu1 }
 0x1ea   : > { %v2262_v17 = vadd.f32 %v3647_v11, %v5075_v38  ;;  %v2253_v14 = vpop.f32.mrb[113].mxu0  ;;  %v3559_v15 = vadd.f32 %v3558_v24, %v3557_v45  ;;  %v3560_v21 = vpop.f32.mrb[114].mxu1 }
 0x1eb   : > { %v2254_v32 = vadd.f32 %v2253_v14, %v5063_v47  ;;  %v3648_v58 = vpop.f32.mrb[114].mxu0  ;;  %v3561_v49 = vpop.f32.mrb[115].mxu1 }
 0x1ec   : > { %v2265_v1 = vadd.f32 %v3648_v58, %v5081_v10  ;;  %v2256_v40 = vpop.f32.mrb[115].mxu0  ;;  %v3562_v6 = vadd.f32 %v3561_v49, %v3560_v21  ;;  %v5166_v47 = vadd.f32 %v3559_v15, %v5060_v39  ;;  %v2580_v53 = vmul.f32 %v2262_v17, %v2262_v17 }
 0x1ed   : > { %v2257_v51 = vadd.f32 %v2256_v40, %v5069_v18  ;;  %v2578_v0 = vmul.f32 %v2254_v32, %v2254_v32 }
 0x1ee   : > { %v3062_v38 = vpack.c.bf16 %v2265_v1, %v2262_v17  ;;  %v5170_v26 = vadd.f32 %v3562_v6, %v5066_v54  ;;  %v2581_v2 = vmul.f32 %v2265_v1, %v2265_v1 }
 0x1ef   : > { %v3057_v27 = vpack.c.bf16 %v2257_v51, %v2254_v32  ;;  %v2540_v55 = vadd.f32 %v2257_v51, %v2254_v32  ;;  %v2579_v10 = vmul.f32 %v2257_v51, %v2257_v51 }
 0x1f0   : > { %3142 = vst [vmem:[%s5162_s6 + $0x8] sm:$0xff] %v3062_v38   ;;  %v3563_v60 = vpop.f32.mrb[116].mxu1 }
 0x1f1   : > { %3058 = vst [vmem:[%s5162_s6] sm:$0xff] %v3057_v27   ;;  %v2541_v23 = vadd.f32 %v2540_v55, %v2262_v17  ;;  %v2610_v29 = vadd.f32 %v2579_v10, %v2578_v0  ;;  %v3651_v12 = vpop.f32.mrb[116].mxu0  ;;  %v3564_v61 = vpop.f32.mrb[117].mxu1 }
 0x1f2   : > { %v2278_v18 = vadd.f32 %v3651_v12, %v5099_v59  ;;  %v2269_v30 = vpop.f32.mrb[117].mxu0  ;;  %v3565_v37 = vadd.f32 %v3564_v61, %v3563_v60  ;;  %v3566_v54 = vpop.f32.mrb[118].mxu1 }
 0x1f3   : > { %v2611_v39 = vadd.f32 %v2610_v29, %v2580_v53  ;;  %v2270_v9 = vadd.f32 %v2269_v30, %v5087_v13  ;;  %v2542_v33 = vadd.f32 %v2541_v23, %v2265_v1  ;;  %v3652_v42 = vpop.f32.mrb[118].mxu0  ;;  %v3567_v14 = vpop.f32.mrb[119].mxu1 }
 0x1f4   : > { %v2281_v57 = vadd.f32 %v3652_v42, %v5105_v35  ;;  %v2272_v50 = vpop.f32.mrb[119].mxu0  ;;  %v3568_v32 = vadd.f32 %v3567_v14, %v3566_v54  ;;  %v5178_v58 = vadd.f32 %v3565_v37, %v5072_v20  ;;  %v2584_v40 = vmul.f32 %v2278_v18, %v2278_v18 }
 0x1f5   : > { %v2543_v11 = vadd.f32 %v2542_v33, %v2270_v9  ;;  %v2582_v45 = vmul.f32 %v2270_v9, %v2270_v9  ;;  %v2612_v17 = vadd.f32 %v2611_v39, %v2581_v2  ;;  %v2273_v59 = vadd.f32 %v2272_v50, %v5093_v63 }
 0x1f6   : > { %v3072_v24 = vpack.c.bf16 %v2281_v57, %v2278_v18  ;;  %v5182_v35 = vadd.f32 %v3568_v32, %v5078_v56  ;;  %v2585_v27 = vmul.f32 %v2281_v57, %v2281_v57 }
 0x1f7   : > { %v2613_v13 = vadd.f32 %v2612_v17, %v2582_v45  ;;  %v3067_v15 = vpack.c.bf16 %v2273_v59, %v2270_v9  ;;  %v2544_v21 = vadd.f32 %v2543_v11, %v2273_v59  ;;  %v2583_v1 = vmul.f32 %v2273_v59, %v2273_v59 }
 0x1f8   : > { %3144 = vst [vmem:[%s5162_s6 + $0x18] sm:$0xff] %v3072_v24   ;;  %v3569_v6 = vpop.f32.mrb[120].mxu1 }
 0x1f9   : > { %3143 = vst [vmem:[%s5162_s6 + $0x10] sm:$0xff] %v3067_v15   ;;  %v2545_v49 = vadd.f32 %v2544_v21, %v2278_v18  ;;  %v2614_v51 = vadd.f32 %v2613_v13, %v2583_v1  ;;  %v3655_v38 = vpop.f32.mrb[120].mxu0  ;;  %v3570_v55 = vpop.f32.mrb[121].mxu1 }
 0x1fa   : > { %v2294_v63 = vadd.f32 %v3655_v38, %v5123_v46  ;;  %v2285_v0 = vpop.f32.mrb[121].mxu0  ;;  %v3571_v29 = vadd.f32 %v3570_v55, %v3569_v6  ;;  %v3572_v56 = vpop.f32.mrb[122].mxu1 }
 0x1fb   : > { %v2615_v20 = vadd.f32 %v2614_v51, %v2584_v40  ;;  %v2286_v10 = vadd.f32 %v2285_v0, %v5111_v3  ;;  %v2546_v53 = vadd.f32 %v2545_v49, %v2281_v57  ;;  %v3656_v23 = vpop.f32.mrb[122].mxu0  ;;  %v3573_v39 = vpop.f32.mrb[123].mxu1 }
 0x1fc   : > { %v2297_v12 = vadd.f32 %v3656_v23, %v5129_v16  ;;  %v2288_v60 = vpop.f32.mrb[123].mxu0  ;;  %v3574_v9 = vadd.f32 %v3573_v39, %v3572_v56  ;;  %v5190_v33 = vadd.f32 %v3571_v29, %v5084_v19  ;;  %v2588_v57 = vmul.f32 %v2294_v63, %v2294_v63 }
 0x1fd   : > { %v2547_v18 = vadd.f32 %v2546_v53, %v2286_v10  ;;  %v2586_v30 = vmul.f32 %v2286_v10, %v2286_v10  ;;  %v2616_v2 = vadd.f32 %v2615_v20, %v2585_v27  ;;  %v2289_v46 = vadd.f32 %v2288_v60, %v5117_v25 }
 0x1fe   : > { %v3082_v61 = vpack.c.bf16 %v2297_v12, %v2294_v63  ;;  %v5194_v16 = vadd.f32 %v3574_v9, %v5090_v22  ;;  %v2589_v59 = vmul.f32 %v2297_v12, %v2297_v12 }
 0x1ff   : > { %v2617_v3 = vadd.f32 %v2616_v2, %v2586_v30  ;;  %v3077_v42 = vpack.c.bf16 %v2289_v46, %v2286_v10  ;;  %v2548_v37 = vadd.f32 %v2547_v18, %v2289_v46  ;;  %v2587_v54 = vmul.f32 %v2289_v46, %v2289_v46 }
 0x200   : > { %3146 = vst [vmem:[%s5162_s6 + $0x28] sm:$0xff] %v3082_v61   ;;  %v3575_v17 = vpop.f32.mrb[124].mxu1 }
 0x201   : > { %3145 = vst [vmem:[%s5162_s6 + $0x20] sm:$0xff] %v3077_v42   ;;  %v2549_v50 = vadd.f32 %v2548_v37, %v2294_v63  ;;  %v2618_v11 = vadd.f32 %v2617_v3, %v2587_v54  ;;  %v3659_v45 = vpop.f32.mrb[124].mxu0  ;;  %v3576_v24 = vpop.f32.mrb[125].mxu1 }
 0x202   : > { %v2310_v25 = vadd.f32 %v3659_v45, %v5148_v31  ;;  %v2301_v14 = vpop.f32.mrb[125].mxu0  ;;  %v3577_v21 = vadd.f32 %v3576_v24, %v3575_v17  ;;  %v3578_v22 = vpop.f32.mrb[126].mxu1 }
 0x203   : > { %v2619_v19 = vadd.f32 %v2618_v11, %v2588_v57  ;;  %v2302_v32 = vadd.f32 %v2301_v14, %v5135_v4  ;;  %v2550_v13 = vadd.f32 %v2549_v50, %v2297_v12  ;;  %v3660_v15 = vpop.f32.mrb[126].mxu0  ;;  %v3579_v6 = vpop.f32.mrb[127].mxu1 }
 0x204   : > { %v2313_v1 = vadd.f32 %v3660_v15, %v5154_v8  ;;  %v2304_v40 = vpop.f32.mrb[127].mxu0  ;;  %v3580_v0 = vadd.f32 %v3579_v6, %v3578_v22  ;;  %v2181_v27 = vadd.f32 %v3577_v21, %v5096_v62  ;;  %v2592_v8 = vmul.f32 %v2310_v25, %v2310_v25 }
 0x205   : > { %v2551_v49 = vadd.f32 %v2550_v13, %v2302_v32  ;;  %v2590_v51 = vmul.f32 %v2302_v32, %v2302_v32  ;;  %v2620_v38 = vadd.f32 %v2619_v19, %v2589_v59  ;;  %v2305_v31 = vadd.f32 %v2304_v40, %v5142_v41 }
 0x206   : > { %v3092_v63 = vpack.c.bf16 %v2313_v1, %v2310_v25  ;;  %v2184_v53 = vadd.f32 %v3580_v0, %v5102_v7  ;;  %v2593_v18 = vmul.f32 %v2313_v1, %v2313_v1 }
 0x207   : > { %v2621_v4 = vadd.f32 %v2620_v38, %v2590_v51  ;;  %v3087_v20 = vpack.c.bf16 %v2305_v31, %v2302_v32  ;;  %v2552_v55 = vadd.f32 %v2551_v49, %v2305_v31  ;;  %v2591_v10 = vmul.f32 %v2305_v31, %v2305_v31 }
 0x208   : > { %3148 = vst [vmem:[%s5162_s6 + $0x38] sm:$0xff] %v3092_v63   ;;  %v3581_v12 = vpop.f32.mrb[128].mxu1 }
 0x209   : > { %3147 = vst [vmem:[%s5162_s6 + $0x30] sm:$0xff] %v3087_v20   ;;  %v2553_v23 = vadd.f32 %v2552_v55, %v2310_v25  ;;  %v2622_v29 = vadd.f32 %v2621_v4, %v2591_v10  ;;  %v3663_v56 = vpop.f32.mrb[128].mxu0  ;;  %v3582_v2 = vpop.f32.mrb[129].mxu1 }
 0x20a   : > { %v2326_v60 = vadd.f32 %v3663_v56, %v5178_v58  ;;  %v2317_v41 = vpop.f32.mrb[129].mxu0  ;;  %v3583_v61 = vadd.f32 %v3582_v2, %v3581_v12  ;;  %v3584_v9 = vpop.f32.mrb[130].mxu1 }
 0x20b   : > { %v2623_v30 = vadd.f32 %v2622_v29, %v2592_v8  ;;  %v2318_v62 = vadd.f32 %v2317_v41, %v5166_v47  ;;  %v2554_v39 = vadd.f32 %v2553_v23, %v2313_v1  ;;  %v3664_v46 = vpop.f32.mrb[130].mxu0  ;;  %v3585_v57 = vpop.f32.mrb[131].mxu1 }
 0x20c   : > { %v2329_v7 = vadd.f32 %v3664_v46, %v5182_v35  ;;  %v2320_v3 = vpop.f32.mrb[131].mxu0  ;;  %v3586_v11 = vadd.f32 %v3585_v57, %v3584_v9  ;;  %v2189_v45 = vadd.f32 %v3583_v61, %v5108_v36  ;;  %v2596_v35 = vmul.f32 %v2326_v60, %v2326_v60 }
 0x20d   : > { %v2555_v42 = vadd.f32 %v2554_v39, %v2318_v62  ;;  %v2594_v37 = vmul.f32 %v2318_v62, %v2318_v62  ;;  %v2624_v54 = vadd.f32 %v2623_v30, %v2593_v18  ;;  %v2321_v58 = vadd.f32 %v2320_v3, %v5170_v26 }
 0x20e   : > { %v3102_v50 = vpack.c.bf16 %v2329_v7, %v2326_v60  ;;  %v2192_v59 = vadd.f32 %v3586_v11, %v5114_v48  ;;  %v2597_v26 = vmul.f32 %v2329_v7, %v2329_v7 }
 0x20f   : > { %v2625_v47 = vadd.f32 %v2624_v54, %v2594_v37  ;;  %v3097_v17 = vpack.c.bf16 %v2321_v58, %v2318_v62  ;;  %v2556_v25 = vadd.f32 %v2555_v42, %v2321_v58  ;;  %v2595_v14 = vmul.f32 %v2321_v58, %v2321_v58 }
 0x210   : > { %3150 = vst [vmem:[%s5162_s6 + $0x48] sm:$0xff] %v3102_v50   ;;  %v3587_v13 = vpop.f32.mrb[132].mxu1 }
 0x211   : > { %3149 = vst [vmem:[%s5162_s6 + $0x40] sm:$0xff] %v3097_v17   ;;  %v2557_v19 = vadd.f32 %v2556_v25, %v2326_v60  ;;  %v2626_v24 = vadd.f32 %v2625_v47, %v2595_v14  ;;  %v3667_v32 = vpop.f32.mrb[132].mxu0  ;;  %v3588_v1 = vpop.f32.mrb[133].mxu1 }
 0x212   : > { %v2342_v15 = vadd.f32 %v3667_v32, %v2181_v27  ;;  %v2333_v21 = vpop.f32.mrb[133].mxu0  ;;  %v3589_v51 = vadd.f32 %v3588_v1, %v3587_v13  ;;  %v3590_v38 = vpop.f32.mrb[134].mxu1 }
 0x213   : > { %v2627_v22 = vadd.f32 %v2626_v24, %v2596_v35  ;;  %v2334_v36 = vadd.f32 %v2333_v21, %v5190_v33  ;;  %v2558_v40 = vadd.f32 %v2557_v19, %v2329_v7  ;;  %v3668_v49 = vpop.f32.mrb[134].mxu0  ;;  %v3591_v4 = vpop.f32.mrb[135].mxu1 }
 0x214   : > { %v2345_v6 = vadd.f32 %v3668_v49, %v2184_v53  ;;  %v2336_v48 = vpop.f32.mrb[135].mxu0  ;;  %v3592_v55 = vadd.f32 %v3591_v4, %v3590_v38  ;;  %v2197_v10 = vadd.f32 %v3589_v51, %v5120_v28  ;;  %v2600_v53 = vmul.f32 %v2342_v15, %v2342_v15 }
 0x215   : > { %v2559_v31 = vadd.f32 %v2558_v40, %v2334_v36  ;;  %v2598_v63 = vmul.f32 %v2334_v36, %v2334_v36  ;;  %v2628_v0 = vadd.f32 %v2627_v22, %v2597_v26  ;;  %v2337_v27 = vadd.f32 %v2336_v48, %v5194_v16 }
 0x216   : > { %v3112_v20 = vpack.c.bf16 %v2345_v6, %v2342_v15  ;;  %v2200_v56 = vadd.f32 %v3592_v55, %v5126_v5  ;;  %v2601_v16 = vmul.f32 %v2345_v6, %v2345_v6 }
 0x217   : > { %v2629_v8 = vadd.f32 %v2628_v0, %v2598_v63  ;;  %v3107_v33 = vpack.c.bf16 %v2337_v27, %v2334_v36  ;;  %v2560_v23 = vadd.f32 %v2559_v31, %v2337_v27  ;;  %v2599_v29 = vmul.f32 %v2337_v27, %v2337_v27 }
 0x218   : > { %3152 = vst [vmem:[%s5162_s6 + $0x58] sm:$0xff] %v3112_v20   ;;  %v3593_v18 = vpop.f32.mrb[136].mxu1 }
 0x219   : > { %3151 = vst [vmem:[%s5162_s6 + $0x50] sm:$0xff] %v3107_v33   ;;  %v2561_v12 = vadd.f32 %v2560_v23, %v2342_v15  ;;  %v2630_v60 = vadd.f32 %v2629_v8, %v2599_v29  ;;  %v3671_v41 = vpop.f32.mrb[136].mxu0  ;;  %v3594_v39 = vpop.f32.mrb[137].mxu1 }
 0x21a   : > { %v2358_v30 = vadd.f32 %v3671_v41, %v2197_v10  ;;  %v2349_v2 = vpop.f32.mrb[137].mxu0  ;;  %v3595_v9 = vadd.f32 %v3594_v39, %v3593_v18  ;;  %v3596_v7 = vpop.f32.mrb[138].mxu1 }
 0x21b   : > { %v2631_v62 = vadd.f32 %v2630_v60, %v2600_v53  ;;  %v2350_v46 = vadd.f32 %v2349_v2, %v2189_v45  ;;  %v2562_v28 = vadd.f32 %v2561_v12, %v2345_v6  ;;  %v3672_v61 = vpop.f32.mrb[138].mxu0  ;;  %v3597_v57 = vpop.f32.mrb[139].mxu1 }
 0x21c   : > { %v2361_v3 = vadd.f32 %v3672_v61, %v2200_v56  ;;  %v2352_v42 = vpop.f32.mrb[139].mxu0  ;;  %v3598_v11 = vadd.f32 %v3597_v57, %v3596_v7  ;;  %v2205_v47 = vadd.f32 %v3595_v9, %v5132_v43  ;;  %v2604_v19 = vmul.f32 %v2358_v30, %v2358_v30 }
 0x21d   : > { %v2563_v5 = vadd.f32 %v2562_v28, %v2350_v46  ;;  %v2602_v37 = vmul.f32 %v2350_v46, %v2350_v46  ;;  %v2632_v54 = vadd.f32 %v2631_v62, %v2601_v16  ;;  %v2353_v58 = vadd.f32 %v2352_v42, %v2192_v59 }
 0x21e   : > { %v3122_v50 = vpack.c.bf16 %v2361_v3, %v2358_v30  ;;  %v2208_v35 = vadd.f32 %v3598_v11, %v5138_v52  ;;  %v2605_v26 = vmul.f32 %v2361_v3, %v2361_v3 }
 0x21f   : > { %v2633_v17 = vadd.f32 %v2632_v54, %v2602_v37  ;;  %v3117_v25 = vpack.c.bf16 %v2353_v58, %v2350_v46  ;;  %v2564_v45 = vadd.f32 %v2563_v5, %v2353_v58  ;;  %v2603_v14 = vmul.f32 %v2353_v58, %v2353_v58 }
 0x220   : > { %3154 = vst [vmem:[%s5162_s6 + $0x68] sm:$0xff] %v3122_v50   ;;  %v3599_v15 = vpop.f32.mrb[140].mxu1 }
 0x221   : > { %3153 = vst [vmem:[%s5162_s6 + $0x60] sm:$0xff] %v3117_v25   ;;  %v2565_v24 = vadd.f32 %v2564_v45, %v2358_v30  ;;  %v2634_v32 = vadd.f32 %v2633_v17, %v2603_v14  ;;  %v3675_v13 = vpop.f32.mrb[140].mxu0  ;;  %v3600_v22 = vpop.f32.mrb[141].mxu1 }
 0x222   : > { %v2365_v21 = vpop.f32.mrb[141].mxu0  ;;  %v3601_v40 = vadd.f32 %v3600_v22, %v3599_v15  ;;  %v3602_v49 = vpop.f32.mrb[142].mxu1 }
 0x223   : > { %v2635_v59 = vadd.f32 %v2634_v32, %v2604_v19  ;;  %v2366_v1 = vadd.f32 %v2365_v21, %v2205_v47  ;;  %v2566_v36 = vadd.f32 %v2565_v24, %v2361_v3  ;;  %v3676_v43 = vpop.f32.mrb[142].mxu0  ;;  %v3603_v48 = vpop.f32.mrb[143].mxu1 }
 0x224   : > { %v2368_v51 = vpop.f32.mrb[143].mxu0  ;;  %v2213_v63 = vadd.f32 %v3601_v40, %v5145_v44  ;;  %v3604_v0 = vadd.f32 %v3603_v48, %v3602_v49 }
 0x225   : > { %v2567_v38 = vadd.f32 %v2566_v36, %v2366_v1  ;;  %v2606_v6 = vmul.f32 %v2366_v1, %v2366_v1  ;;  %v2636_v52 = vadd.f32 %v2635_v59, %v2605_v26  ;;  %v2369_v31 = vadd.f32 %v2368_v51, %v2208_v35 }
 0x226   : > { %v2374_v10 = vadd.f32 %v3675_v13, %v2213_v63  ;;  %v2216_v8 = vadd.f32 %v3604_v0, %v5151_v34 }
 0x227   : > { %v2637_v4 = vadd.f32 %v2636_v52, %v2606_v6  ;;  %v3127_v27 = vpack.c.bf16 %v2369_v31, %v2366_v1  ;;  %v2568_v20 = vadd.f32 %v2567_v38, %v2369_v31  ;;  %v2607_v55 = vmul.f32 %v2369_v31, %v2369_v31 }
 0x228   : > { %v2608_v23 = vmul.f32 %v2374_v10, %v2374_v10  ;;  %v2377_v29 = vadd.f32 %v3676_v43, %v2216_v8 }
 0x229   : > { %3155 = vst [vmem:[%s5162_s6 + $0x70] sm:$0xff] %v3127_v27   ;;  %v2638_v33 = vadd.f32 %v2637_v4, %v2607_v55  ;;  %v2569_v56 = vadd.f32 %v2568_v20, %v2374_v10 }
 0x22a   : > { %v3132_v53 = vpack.c.bf16 %v2377_v29, %v2374_v10  ;;  %v2609_v12 = vmul.f32 %v2377_v29, %v2377_v29 }
 0x22b   : > { %v2570_v60 = vadd.f32 %v2569_v56, %v2377_v29  ;;  %v2639_v41 = vadd.f32 %v2638_v33, %v2608_v23 }
 0x22c   : > { %3156 = vst [vmem:[%s5162_s6 + $0x78] sm:$0xff] %v3132_v53  }
 0x22d   : > { %v2571_v44 = vrot.slane %v2570_v60, 4  ;;  %v2640_v18 = vadd.f32 %v2639_v41, %v2609_v12 }
 0x22f   : > { %v2572_v30 = vadd.f32 %v2571_v44, %v2570_v60  ;;  %v2641_v2 = vrot.slane %v2640_v18, 4 }
 0x231   : > { %v2573_v16 = vrot.slane %v2572_v30, 2  ;;  %v2642_v62 = vadd.f32 %v2641_v2, %v2640_v18 }
 0x233   : > { %v2574_v39 = vadd.f32 %v2573_v16, %v2572_v30  ;;  %v2643_v34 = vrot.slane %v2642_v62, 2 }
 0x235   : > { %v2575_v46 = vrot.slane %v2574_v39, 1  ;;  %v2644_v28 = vadd.f32 %v2643_v34, %v2642_v62 }
 0x237   : > { %v2576_v61 = vadd.f32 %v2575_v46, %v2574_v39  ;;  %v2645_v9 = vrot.slane %v2644_v28, 1 }
 0x239   : > { %2577 = vst [vmem:[%s236_s10] sm:$0x1] %v2576_v61  ;;  %v2646_v7 = vadd.f32 %v2645_v9, %v2644_v28 }
 0x23b   : > { %2647 = vst [vmem:[%s236_s10 + $0x1] sm:$0x1] %v2646_v7 }
 0x23c PF: > { %s16_s18 = sadd.s32 1, %s3785_s18  }
 0x23d   : > { %p13_p5 = scmp.ge.s32.totalorder %s16_s18, 4  }
 0x23f   :  { %15 = sbr.rel (!%p13_p5) target bundleno = 1 (0x1), region = 78 }

</bundles_post_ra>
